<compile_context>
chip_gen: v7x
topology: tpu7x:2x2x1
jax: 0.10.0
libtpu: 0.0.40
codegen_flags: <defaults>
</compile_context>

<pallas_src>
import functools

import jax
import jax.numpy as jnp
from jax import lax
from jax.experimental import pallas as pl
from jax.experimental.pallas import tpu as pltpu

_NUM_LAYERS = 12   # l1 + 9 skip-block layers + l2 + l3
_NUM_SKIP = 9


def _perceptron(h, w_ref, gamma_ref, beta_ref, mask_ref, *, eps):
    """One PerceptronLayer: Linear (bias folded away) -> BN (batch stats) -> Dropout -> ReLU."""
    # MXU matmul: bf16 operands, f32 accumulation. Weight ref is already (C_in, C_out).
    y = jnp.dot(h.astype(jnp.bfloat16), w_ref[...],
                preferred_element_type=jnp.float32)

    # BatchNorm1d (training mode): one-pass batch stats folded into scale + shift.
    inv_n = 1.0 / y.shape[0]
    mean = jnp.sum(y, axis=0, keepdims=True) * inv_n
    var = jnp.maximum(jnp.sum(y * y, axis=0, keepdims=True) * inv_n - mean * mean, 0.0)
    scale = gamma_ref[...] * lax.rsqrt(var + eps)
    shift = beta_ref[...] - mean * scale
    y = y * scale + shift

    # Dropout (train mode): mask is precomputed, already scaled by 1/(1-p).
    y = y * mask_ref[...]

    # ReLU
    return jnp.maximum(y, 0.0)


def _mlp8_kernel(x_ref, *rest, eps):
    o_ref = rest[-1]
    layer_refs = rest[:-1]
    assert len(layer_refs) == 4 * _NUM_LAYERS
    params = [layer_refs[4 * i:4 * (i + 1)] for i in range(_NUM_LAYERS)]
    layer = functools.partial(_perceptron, eps=eps)

    h = x_ref[...].astype(jnp.float32)

    # l1
    h = layer(h, *params[0])

    # MLPSkipConnections (9 layers): x1 = L0(x); then in = x + x1; x = x1; x1 = Li(in)
    x = h
    x1 = layer(x, *params[1])
    for i in range(2, 1 + _NUM_SKIP):
        x, x1 = x1, layer(x + x1, *params[i])
    h = x1

    # l2, l3
    h = layer(h, *params[1 + _NUM_SKIP])
    h = layer(h, *params[2 + _NUM_SKIP])

    o_ref[...] = h.astype(o_ref.dtype)


def mlp8_forward(x, layer_params, dropout_masks, *, eps=1e-5):
    """Fused MLP8 forward (training-mode BN + dropout).

    x:             (N, in_dim) float array.
    layer_params:  list of 12 tuples (w (C_out, C_in), b (C_out,), gamma (C_out,), beta (C_out,))
                   in module order [l1, skip.layers[0..8], l2, l3]. The Linear bias is
                   accepted but unused: it is exactly cancelled by BatchNorm's mean subtraction.
    dropout_masks: list of 12 arrays (N, C_out) with values in {0, 1/(1-p)}.
    """
    assert len(layer_params) == _NUM_LAYERS and len(dropout_masks) == _NUM_LAYERS
    n = x.shape[0]
    vmem = pl.BlockSpec(memory_space=pltpu.MemorySpace.VMEM)

    flat_inputs = [x.astype(jnp.float32)]
    in_specs = [vmem]
    for (w, _b, gamma, beta), mask in zip(layer_params, dropout_masks):
        c_out, _c_in = w.shape
        # Pre-transpose once on the host so the kernel feeds the MXU a (C_in, C_out)
        # layout directly (no in-kernel .T / relayout); bf16 operands, f32 accumulate.
        flat_inputs.append(jnp.asarray(w, jnp.float32).T.astype(jnp.bfloat16))
        flat_inputs.append(jnp.asarray(gamma, jnp.float32).reshape(1, c_out))
        flat_inputs.append(jnp.asarray(beta, jnp.float32).reshape(1, c_out))
        flat_inputs.append(jnp.asarray(mask, jnp.float32))
        in_specs.extend([vmem, vmem, vmem, vmem])

    c_final = layer_params[-1][0].shape[0]
    kernel = functools.partial(_mlp8_kernel, eps=float(eps))
    return pl.pallas_call(
        kernel,
        out_shape=jax.ShapeDtypeStruct((n, c_final), jnp.float32),
        in_specs=in_specs,
        out_specs=vmem,
    )(*flat_inputs)


if __name__ == "__main__":
    # Scaled-down MLP8 (same structure as the module, small widths):
    #   l1: 40 -> 128 | skip: 8 x (128 -> 128) + (128 -> 64) | l2: 64 -> 32 | l3: 32 -> 71
    N = 16
    IN_DIM = 40                      # 40 * (2K + 1) with K = 0
    HID, SKIP_OUT, L2_OUT, NUM_CLASSES = 128, 64, 32, 71
    DROPOUT_P = 0.5

    dims = ([(IN_DIM, HID)] + [(HID, HID)] * 8 + [(HID, SKIP_OUT)]
            + [(SKIP_OUT, L2_OUT), (L2_OUT, NUM_CLASSES)])
    assert len(dims) == _NUM_LAYERS

    key = jax.random.PRNGKey(0)
    kx, key = jax.random.split(key)
    x = jax.random.normal(kx, (N, IN_DIM), dtype=jnp.float32)

    keep_p = 1.0 - DROPOUT_P
    layer_params, dropout_masks = [], []
    for c_in, c_out in dims:
        kw, kb, km, key = jax.random.split(key, 4)
        bound = 1.0 / (c_in ** 0.5)            # PyTorch Linear init bound
        w = jax.random.uniform(kw, (c_out, c_in), jnp.float32, -bound, bound)
        b = jax.random.uniform(kb, (c_out,), jnp.float32, -bound, bound)
        gamma = jnp.ones((c_out,), jnp.float32)    # BatchNorm1d weight init
        beta = jnp.zeros((c_out,), jnp.float32)    # BatchNorm1d bias init
        layer_params.append((w, b, gamma, beta))
        mask = jax.random.bernoulli(km, keep_p, (N, c_out)).astype(jnp.float32) / keep_p
        dropout_masks.append(mask)

    out = mlp8_forward(x, layer_params, dropout_masks)
    jax.block_until_ready(out)

    assert out.shape == (N, NUM_CLASSES) and out.dtype == jnp.float32
    print("KERNEL_OK")
</pallas_src>

<mosaic_0001>
module attributes {stable_mosaic.version = 11 : i64} {
  func.func @_mlp8_kernel(%arg0: memref<16x40xf32, #tpu.memory_space<vmem>>, %arg1: memref<40x128xbf16, #tpu.memory_space<vmem>>, %arg2: memref<1x128xf32, #tpu.memory_space<vmem>>, %arg3: memref<1x128xf32, #tpu.memory_space<vmem>>, %arg4: memref<16x128xf32, #tpu.memory_space<vmem>>, %arg5: memref<128x128xbf16, #tpu.memory_space<vmem>>, %arg6: memref<1x128xf32, #tpu.memory_space<vmem>>, %arg7: memref<1x128xf32, #tpu.memory_space<vmem>>, %arg8: memref<16x128xf32, #tpu.memory_space<vmem>>, %arg9: memref<128x128xbf16, #tpu.memory_space<vmem>>, %arg10: memref<1x128xf32, #tpu.memory_space<vmem>>, %arg11: memref<1x128xf32, #tpu.memory_space<vmem>>, %arg12: memref<16x128xf32, #tpu.memory_space<vmem>>, %arg13: memref<128x128xbf16, #tpu.memory_space<vmem>>, %arg14: memref<1x128xf32, #tpu.memory_space<vmem>>, %arg15: memref<1x128xf32, #tpu.memory_space<vmem>>, %arg16: memref<16x128xf32, #tpu.memory_space<vmem>>, %arg17: memref<128x128xbf16, #tpu.memory_space<vmem>>, %arg18: memref<1x128xf32, #tpu.memory_space<vmem>>, %arg19: memref<1x128xf32, #tpu.memory_space<vmem>>, %arg20: memref<16x128xf32, #tpu.memory_space<vmem>>, %arg21: memref<128x128xbf16, #tpu.memory_space<vmem>>, %arg22: memref<1x128xf32, #tpu.memory_space<vmem>>, %arg23: memref<1x128xf32, #tpu.memory_space<vmem>>, %arg24: memref<16x128xf32, #tpu.memory_space<vmem>>, %arg25: memref<128x128xbf16, #tpu.memory_space<vmem>>, %arg26: memref<1x128xf32, #tpu.memory_space<vmem>>, %arg27: memref<1x128xf32, #tpu.memory_space<vmem>>, %arg28: memref<16x128xf32, #tpu.memory_space<vmem>>, %arg29: memref<128x128xbf16, #tpu.memory_space<vmem>>, %arg30: memref<1x128xf32, #tpu.memory_space<vmem>>, %arg31: memref<1x128xf32, #tpu.memory_space<vmem>>, %arg32: memref<16x128xf32, #tpu.memory_space<vmem>>, %arg33: memref<128x128xbf16, #tpu.memory_space<vmem>>, %arg34: memref<1x128xf32, #tpu.memory_space<vmem>>, %arg35: memref<1x128xf32, #tpu.memory_space<vmem>>, %arg36: memref<16x128xf32, #tpu.memory_space<vmem>>, %arg37: memref<128x64xbf16, #tpu.memory_space<vmem>>, %arg38: memref<1x64xf32, #tpu.memory_space<vmem>>, %arg39: memref<1x64xf32, #tpu.memory_space<vmem>>, %arg40: memref<16x64xf32, #tpu.memory_space<vmem>>, %arg41: memref<64x32xbf16, #tpu.memory_space<vmem>>, %arg42: memref<1x32xf32, #tpu.memory_space<vmem>>, %arg43: memref<1x32xf32, #tpu.memory_space<vmem>>, %arg44: memref<16x32xf32, #tpu.memory_space<vmem>>, %arg45: memref<32x71xbf16, #tpu.memory_space<vmem>>, %arg46: memref<1x71xf32, #tpu.memory_space<vmem>>, %arg47: memref<1x71xf32, #tpu.memory_space<vmem>>, %arg48: memref<16x71xf32, #tpu.memory_space<vmem>>, %arg49: memref<16x71xf32, #tpu.memory_space<vmem>>) attributes {dimension_semantics = [], scalar_prefetch = 0 : i64, scratch_operands = 0 : i64, tpu.core_type = #tpu.core_type<tc>} {
    %c0 = arith.constant 0 : index
    %c0_0 = arith.constant 0 : index
    %0 = vector.load %arg0[%c0, %c0_0] : memref<16x40xf32, #tpu.memory_space<vmem>>, vector<16x40xf32>
    %1 = arith.truncf %0 : vector<16x40xf32> to vector<16x40xbf16>
    %c0_1 = arith.constant 0 : index
    %c0_2 = arith.constant 0 : index
    %2 = vector.load %arg1[%c0_1, %c0_2] : memref<40x128xbf16, #tpu.memory_space<vmem>>, vector<40x128xbf16>
    %cst = arith.constant dense<0.000000e+00> : vector<16x128xf32>
    %3 = tpu.matmul %1, %2, %cst {dimension_numbers = #tpu.dot_dimension_numbers<[1], [0], [0], [1], [0, 0, 1, 1], [], []>} : vector<16x40xbf16>, vector<40x128xbf16>, vector<16x128xf32> -> vector<16x128xf32>
    %cst_3 = arith.constant dense<0.000000e+00> : vector<128xf32>
    %4 = vector.multi_reduction <add>, %3, %cst_3 [0] : vector<16x128xf32> to vector<128xf32>
    %5 = vector.shape_cast %4 : vector<128xf32> to vector<1x128xf32>
    %cst_4 = arith.constant 6.250000e-02 : f32
    %6 = vector.broadcast %cst_4 : f32 to vector<1x128xf32>
    %7 = arith.mulf %5, %6 : vector<1x128xf32>
    %8 = arith.mulf %3, %3 : vector<16x128xf32>
    %cst_5 = arith.constant dense<0.000000e+00> : vector<128xf32>
    %9 = vector.multi_reduction <add>, %8, %cst_5 [0] : vector<16x128xf32> to vector<128xf32>
    %10 = vector.shape_cast %9 : vector<128xf32> to vector<1x128xf32>
    %cst_6 = arith.constant 6.250000e-02 : f32
    %11 = vector.broadcast %cst_6 : f32 to vector<1x128xf32>
    %12 = arith.mulf %10, %11 : vector<1x128xf32>
    %13 = arith.mulf %7, %7 : vector<1x128xf32>
    %14 = arith.subf %12, %13 : vector<1x128xf32>
    %cst_7 = arith.constant 0.000000e+00 : f32
    %15 = vector.broadcast %cst_7 : f32 to vector<1x128xf32>
    %16 = arith.maximumf %14, %15 : vector<1x128xf32>
    %c0_8 = arith.constant 0 : index
    %c0_9 = arith.constant 0 : index
    %17 = vector.load %arg2[%c0_8, %c0_9] : memref<1x128xf32, #tpu.memory_space<vmem>>, vector<1x128xf32>
    %cst_10 = arith.constant 9.99999974E-6 : f32
    %18 = vector.broadcast %cst_10 : f32 to vector<1x128xf32>
    %19 = arith.addf %16, %18 : vector<1x128xf32>
    %20 = math.rsqrt %19 : vector<1x128xf32>
    %21 = arith.mulf %17, %20 : vector<1x128xf32>
    %c0_11 = arith.constant 0 : index
    %c0_12 = arith.constant 0 : index
    %22 = vector.load %arg3[%c0_11, %c0_12] : memref<1x128xf32, #tpu.memory_space<vmem>>, vector<1x128xf32>
    %23 = arith.mulf %7, %21 : vector<1x128xf32>
    %24 = arith.subf %22, %23 : vector<1x128xf32>
    %25 = vector.broadcast %21 : vector<1x128xf32> to vector<16x128xf32>
    %26 = arith.mulf %3, %25 : vector<16x128xf32>
    %27 = vector.broadcast %24 : vector<1x128xf32> to vector<16x128xf32>
    %28 = arith.addf %26, %27 : vector<16x128xf32>
    %c0_13 = arith.constant 0 : index
    %c0_14 = arith.constant 0 : index
    %29 = vector.load %arg4[%c0_13, %c0_14] : memref<16x128xf32, #tpu.memory_space<vmem>>, vector<16x128xf32>
    %30 = arith.mulf %28, %29 : vector<16x128xf32>
    %cst_15 = arith.constant 0.000000e+00 : f32
    %31 = vector.broadcast %cst_15 : f32 to vector<16x128xf32>
    %32 = arith.maximumf %30, %31 : vector<16x128xf32>
    %33 = arith.truncf %32 : vector<16x128xf32> to vector<16x128xbf16>
    %c0_16 = arith.constant 0 : index
    %c0_17 = arith.constant 0 : index
    %34 = vector.load %arg5[%c0_16, %c0_17] : memref<128x128xbf16, #tpu.memory_space<vmem>>, vector<128x128xbf16>
    %cst_18 = arith.constant dense<0.000000e+00> : vector<16x128xf32>
    %35 = tpu.matmul %33, %34, %cst_18 {dimension_numbers = #tpu.dot_dimension_numbers<[1], [0], [0], [1], [0, 0, 1, 1], [], []>} : vector<16x128xbf16>, vector<128x128xbf16>, vector<16x128xf32> -> vector<16x128xf32>
    %cst_19 = arith.constant dense<0.000000e+00> : vector<128xf32>
    %36 = vector.multi_reduction <add>, %35, %cst_19 [0] : vector<16x128xf32> to vector<128xf32>
    %37 = vector.shape_cast %36 : vector<128xf32> to vector<1x128xf32>
    %cst_20 = arith.constant 6.250000e-02 : f32
    %38 = vector.broadcast %cst_20 : f32 to vector<1x128xf32>
    %39 = arith.mulf %37, %38 : vector<1x128xf32>
    %40 = arith.mulf %35, %35 : vector<16x128xf32>
    %cst_21 = arith.constant dense<0.000000e+00> : vector<128xf32>
    %41 = vector.multi_reduction <add>, %40, %cst_21 [0] : vector<16x128xf32> to vector<128xf32>
    %42 = vector.shape_cast %41 : vector<128xf32> to vector<1x128xf32>
    %cst_22 = arith.constant 6.250000e-02 : f32
    %43 = vector.broadcast %cst_22 : f32 to vector<1x128xf32>
    %44 = arith.mulf %42, %43 : vector<1x128xf32>
    %45 = arith.mulf %39, %39 : vector<1x128xf32>
    %46 = arith.subf %44, %45 : vector<1x128xf32>
    %cst_23 = arith.constant 0.000000e+00 : f32
    %47 = vector.broadcast %cst_23 : f32 to vector<1x128xf32>
    %48 = arith.maximumf %46, %47 : vector<1x128xf32>
    %c0_24 = arith.constant 0 : index
    %c0_25 = arith.constant 0 : index
    %49 = vector.load %arg6[%c0_24, %c0_25] : memref<1x128xf32, #tpu.memory_space<vmem>>, vector<1x128xf32>
    %cst_26 = arith.constant 9.99999974E-6 : f32
    %50 = vector.broadcast %cst_26 : f32 to vector<1x128xf32>
    %51 = arith.addf %48, %50 : vector<1x128xf32>
    %52 = math.rsqrt %51 : vector<1x128xf32>
    %53 = arith.mulf %49, %52 : vector<1x128xf32>
    %c0_27 = arith.constant 0 : index
    %c0_28 = arith.constant 0 : index
    %54 = vector.load %arg7[%c0_27, %c0_28] : memref<1x128xf32, #tpu.memory_space<vmem>>, vector<1x128xf32>
    %55 = arith.mulf %39, %53 : vector<1x128xf32>
    %56 = arith.subf %54, %55 : vector<1x128xf32>
    %57 = vector.broadcast %53 : vector<1x128xf32> to vector<16x128xf32>
    %58 = arith.mulf %35, %57 : vector<16x128xf32>
    %59 = vector.broadcast %56 : vector<1x128xf32> to vector<16x128xf32>
    %60 = arith.addf %58, %59 : vector<16x128xf32>
    %c0_29 = arith.constant 0 : index
    %c0_30 = arith.constant 0 : index
    %61 = vector.load %arg8[%c0_29, %c0_30] : memref<16x128xf32, #tpu.memory_space<vmem>>, vector<16x128xf32>
    %62 = arith.mulf %60, %61 : vector<16x128xf32>
    %cst_31 = arith.constant 0.000000e+00 : f32
    %63 = vector.broadcast %cst_31 : f32 to vector<16x128xf32>
    %64 = arith.maximumf %62, %63 : vector<16x128xf32>
    %65 = arith.addf %32, %64 : vector<16x128xf32>
    %66 = arith.truncf %65 : vector<16x128xf32> to vector<16x128xbf16>
    %c0_32 = arith.constant 0 : index
    %c0_33 = arith.constant 0 : index
    %67 = vector.load %arg9[%c0_32, %c0_33] : memref<128x128xbf16, #tpu.memory_space<vmem>>, vector<128x128xbf16>
    %cst_34 = arith.constant dense<0.000000e+00> : vector<16x128xf32>
    %68 = tpu.matmul %66, %67, %cst_34 {dimension_numbers = #tpu.dot_dimension_numbers<[1], [0], [0], [1], [0, 0, 1, 1], [], []>} : vector<16x128xbf16>, vector<128x128xbf16>, vector<16x128xf32> -> vector<16x128xf32>
    %cst_35 = arith.constant dense<0.000000e+00> : vector<128xf32>
    %69 = vector.multi_reduction <add>, %68, %cst_35 [0] : vector<16x128xf32> to vector<128xf32>
    %70 = vector.shape_cast %69 : vector<128xf32> to vector<1x128xf32>
    %cst_36 = arith.constant 6.250000e-02 : f32
    %71 = vector.broadcast %cst_36 : f32 to vector<1x128xf32>
    %72 = arith.mulf %70, %71 : vector<1x128xf32>
    %73 = arith.mulf %68, %68 : vector<16x128xf32>
    %cst_37 = arith.constant dense<0.000000e+00> : vector<128xf32>
    %74 = vector.multi_reduction <add>, %73, %cst_37 [0] : vector<16x128xf32> to vector<128xf32>
    %75 = vector.shape_cast %74 : vector<128xf32> to vector<1x128xf32>
    %cst_38 = arith.constant 6.250000e-02 : f32
    %76 = vector.broadcast %cst_38 : f32 to vector<1x128xf32>
    %77 = arith.mulf %75, %76 : vector<1x128xf32>
    %78 = arith.mulf %72, %72 : vector<1x128xf32>
    %79 = arith.subf %77, %78 : vector<1x128xf32>
    %cst_39 = arith.constant 0.000000e+00 : f32
    %80 = vector.broadcast %cst_39 : f32 to vector<1x128xf32>
    %81 = arith.maximumf %79, %80 : vector<1x128xf32>
    %c0_40 = arith.constant 0 : index
    %c0_41 = arith.constant 0 : index
    %82 = vector.load %arg10[%c0_40, %c0_41] : memref<1x128xf32, #tpu.memory_space<vmem>>, vector<1x128xf32>
    %cst_42 = arith.constant 9.99999974E-6 : f32
    %83 = vector.broadcast %cst_42 : f32 to vector<1x128xf32>
    %84 = arith.addf %81, %83 : vector<1x128xf32>
    %85 = math.rsqrt %84 : vector<1x128xf32>
    %86 = arith.mulf %82, %85 : vector<1x128xf32>
    %c0_43 = arith.constant 0 : index
    %c0_44 = arith.constant 0 : index
    %87 = vector.load %arg11[%c0_43, %c0_44] : memref<1x128xf32, #tpu.memory_space<vmem>>, vector<1x128xf32>
    %88 = arith.mulf %72, %86 : vector<1x128xf32>
    %89 = arith.subf %87, %88 : vector<1x128xf32>
    %90 = vector.broadcast %86 : vector<1x128xf32> to vector<16x128xf32>
    %91 = arith.mulf %68, %90 : vector<16x128xf32>
    %92 = vector.broadcast %89 : vector<1x128xf32> to vector<16x128xf32>
    %93 = arith.addf %91, %92 : vector<16x128xf32>
    %c0_45 = arith.constant 0 : index
    %c0_46 = arith.constant 0 : index
    %94 = vector.load %arg12[%c0_45, %c0_46] : memref<16x128xf32, #tpu.memory_space<vmem>>, vector<16x128xf32>
    %95 = arith.mulf %93, %94 : vector<16x128xf32>
    %cst_47 = arith.constant 0.000000e+00 : f32
    %96 = vector.broadcast %cst_47 : f32 to vector<16x128xf32>
    %97 = arith.maximumf %95, %96 : vector<16x128xf32>
    %98 = arith.addf %64, %97 : vector<16x128xf32>
    %99 = arith.truncf %98 : vector<16x128xf32> to vector<16x128xbf16>
    %c0_48 = arith.constant 0 : index
    %c0_49 = arith.constant 0 : index
    %100 = vector.load %arg13[%c0_48, %c0_49] : memref<128x128xbf16, #tpu.memory_space<vmem>>, vector<128x128xbf16>
    %cst_50 = arith.constant dense<0.000000e+00> : vector<16x128xf32>
    %101 = tpu.matmul %99, %100, %cst_50 {dimension_numbers = #tpu.dot_dimension_numbers<[1], [0], [0], [1], [0, 0, 1, 1], [], []>} : vector<16x128xbf16>, vector<128x128xbf16>, vector<16x128xf32> -> vector<16x128xf32>
    %cst_51 = arith.constant dense<0.000000e+00> : vector<128xf32>
    %102 = vector.multi_reduction <add>, %101, %cst_51 [0] : vector<16x128xf32> to vector<128xf32>
    %103 = vector.shape_cast %102 : vector<128xf32> to vector<1x128xf32>
    %cst_52 = arith.constant 6.250000e-02 : f32
    %104 = vector.broadcast %cst_52 : f32 to vector<1x128xf32>
    %105 = arith.mulf %103, %104 : vector<1x128xf32>
    %106 = arith.mulf %101, %101 : vector<16x128xf32>
    %cst_53 = arith.constant dense<0.000000e+00> : vector<128xf32>
    %107 = vector.multi_reduction <add>, %106, %cst_53 [0] : vector<16x128xf32> to vector<128xf32>
    %108 = vector.shape_cast %107 : vector<128xf32> to vector<1x128xf32>
    %cst_54 = arith.constant 6.250000e-02 : f32
    %109 = vector.broadcast %cst_54 : f32 to vector<1x128xf32>
    %110 = arith.mulf %108, %109 : vector<1x128xf32>
    %111 = arith.mulf %105, %105 : vector<1x128xf32>
    %112 = arith.subf %110, %111 : vector<1x128xf32>
    %cst_55 = arith.constant 0.000000e+00 : f32
    %113 = vector.broadcast %cst_55 : f32 to vector<1x128xf32>
    %114 = arith.maximumf %112, %113 : vector<1x128xf32>
    %c0_56 = arith.constant 0 : index
    %c0_57 = arith.constant 0 : index
    %115 = vector.load %arg14[%c0_56, %c0_57] : memref<1x128xf32, #tpu.memory_space<vmem>>, vector<1x128xf32>
    %cst_58 = arith.constant 9.99999974E-6 : f32
    %116 = vector.broadcast %cst_58 : f32 to vector<1x128xf32>
    %117 = arith.addf %114, %116 : vector<1x128xf32>
    %118 = math.rsqrt %117 : vector<1x128xf32>
    %119 = arith.mulf %115, %118 : vector<1x128xf32>
    %c0_59 = arith.constant 0 : index
    %c0_60 = arith.constant 0 : index
    %120 = vector.load %arg15[%c0_59, %c0_60] : memref<1x128xf32, #tpu.memory_space<vmem>>, vector<1x128xf32>
    %121 = arith.mulf %105, %119 : vector<1x128xf32>
    %122 = arith.subf %120, %121 : vector<1x128xf32>
    %123 = vector.broadcast %119 : vector<1x128xf32> to vector<16x128xf32>
    %124 = arith.mulf %101, %123 : vector<16x128xf32>
    %125 = vector.broadcast %122 : vector<1x128xf32> to vector<16x128xf32>
    %126 = arith.addf %124, %125 : vector<16x128xf32>
    %c0_61 = arith.constant 0 : index
    %c0_62 = arith.constant 0 : index
    %127 = vector.load %arg16[%c0_61, %c0_62] : memref<16x128xf32, #tpu.memory_space<vmem>>, vector<16x128xf32>
    %128 = arith.mulf %126, %127 : vector<16x128xf32>
    %cst_63 = arith.constant 0.000000e+00 : f32
    %129 = vector.broadcast %cst_63 : f32 to vector<16x128xf32>
    %130 = arith.maximumf %128, %129 : vector<16x128xf32>
    %131 = arith.addf %97, %130 : vector<16x128xf32>
    %132 = arith.truncf %131 : vector<16x128xf32> to vector<16x128xbf16>
    %c0_64 = arith.constant 0 : index
    %c0_65 = arith.constant 0 : index
    %133 = vector.load %arg17[%c0_64, %c0_65] : memref<128x128xbf16, #tpu.memory_space<vmem>>, vector<128x128xbf16>
    %cst_66 = arith.constant dense<0.000000e+00> : vector<16x128xf32>
    %134 = tpu.matmul %132, %133, %cst_66 {dimension_numbers = #tpu.dot_dimension_numbers<[1], [0], [0], [1], [0, 0, 1, 1], [], []>} : vector<16x128xbf16>, vector<128x128xbf16>, vector<16x128xf32> -> vector<16x128xf32>
    %cst_67 = arith.constant dense<0.000000e+00> : vector<128xf32>
    %135 = vector.multi_reduction <add>, %134, %cst_67 [0] : vector<16x128xf32> to vector<128xf32>
    %136 = vector.shape_cast %135 : vector<128xf32> to vector<1x128xf32>
    %cst_68 = arith.constant 6.250000e-02 : f32
    %137 = vector.broadcast %cst_68 : f32 to vector<1x128xf32>
    %138 = arith.mulf %136, %137 : vector<1x128xf32>
    %139 = arith.mulf %134, %134 : vector<16x128xf32>
    %cst_69 = arith.constant dense<0.000000e+00> : vector<128xf32>
    %140 = vector.multi_reduction <add>, %139, %cst_69 [0] : vector<16x128xf32> to vector<128xf32>
    %141 = vector.shape_cast %140 : vector<128xf32> to vector<1x128xf32>
    %cst_70 = arith.constant 6.250000e-02 : f32
    %142 = vector.broadcast %cst_70 : f32 to vector<1x128xf32>
    %143 = arith.mulf %141, %142 : vector<1x128xf32>
    %144 = arith.mulf %138, %138 : vector<1x128xf32>
    %145 = arith.subf %143, %144 : vector<1x128xf32>
    %cst_71 = arith.constant 0.000000e+00 : f32
    %146 = vector.broadcast %cst_71 : f32 to vector<1x128xf32>
    %147 = arith.maximumf %145, %146 : vector<1x128xf32>
    %c0_72 = arith.constant 0 : index
    %c0_73 = arith.constant 0 : index
    %148 = vector.load %arg18[%c0_72, %c0_73] : memref<1x128xf32, #tpu.memory_space<vmem>>, vector<1x128xf32>
    %cst_74 = arith.constant 9.99999974E-6 : f32
    %149 = vector.broadcast %cst_74 : f32 to vector<1x128xf32>
    %150 = arith.addf %147, %149 : vector<1x128xf32>
    %151 = math.rsqrt %150 : vector<1x128xf32>
    %152 = arith.mulf %148, %151 : vector<1x128xf32>
    %c0_75 = arith.constant 0 : index
    %c0_76 = arith.constant 0 : index
    %153 = vector.load %arg19[%c0_75, %c0_76] : memref<1x128xf32, #tpu.memory_space<vmem>>, vector<1x128xf32>
    %154 = arith.mulf %138, %152 : vector<1x128xf32>
    %155 = arith.subf %153, %154 : vector<1x128xf32>
    %156 = vector.broadcast %152 : vector<1x128xf32> to vector<16x128xf32>
    %157 = arith.mulf %134, %156 : vector<16x128xf32>
    %158 = vector.broadcast %155 : vector<1x128xf32> to vector<16x128xf32>
    %159 = arith.addf %157, %158 : vector<16x128xf32>
    %c0_77 = arith.constant 0 : index
    %c0_78 = arith.constant 0 : index
    %160 = vector.load %arg20[%c0_77, %c0_78] : memref<16x128xf32, #tpu.memory_space<vmem>>, vector<16x128xf32>
    %161 = arith.mulf %159, %160 : vector<16x128xf32>
    %cst_79 = arith.constant 0.000000e+00 : f32
    %162 = vector.broadcast %cst_79 : f32 to vector<16x128xf32>
    %163 = arith.maximumf %161, %162 : vector<16x128xf32>
    %164 = arith.addf %130, %163 : vector<16x128xf32>
    %165 = arith.truncf %164 : vector<16x128xf32> to vector<16x128xbf16>
    %c0_80 = arith.constant 0 : index
    %c0_81 = arith.constant 0 : index
    %166 = vector.load %arg21[%c0_80, %c0_81] : memref<128x128xbf16, #tpu.memory_space<vmem>>, vector<128x128xbf16>
    %cst_82 = arith.constant dense<0.000000e+00> : vector<16x128xf32>
    %167 = tpu.matmul %165, %166, %cst_82 {dimension_numbers = #tpu.dot_dimension_numbers<[1], [0], [0], [1], [0, 0, 1, 1], [], []>} : vector<16x128xbf16>, vector<128x128xbf16>, vector<16x128xf32> -> vector<16x128xf32>
    %cst_83 = arith.constant dense<0.000000e+00> : vector<128xf32>
    %168 = vector.multi_reduction <add>, %167, %cst_83 [0] : vector<16x128xf32> to vector<128xf32>
    %169 = vector.shape_cast %168 : vector<128xf32> to vector<1x128xf32>
    %cst_84 = arith.constant 6.250000e-02 : f32
    %170 = vector.broadcast %cst_84 : f32 to vector<1x128xf32>
    %171 = arith.mulf %169, %170 : vector<1x128xf32>
    %172 = arith.mulf %167, %167 : vector<16x128xf32>
    %cst_85 = arith.constant dense<0.000000e+00> : vector<128xf32>
    %173 = vector.multi_reduction <add>, %172, %cst_85 [0] : vector<16x128xf32> to vector<128xf32>
    %174 = vector.shape_cast %173 : vector<128xf32> to vector<1x128xf32>
    %cst_86 = arith.constant 6.250000e-02 : f32
    %175 = vector.broadcast %cst_86 : f32 to vector<1x128xf32>
    %176 = arith.mulf %174, %175 : vector<1x128xf32>
    %177 = arith.mulf %171, %171 : vector<1x128xf32>
    %178 = arith.subf %176, %177 : vector<1x128xf32>
    %cst_87 = arith.constant 0.000000e+00 : f32
    %179 = vector.broadcast %cst_87 : f32 to vector<1x128xf32>
    %180 = arith.maximumf %178, %179 : vector<1x128xf32>
    %c0_88 = arith.constant 0 : index
    %c0_89 = arith.constant 0 : index
    %181 = vector.load %arg22[%c0_88, %c0_89] : memref<1x128xf32, #tpu.memory_space<vmem>>, vector<1x128xf32>
    %cst_90 = arith.constant 9.99999974E-6 : f32
    %182 = vector.broadcast %cst_90 : f32 to vector<1x128xf32>
    %183 = arith.addf %180, %182 : vector<1x128xf32>
    %184 = math.rsqrt %183 : vector<1x128xf32>
    %185 = arith.mulf %181, %184 : vector<1x128xf32>
    %c0_91 = arith.constant 0 : index
    %c0_92 = arith.constant 0 : index
    %186 = vector.load %arg23[%c0_91, %c0_92] : memref<1x128xf32, #tpu.memory_space<vmem>>, vector<1x128xf32>
    %187 = arith.mulf %171, %185 : vector<1x128xf32>
    %188 = arith.subf %186, %187 : vector<1x128xf32>
    %189 = vector.broadcast %185 : vector<1x128xf32> to vector<16x128xf32>
    %190 = arith.mulf %167, %189 : vector<16x128xf32>
    %191 = vector.broadcast %188 : vector<1x128xf32> to vector<16x128xf32>
    %192 = arith.addf %190, %191 : vector<16x128xf32>
    %c0_93 = arith.constant 0 : index
    %c0_94 = arith.constant 0 : index
    %193 = vector.load %arg24[%c0_93, %c0_94] : memref<16x128xf32, #tpu.memory_space<vmem>>, vector<16x128xf32>
    %194 = arith.mulf %192, %193 : vector<16x128xf32>
    %cst_95 = arith.constant 0.000000e+00 : f32
    %195 = vector.broadcast %cst_95 : f32 to vector<16x128xf32>
    %196 = arith.maximumf %194, %195 : vector<16x128xf32>
    %197 = arith.addf %163, %196 : vector<16x128xf32>
    %198 = arith.truncf %197 : vector<16x128xf32> to vector<16x128xbf16>
    %c0_96 = arith.constant 0 : index
    %c0_97 = arith.constant 0 : index
    %199 = vector.load %arg25[%c0_96, %c0_97] : memref<128x128xbf16, #tpu.memory_space<vmem>>, vector<128x128xbf16>
    %cst_98 = arith.constant dense<0.000000e+00> : vector<16x128xf32>
    %200 = tpu.matmul %198, %199, %cst_98 {dimension_numbers = #tpu.dot_dimension_numbers<[1], [0], [0], [1], [0, 0, 1, 1], [], []>} : vector<16x128xbf16>, vector<128x128xbf16>, vector<16x128xf32> -> vector<16x128xf32>
    %cst_99 = arith.constant dense<0.000000e+00> : vector<128xf32>
    %201 = vector.multi_reduction <add>, %200, %cst_99 [0] : vector<16x128xf32> to vector<128xf32>
    %202 = vector.shape_cast %201 : vector<128xf32> to vector<1x128xf32>
    %cst_100 = arith.constant 6.250000e-02 : f32
    %203 = vector.broadcast %cst_100 : f32 to vector<1x128xf32>
    %204 = arith.mulf %202, %203 : vector<1x128xf32>
    %205 = arith.mulf %200, %200 : vector<16x128xf32>
    %cst_101 = arith.constant dense<0.000000e+00> : vector<128xf32>
    %206 = vector.multi_reduction <add>, %205, %cst_101 [0] : vector<16x128xf32> to vector<128xf32>
    %207 = vector.shape_cast %206 : vector<128xf32> to vector<1x128xf32>
    %cst_102 = arith.constant 6.250000e-02 : f32
    %208 = vector.broadcast %cst_102 : f32 to vector<1x128xf32>
    %209 = arith.mulf %207, %208 : vector<1x128xf32>
    %210 = arith.mulf %204, %204 : vector<1x128xf32>
    %211 = arith.subf %209, %210 : vector<1x128xf32>
    %cst_103 = arith.constant 0.000000e+00 : f32
    %212 = vector.broadcast %cst_103 : f32 to vector<1x128xf32>
    %213 = arith.maximumf %211, %212 : vector<1x128xf32>
    %c0_104 = arith.constant 0 : index
    %c0_105 = arith.constant 0 : index
    %214 = vector.load %arg26[%c0_104, %c0_105] : memref<1x128xf32, #tpu.memory_space<vmem>>, vector<1x128xf32>
    %cst_106 = arith.constant 9.99999974E-6 : f32
    %215 = vector.broadcast %cst_106 : f32 to vector<1x128xf32>
    %216 = arith.addf %213, %215 : vector<1x128xf32>
    %217 = math.rsqrt %216 : vector<1x128xf32>
    %218 = arith.mulf %214, %217 : vector<1x128xf32>
    %c0_107 = arith.constant 0 : index
    %c0_108 = arith.constant 0 : index
    %219 = vector.load %arg27[%c0_107, %c0_108] : memref<1x128xf32, #tpu.memory_space<vmem>>, vector<1x128xf32>
    %220 = arith.mulf %204, %218 : vector<1x128xf32>
    %221 = arith.subf %219, %220 : vector<1x128xf32>
    %222 = vector.broadcast %218 : vector<1x128xf32> to vector<16x128xf32>
    %223 = arith.mulf %200, %222 : vector<16x128xf32>
    %224 = vector.broadcast %221 : vector<1x128xf32> to vector<16x128xf32>
    %225 = arith.addf %223, %224 : vector<16x128xf32>
    %c0_109 = arith.constant 0 : index
    %c0_110 = arith.constant 0 : index
    %226 = vector.load %arg28[%c0_109, %c0_110] : memref<16x128xf32, #tpu.memory_space<vmem>>, vector<16x128xf32>
    %227 = arith.mulf %225, %226 : vector<16x128xf32>
    %cst_111 = arith.constant 0.000000e+00 : f32
    %228 = vector.broadcast %cst_111 : f32 to vector<16x128xf32>
    %229 = arith.maximumf %227, %228 : vector<16x128xf32>
    %230 = arith.addf %196, %229 : vector<16x128xf32>
    %231 = arith.truncf %230 : vector<16x128xf32> to vector<16x128xbf16>
    %c0_112 = arith.constant 0 : index
    %c0_113 = arith.constant 0 : index
    %232 = vector.load %arg29[%c0_112, %c0_113] : memref<128x128xbf16, #tpu.memory_space<vmem>>, vector<128x128xbf16>
    %cst_114 = arith.constant dense<0.000000e+00> : vector<16x128xf32>
    %233 = tpu.matmul %231, %232, %cst_114 {dimension_numbers = #tpu.dot_dimension_numbers<[1], [0], [0], [1], [0, 0, 1, 1], [], []>} : vector<16x128xbf16>, vector<128x128xbf16>, vector<16x128xf32> -> vector<16x128xf32>
    %cst_115 = arith.constant dense<0.000000e+00> : vector<128xf32>
    %234 = vector.multi_reduction <add>, %233, %cst_115 [0] : vector<16x128xf32> to vector<128xf32>
    %235 = vector.shape_cast %234 : vector<128xf32> to vector<1x128xf32>
    %cst_116 = arith.constant 6.250000e-02 : f32
    %236 = vector.broadcast %cst_116 : f32 to vector<1x128xf32>
    %237 = arith.mulf %235, %236 : vector<1x128xf32>
    %238 = arith.mulf %233, %233 : vector<16x128xf32>
    %cst_117 = arith.constant dense<0.000000e+00> : vector<128xf32>
    %239 = vector.multi_reduction <add>, %238, %cst_117 [0] : vector<16x128xf32> to vector<128xf32>
    %240 = vector.shape_cast %239 : vector<128xf32> to vector<1x128xf32>
    %cst_118 = arith.constant 6.250000e-02 : f32
    %241 = vector.broadcast %cst_118 : f32 to vector<1x128xf32>
    %242 = arith.mulf %240, %241 : vector<1x128xf32>
    %243 = arith.mulf %237, %237 : vector<1x128xf32>
    %244 = arith.subf %242, %243 : vector<1x128xf32>
    %cst_119 = arith.constant 0.000000e+00 : f32
    %245 = vector.broadcast %cst_119 : f32 to vector<1x128xf32>
    %246 = arith.maximumf %244, %245 : vector<1x128xf32>
    %c0_120 = arith.constant 0 : index
    %c0_121 = arith.constant 0 : index
    %247 = vector.load %arg30[%c0_120, %c0_121] : memref<1x128xf32, #tpu.memory_space<vmem>>, vector<1x128xf32>
    %cst_122 = arith.constant 9.99999974E-6 : f32
    %248 = vector.broadcast %cst_122 : f32 to vector<1x128xf32>
    %249 = arith.addf %246, %248 : vector<1x128xf32>
    %250 = math.rsqrt %249 : vector<1x128xf32>
    %251 = arith.mulf %247, %250 : vector<1x128xf32>
    %c0_123 = arith.constant 0 : index
    %c0_124 = arith.constant 0 : index
    %252 = vector.load %arg31[%c0_123, %c0_124] : memref<1x128xf32, #tpu.memory_space<vmem>>, vector<1x128xf32>
    %253 = arith.mulf %237, %251 : vector<1x128xf32>
    %254 = arith.subf %252, %253 : vector<1x128xf32>
    %255 = vector.broadcast %251 : vector<1x128xf32> to vector<16x128xf32>
    %256 = arith.mulf %233, %255 : vector<16x128xf32>
    %257 = vector.broadcast %254 : vector<1x128xf32> to vector<16x128xf32>
    %258 = arith.addf %256, %257 : vector<16x128xf32>
    %c0_125 = arith.constant 0 : index
    %c0_126 = arith.constant 0 : index
    %259 = vector.load %arg32[%c0_125, %c0_126] : memref<16x128xf32, #tpu.memory_space<vmem>>, vector<16x128xf32>
    %260 = arith.mulf %258, %259 : vector<16x128xf32>
    %cst_127 = arith.constant 0.000000e+00 : f32
    %261 = vector.broadcast %cst_127 : f32 to vector<16x128xf32>
    %262 = arith.maximumf %260, %261 : vector<16x128xf32>
    %263 = arith.addf %229, %262 : vector<16x128xf32>
    %264 = arith.truncf %263 : vector<16x128xf32> to vector<16x128xbf16>
    %c0_128 = arith.constant 0 : index
    %c0_129 = arith.constant 0 : index
    %265 = vector.load %arg33[%c0_128, %c0_129] : memref<128x128xbf16, #tpu.memory_space<vmem>>, vector<128x128xbf16>
    %cst_130 = arith.constant dense<0.000000e+00> : vector<16x128xf32>
    %266 = tpu.matmul %264, %265, %cst_130 {dimension_numbers = #tpu.dot_dimension_numbers<[1], [0], [0], [1], [0, 0, 1, 1], [], []>} : vector<16x128xbf16>, vector<128x128xbf16>, vector<16x128xf32> -> vector<16x128xf32>
    %cst_131 = arith.constant dense<0.000000e+00> : vector<128xf32>
    %267 = vector.multi_reduction <add>, %266, %cst_131 [0] : vector<16x128xf32> to vector<128xf32>
    %268 = vector.shape_cast %267 : vector<128xf32> to vector<1x128xf32>
    %cst_132 = arith.constant 6.250000e-02 : f32
    %269 = vector.broadcast %cst_132 : f32 to vector<1x128xf32>
    %270 = arith.mulf %268, %269 : vector<1x128xf32>
    %271 = arith.mulf %266, %266 : vector<16x128xf32>
    %cst_133 = arith.constant dense<0.000000e+00> : vector<128xf32>
    %272 = vector.multi_reduction <add>, %271, %cst_133 [0] : vector<16x128xf32> to vector<128xf32>
    %273 = vector.shape_cast %272 : vector<128xf32> to vector<1x128xf32>
    %cst_134 = arith.constant 6.250000e-02 : f32
    %274 = vector.broadcast %cst_134 : f32 to vector<1x128xf32>
    %275 = arith.mulf %273, %274 : vector<1x128xf32>
    %276 = arith.mulf %270, %270 : vector<1x128xf32>
    %277 = arith.subf %275, %276 : vector<1x128xf32>
    %cst_135 = arith.constant 0.000000e+00 : f32
    %278 = vector.broadcast %cst_135 : f32 to vector<1x128xf32>
    %279 = arith.maximumf %277, %278 : vector<1x128xf32>
    %c0_136 = arith.constant 0 : index
    %c0_137 = arith.constant 0 : index
    %280 = vector.load %arg34[%c0_136, %c0_137] : memref<1x128xf32, #tpu.memory_space<vmem>>, vector<1x128xf32>
    %cst_138 = arith.constant 9.99999974E-6 : f32
    %281 = vector.broadcast %cst_138 : f32 to vector<1x128xf32>
    %282 = arith.addf %279, %281 : vector<1x128xf32>
    %283 = math.rsqrt %282 : vector<1x128xf32>
    %284 = arith.mulf %280, %283 : vector<1x128xf32>
    %c0_139 = arith.constant 0 : index
    %c0_140 = arith.constant 0 : index
    %285 = vector.load %arg35[%c0_139, %c0_140] : memref<1x128xf32, #tpu.memory_space<vmem>>, vector<1x128xf32>
    %286 = arith.mulf %270, %284 : vector<1x128xf32>
    %287 = arith.subf %285, %286 : vector<1x128xf32>
    %288 = vector.broadcast %284 : vector<1x128xf32> to vector<16x128xf32>
    %289 = arith.mulf %266, %288 : vector<16x128xf32>
    %290 = vector.broadcast %287 : vector<1x128xf32> to vector<16x128xf32>
    %291 = arith.addf %289, %290 : vector<16x128xf32>
    %c0_141 = arith.constant 0 : index
    %c0_142 = arith.constant 0 : index
    %292 = vector.load %arg36[%c0_141, %c0_142] : memref<16x128xf32, #tpu.memory_space<vmem>>, vector<16x128xf32>
    %293 = arith.mulf %291, %292 : vector<16x128xf32>
    %cst_143 = arith.constant 0.000000e+00 : f32
    %294 = vector.broadcast %cst_143 : f32 to vector<16x128xf32>
    %295 = arith.maximumf %293, %294 : vector<16x128xf32>
    %296 = arith.addf %262, %295 : vector<16x128xf32>
    %297 = arith.truncf %296 : vector<16x128xf32> to vector<16x128xbf16>
    %c0_144 = arith.constant 0 : index
    %c0_145 = arith.constant 0 : index
    %298 = vector.load %arg37[%c0_144, %c0_145] : memref<128x64xbf16, #tpu.memory_space<vmem>>, vector<128x64xbf16>
    %cst_146 = arith.constant dense<0.000000e+00> : vector<16x64xf32>
    %299 = tpu.matmul %297, %298, %cst_146 {dimension_numbers = #tpu.dot_dimension_numbers<[1], [0], [0], [1], [0, 0, 1, 1], [], []>} : vector<16x128xbf16>, vector<128x64xbf16>, vector<16x64xf32> -> vector<16x64xf32>
    %cst_147 = arith.constant dense<0.000000e+00> : vector<64xf32>
    %300 = vector.multi_reduction <add>, %299, %cst_147 [0] : vector<16x64xf32> to vector<64xf32>
    %301 = vector.shape_cast %300 : vector<64xf32> to vector<1x64xf32>
    %cst_148 = arith.constant 6.250000e-02 : f32
    %302 = vector.broadcast %cst_148 : f32 to vector<1x64xf32>
    %303 = arith.mulf %301, %302 : vector<1x64xf32>
    %304 = arith.mulf %299, %299 : vector<16x64xf32>
    %cst_149 = arith.constant dense<0.000000e+00> : vector<64xf32>
    %305 = vector.multi_reduction <add>, %304, %cst_149 [0] : vector<16x64xf32> to vector<64xf32>
    %306 = vector.shape_cast %305 : vector<64xf32> to vector<1x64xf32>
    %cst_150 = arith.constant 6.250000e-02 : f32
    %307 = vector.broadcast %cst_150 : f32 to vector<1x64xf32>
    %308 = arith.mulf %306, %307 : vector<1x64xf32>
    %309 = arith.mulf %303, %303 : vector<1x64xf32>
    %310 = arith.subf %308, %309 : vector<1x64xf32>
    %cst_151 = arith.constant 0.000000e+00 : f32
    %311 = vector.broadcast %cst_151 : f32 to vector<1x64xf32>
    %312 = arith.maximumf %310, %311 : vector<1x64xf32>
    %c0_152 = arith.constant 0 : index
    %c0_153 = arith.constant 0 : index
    %313 = vector.load %arg38[%c0_152, %c0_153] : memref<1x64xf32, #tpu.memory_space<vmem>>, vector<1x64xf32>
    %cst_154 = arith.constant 9.99999974E-6 : f32
    %314 = vector.broadcast %cst_154 : f32 to vector<1x64xf32>
    %315 = arith.addf %312, %314 : vector<1x64xf32>
    %316 = math.rsqrt %315 : vector<1x64xf32>
    %317 = arith.mulf %313, %316 : vector<1x64xf32>
    %c0_155 = arith.constant 0 : index
    %c0_156 = arith.constant 0 : index
    %318 = vector.load %arg39[%c0_155, %c0_156] : memref<1x64xf32, #tpu.memory_space<vmem>>, vector<1x64xf32>
    %319 = arith.mulf %303, %317 : vector<1x64xf32>
    %320 = arith.subf %318, %319 : vector<1x64xf32>
    %321 = vector.broadcast %317 : vector<1x64xf32> to vector<16x64xf32>
    %322 = arith.mulf %299, %321 : vector<16x64xf32>
    %323 = vector.broadcast %320 : vector<1x64xf32> to vector<16x64xf32>
    %324 = arith.addf %322, %323 : vector<16x64xf32>
    %c0_157 = arith.constant 0 : index
    %c0_158 = arith.constant 0 : index
    %325 = vector.load %arg40[%c0_157, %c0_158] : memref<16x64xf32, #tpu.memory_space<vmem>>, vector<16x64xf32>
    %326 = arith.mulf %324, %325 : vector<16x64xf32>
    %cst_159 = arith.constant 0.000000e+00 : f32
    %327 = vector.broadcast %cst_159 : f32 to vector<16x64xf32>
    %328 = arith.maximumf %326, %327 : vector<16x64xf32>
    %329 = arith.truncf %328 : vector<16x64xf32> to vector<16x64xbf16>
    %c0_160 = arith.constant 0 : index
    %c0_161 = arith.constant 0 : index
    %330 = vector.load %arg41[%c0_160, %c0_161] : memref<64x32xbf16, #tpu.memory_space<vmem>>, vector<64x32xbf16>
    %cst_162 = arith.constant dense<0.000000e+00> : vector<16x32xf32>
    %331 = tpu.matmul %329, %330, %cst_162 {dimension_numbers = #tpu.dot_dimension_numbers<[1], [0], [0], [1], [0, 0, 1, 1], [], []>} : vector<16x64xbf16>, vector<64x32xbf16>, vector<16x32xf32> -> vector<16x32xf32>
    %cst_163 = arith.constant dense<0.000000e+00> : vector<32xf32>
    %332 = vector.multi_reduction <add>, %331, %cst_163 [0] : vector<16x32xf32> to vector<32xf32>
    %333 = vector.shape_cast %332 : vector<32xf32> to vector<1x32xf32>
    %cst_164 = arith.constant 6.250000e-02 : f32
    %334 = vector.broadcast %cst_164 : f32 to vector<1x32xf32>
    %335 = arith.mulf %333, %334 : vector<1x32xf32>
    %336 = arith.mulf %331, %331 : vector<16x32xf32>
    %cst_165 = arith.constant dense<0.000000e+00> : vector<32xf32>
    %337 = vector.multi_reduction <add>, %336, %cst_165 [0] : vector<16x32xf32> to vector<32xf32>
    %338 = vector.shape_cast %337 : vector<32xf32> to vector<1x32xf32>
    %cst_166 = arith.constant 6.250000e-02 : f32
    %339 = vector.broadcast %cst_166 : f32 to vector<1x32xf32>
    %340 = arith.mulf %338, %339 : vector<1x32xf32>
    %341 = arith.mulf %335, %335 : vector<1x32xf32>
    %342 = arith.subf %340, %341 : vector<1x32xf32>
    %cst_167 = arith.constant 0.000000e+00 : f32
    %343 = vector.broadcast %cst_167 : f32 to vector<1x32xf32>
    %344 = arith.maximumf %342, %343 : vector<1x32xf32>
    %c0_168 = arith.constant 0 : index
    %c0_169 = arith.constant 0 : index
    %345 = vector.load %arg42[%c0_168, %c0_169] : memref<1x32xf32, #tpu.memory_space<vmem>>, vector<1x32xf32>
    %cst_170 = arith.constant 9.99999974E-6 : f32
    %346 = vector.broadcast %cst_170 : f32 to vector<1x32xf32>
    %347 = arith.addf %344, %346 : vector<1x32xf32>
    %348 = math.rsqrt %347 : vector<1x32xf32>
    %349 = arith.mulf %345, %348 : vector<1x32xf32>
    %c0_171 = arith.constant 0 : index
    %c0_172 = arith.constant 0 : index
    %350 = vector.load %arg43[%c0_171, %c0_172] : memref<1x32xf32, #tpu.memory_space<vmem>>, vector<1x32xf32>
    %351 = arith.mulf %335, %349 : vector<1x32xf32>
    %352 = arith.subf %350, %351 : vector<1x32xf32>
    %353 = vector.broadcast %349 : vector<1x32xf32> to vector<16x32xf32>
    %354 = arith.mulf %331, %353 : vector<16x32xf32>
    %355 = vector.broadcast %352 : vector<1x32xf32> to vector<16x32xf32>
    %356 = arith.addf %354, %355 : vector<16x32xf32>
    %c0_173 = arith.constant 0 : index
    %c0_174 = arith.constant 0 : index
    %357 = vector.load %arg44[%c0_173, %c0_174] : memref<16x32xf32, #tpu.memory_space<vmem>>, vector<16x32xf32>
    %358 = arith.mulf %356, %357 : vector<16x32xf32>
    %cst_175 = arith.constant 0.000000e+00 : f32
    %359 = vector.broadcast %cst_175 : f32 to vector<16x32xf32>
    %360 = arith.maximumf %358, %359 : vector<16x32xf32>
    %361 = arith.truncf %360 : vector<16x32xf32> to vector<16x32xbf16>
    %c0_176 = arith.constant 0 : index
    %c0_177 = arith.constant 0 : index
    %362 = vector.load %arg45[%c0_176, %c0_177] : memref<32x71xbf16, #tpu.memory_space<vmem>>, vector<32x71xbf16>
    %cst_178 = arith.constant dense<0.000000e+00> : vector<16x71xf32>
    %363 = tpu.matmul %361, %362, %cst_178 {dimension_numbers = #tpu.dot_dimension_numbers<[1], [0], [0], [1], [0, 0, 1, 1], [], []>} : vector<16x32xbf16>, vector<32x71xbf16>, vector<16x71xf32> -> vector<16x71xf32>
    %cst_179 = arith.constant dense<0.000000e+00> : vector<71xf32>
    %364 = vector.multi_reduction <add>, %363, %cst_179 [0] : vector<16x71xf32> to vector<71xf32>
    %365 = vector.shape_cast %364 : vector<71xf32> to vector<1x71xf32>
    %cst_180 = arith.constant 6.250000e-02 : f32
    %366 = vector.broadcast %cst_180 : f32 to vector<1x71xf32>
    %367 = arith.mulf %365, %366 : vector<1x71xf32>
    %368 = arith.mulf %363, %363 : vector<16x71xf32>
    %cst_181 = arith.constant dense<0.000000e+00> : vector<71xf32>
    %369 = vector.multi_reduction <add>, %368, %cst_181 [0] : vector<16x71xf32> to vector<71xf32>
    %370 = vector.shape_cast %369 : vector<71xf32> to vector<1x71xf32>
    %cst_182 = arith.constant 6.250000e-02 : f32
    %371 = vector.broadcast %cst_182 : f32 to vector<1x71xf32>
    %372 = arith.mulf %370, %371 : vector<1x71xf32>
    %373 = arith.mulf %367, %367 : vector<1x71xf32>
    %374 = arith.subf %372, %373 : vector<1x71xf32>
    %cst_183 = arith.constant 0.000000e+00 : f32
    %375 = vector.broadcast %cst_183 : f32 to vector<1x71xf32>
    %376 = arith.maximumf %374, %375 : vector<1x71xf32>
    %c0_184 = arith.constant 0 : index
    %c0_185 = arith.constant 0 : index
    %377 = vector.load %arg46[%c0_184, %c0_185] : memref<1x71xf32, #tpu.memory_space<vmem>>, vector<1x71xf32>
    %cst_186 = arith.constant 9.99999974E-6 : f32
    %378 = vector.broadcast %cst_186 : f32 to vector<1x71xf32>
    %379 = arith.addf %376, %378 : vector<1x71xf32>
    %380 = math.rsqrt %379 : vector<1x71xf32>
    %381 = arith.mulf %377, %380 : vector<1x71xf32>
    %c0_187 = arith.constant 0 : index
    %c0_188 = arith.constant 0 : index
    %382 = vector.load %arg47[%c0_187, %c0_188] : memref<1x71xf32, #tpu.memory_space<vmem>>, vector<1x71xf32>
    %383 = arith.mulf %367, %381 : vector<1x71xf32>
    %384 = arith.subf %382, %383 : vector<1x71xf32>
    %385 = vector.broadcast %381 : vector<1x71xf32> to vector<16x71xf32>
    %386 = arith.mulf %363, %385 : vector<16x71xf32>
    %387 = vector.broadcast %384 : vector<1x71xf32> to vector<16x71xf32>
    %388 = arith.addf %386, %387 : vector<16x71xf32>
    %c0_189 = arith.constant 0 : index
    %c0_190 = arith.constant 0 : index
    %389 = vector.load %arg48[%c0_189, %c0_190] : memref<16x71xf32, #tpu.memory_space<vmem>>, vector<16x71xf32>
    %390 = arith.mulf %388, %389 : vector<16x71xf32>
    %cst_191 = arith.constant 0.000000e+00 : f32
    %391 = vector.broadcast %cst_191 : f32 to vector<16x71xf32>
    %392 = arith.maximumf %390, %391 : vector<16x71xf32>
    %c0_192 = arith.constant 0 : index
    %c0_193 = arith.constant 0 : index
    %393 = vector.load %arg49[%c0_192, %c0_193] : memref<16x71xf32, #tpu.memory_space<vmem>>, vector<16x71xf32>
    tpu.vector_store %arg49[%c0_192, %c0_193], %392 {strides = array<i32>} : memref<16x71xf32, #tpu.memory_space<vmem>>, vector<16x71xf32>,
    return
  }
}

</mosaic_0001>

<bundles_post_ra>
// kernel: tpu_custom_call.1
= control target key start
LH: loop header
LB: loop body
LE: loop exit
PB: predicated region body
PF: predicated region fallthrough
CT: control target
= control target key end

     0   :  { %s4040_s6 = smov 1   ;;  %s4041_s10 = smov 2   ;;  %s4905_s0 = inlined_call_operand.smem [shape: u32[50], index: -1, kind: input, shape index: {}] }
   0x1   :  { %s4142_s5 = sld [smem:[%s4905_s0]]   ;;  %s4042_s14 = smov 3  }
   0x2   :  { %s4147_s9 = sld [smem:[%s4905_s0 + %s4040_s6]]   ;;  %s4043_s18 = smov 4  }
   0x3   :  { %s4152_s13 = sld [smem:[%s4905_s0 + %s4041_s10]]   ;;  %s4044_s22 = smov 5  }
   0x4   :  { %s4157_s17 = sld [smem:[%s4905_s0 + %s4042_s14]]   ;;  %s4045_s26 = smov 6  }
   0x5   :  { %s4162_s21 = sld [smem:[%s4905_s0 + %s4043_s18]]   ;;  %s4046_s30 = smov 7  }
   0x6   :  { %s4167_s25 = sld [smem:[%s4905_s0 + %s4044_s22]]   ;;  %s4047_s4 = smov 8  }
   0x7   :  { %4937 = sst [smem:[#allocation83_spill]] %s4142_s5  ;;  %s4048_s10 = smov 9  }
   0x8   :  { %s4172_s29 = sld [smem:[%s4905_s0 + %s4045_s26]]   ;;  %s4049_s15 = smov 10  }
   0x9   :  { %4938 = sst [smem:[#allocation84_spill]] %s4152_s13  ;;  %s4050_s20 = smov 11  }
   0xa   :  { %s4177_s3 = sld [smem:[%s4905_s0 + %s4046_s30]]   ;;  %s4051_s26 = smov 12  }
   0xb   :  { %4939 = sst [smem:[#allocation85_spill]] %s4162_s21  ;;  %s4052_s1 = smov 13  }
   0xc   :  { %4940 = sst [smem:[#allocation86_spill]] %s4167_s25  ;;  %s4053_s7 = smov 14  }
   0xd   :  { %s4182_s8 = sld [smem:[%s4905_s0 + %s4047_s4]]   ;;  %s4055_s22 = smov 16  }
   0xe   :  { %s4187_s14 = sld [smem:[%s4905_s0 + %s4048_s10]]   ;;  %s4056_s28 = smov 17  }
   0xf   :  { %s4192_s19 = sld [smem:[%s4905_s0 + %s4049_s15]]   ;;  %s4054_s15 = smov 15  }
  0x10   :  { %4941 = sst [smem:[#allocation87_spill]] %s4177_s3 }
  0x11   :  { %s4197_s24 = sld [smem:[%s4905_s0 + %s4050_s20]]  }
  0x12   :  { %s4202_s30 = sld [smem:[%s4905_s0 + %s4051_s26]]  }
  0x13   :  { %s4207_s6 = sld [smem:[%s4905_s0 + %s4052_s1]]  }
  0x14   :  { %4942 = sst [smem:[#allocation88_spill]] %s4187_s14 }
  0x15   :  { %4943 = sst [smem:[#allocation89_spill]] %s4192_s19 }
  0x16   :  { %s4212_s12 = sld [smem:[%s4905_s0 + %s4053_s7]]   ;;  %s4057_s7 = smov 18  }
  0x17   :  { %s4217_s20 = sld [smem:[%s4905_s0 + %s4054_s15]]   ;;  %s4058_s15 = smov 19  }
  0x18   :  { %4944 = sst [smem:[#allocation90_spill]] %s4202_s30 }
  0x19   :  { %4945 = sst [smem:[#allocation91_spill]] %s4207_s6 }
  0x1a   :  { %s4222_s27 = sld [smem:[%s4905_s0 + %s4055_s22]]   ;;  %s4059_s22 = smov 20  }
  0x1b   :  { %s4227_s4 = sld [smem:[%s4905_s0 + %s4056_s28]]   ;;  %s4060_s28 = smov 21  }
  0x1c   :  { %s4232_s6 = sld [smem:[%s4905_s0 + %s4057_s7]]   ;;  %s4061_s7 = smov 22  }
  0x1d   :  { %4946 = sst [smem:[#allocation92_spill]] %s4217_s20 }
  0x1e   :  { %s4237_s14 = sld [smem:[%s4905_s0 + %s4058_s15]]   ;;  %s4062_s15 = smov 23  }
  0x1f   :  { %s4242_s25 = sld [smem:[%s4905_s0 + %s4059_s22]]   ;;  %s4063_s22 = smov 24  }
  0x20   :  { %s4252_s20 = sld [smem:[%s4905_s0 + %s4061_s7]]   ;;  %s4065_s7 = smov 26  }
  0x21   :  { %4947 = sst [smem:[#allocation93_spill]] %s4227_s4 }
  0x22   :  { %s4247_s4 = sld [smem:[%s4905_s0 + %s4060_s28]]   ;;  %s4064_s28 = smov 25  }
  0x23   :  { %s4262_s30 = sld [smem:[%s4905_s0 + %s4063_s22]]   ;;  %s4067_s22 = smov 28  }
  0x24   :  { %4948 = sst [smem:[#allocation94_spill]] %s4237_s14 }
  0x25   :  { %s4257_s14 = sld [smem:[%s4905_s0 + %s4062_s15]]   ;;  %s4066_s15 = smov 27  }
  0x26   :  { %s4272_s19 = sld [smem:[%s4905_s0 + %s4065_s7]]   ;;  %s4069_s7 = smov 30  }
  0x27   :  { %s4282_s3 = sld [smem:[%s4905_s0 + %s4067_s22]]   ;;  %s4071_s22 = smov 32  }
  0x28   :  { %4949 = sst [smem:[#allocation95_spill]] %s4247_s4 }
  0x29   :  { %s4267_s4 = sld [smem:[%s4905_s0 + %s4064_s28]]   ;;  %s4068_s28 = smov 29  }
  0x2a   :  { %s4292_s21 = sld [smem:[%s4905_s0 + %s4069_s7]]   ;;  %s4073_s7 = smov 34  }
  0x2b   :  { %4950 = sst [smem:[#allocation96_spill]] %s4257_s14 }
  0x2c   :  { %s4277_s14 = sld [smem:[%s4905_s0 + %s4066_s15]]   ;;  %s4070_s15 = smov 31  }
  0x2d   :  { %s4302_s13 = sld [smem:[%s4905_s0 + %s4071_s22]]   ;;  %s4075_s22 = smov 36  }
  0x2e   :  { %s4312_s5 = sld [smem:[%s4905_s0 + %s4073_s7]]   ;;  %s4077_s7 = smov 38  }
  0x2f   :  { %4951 = sst [smem:[#allocation97_spill]] %s4267_s4 }
  0x30   :  { %s4287_s4 = sld [smem:[%s4905_s0 + %s4068_s28]]   ;;  %s4072_s28 = smov 33  }
  0x32   :  { %4952 = sst [smem:[#allocation98_spill]] %s4277_s14 }
  0x33   :  { %s4297_s14 = sld [smem:[%s4905_s0 + %s4070_s15]]   ;;  %s4074_s15 = smov 35  }
  0x34   :  { %4955 = sst [smem:[#allocation101_spill]] %s4302_s13 }
  0x35   :  { %4957 = sst [smem:[#allocation103_spill]] %s4312_s5 }
  0x36   :  { %4953 = sst [smem:[#allocation99_spill]] %s4287_s4 }
  0x37   :  { %s4307_s4 = sld [smem:[%s4905_s0 + %s4072_s28]]   ;;  %s4076_s28 = smov 37  }
  0x38   :  { %s4322_s13 = sld [smem:[%s4905_s0 + %s4075_s22]]   ;;  %s4079_s22 = smov 40  }
  0x39   :  { %4954 = sst [smem:[#allocation100_spill]] %s4297_s14 }
  0x3a   :  { %s4317_s14 = sld [smem:[%s4905_s0 + %s4074_s15]]   ;;  %s4078_s15 = smov 39  }
  0x3b   :  { %s4332_s5 = sld [smem:[%s4905_s0 + %s4077_s7]]   ;;  %s4081_s7 = smov 42  }
  0x3d   :  { %4956 = sst [smem:[#allocation102_spill]] %s4307_s4 }
  0x3e   :  { %4959 = sst [smem:[#allocation105_spill]] %s4322_s13 }
  0x3f   :  { %s4327_s4 = sld [smem:[%s4905_s0 + %s4076_s28]]   ;;  %s4080_s28 = smov 41  }
  0x40   :  { %4958 = sst [smem:[#allocation104_spill]] %s4317_s14 }
  0x41   :  { %4961 = sst [smem:[#allocation107_spill]] %s4332_s5 }
  0x42   :  { %s4337_s14 = sld [smem:[%s4905_s0 + %s4078_s15]]   ;;  %s4082_s15 = smov 43  }
  0x43   :  { %s4342_s13 = sld [smem:[%s4905_s0 + %s4079_s22]]   ;;  %s4083_s22 = smov 44  }
  0x44   :  { %s4352_s5 = sld [smem:[%s4905_s0 + %s4081_s7]]   ;;  %s4085_s7 = smov 46  }
  0x45   :  { %4960 = sst [smem:[#allocation106_spill]] %s4327_s4 }
  0x46   :  { %s4347_s4 = sld [smem:[%s4905_s0 + %s4080_s28]]   ;;  %s4084_s28 = smov 45  }
  0x48   :  { %4962 = sst [smem:[#allocation108_spill]] %s4337_s14 }
  0x49   :  { %4963 = sst [smem:[#allocation109_spill]] %s4342_s13 }
  0x4a   :  { %4965 = sst [smem:[#allocation111_spill]] %s4352_s5 }
  0x4b   :  { %s4357_s14 = sld [smem:[%s4905_s0 + %s4082_s15]]   ;;  %s4086_s15 = smov 47  }
  0x4c   :  { %4964 = sst [smem:[#allocation110_spill]] %s4347_s4 }
  0x4d   :  { %s4362_s13 = sld [smem:[%s4905_s0 + %s4083_s22]]   ;;  %s4087_s22 = smov 48  }
  0x4e   :  { %s4367_s4 = sld [smem:[%s4905_s0 + %s4084_s28]]   ;;  %s4088_s28 = smov 49  }
  0x4f   :  { %s4372_s5 = sld [smem:[%s4905_s0 + %s4085_s7]]  }
  0x51   :  { %4966 = sst [smem:[#allocation112_spill]] %s4357_s14 }
  0x52   :  { %s4377_s14 = sld [smem:[%s4905_s0 + %s4086_s15]]  }
  0x53   :  { %4967 = sst [smem:[#allocation113_spill]] %s4362_s13 }
  0x54   :  { %4968 = sst [smem:[#allocation114_spill]] %s4367_s4 }
  0x55   :  { %s4382_s13 = sld [smem:[%s4905_s0 + %s4087_s22]]  }
  0x56   :  { %s4387_s4 = sld [smem:[%s4905_s0 + %s4088_s28]]  }
  0x57   :  { %104 = vsyncpa [#allocation3], 0 }
  0x58   :  { %105 = vsyncpa [#allocation6], 0 }
  0x59   :  { %106 = vsyncpa [#allocation9], 0 }
  0x5a   :  { %107 = vsyncpa [#allocation12], 0 }
  0x5b   :  { %108 = vsyncpa [#allocation15], 0 }
  0x5c   :  { %109 = vsyncpa [#allocation18], 0 }
  0x5d   :  { %110 = vsyncpa [#allocation21], 0 }
  0x5e   :  { %111 = vsyncpa [#allocation24], 0 }
  0x5f   :  { %112 = vsyncpa [#allocation27], 0 }
  0x60   :  { %113 = vsyncpa [#allocation30], 0 }
  0x61   :  { %114 = vsyncpa [#allocation33], 0 }
  0x62   :  { %115 = vsyncpa [#allocation36], 0 }
  0x63   :  { %116 = vsyncpa [#allocation39], 0 }
  0x64   :  { %117 = vsyncpa [#allocation42], 0 }
  0x65   :  { %118 = vsyncpa [#allocation45], 0 }
  0x66   :  { %119 = vsyncpa [#allocation48], 0 }
  0x67   :  { %120 = vsyncpa [#allocation51], 0 }
  0x68   :  { %121 = vsyncpa [#allocation54], 0 }
  0x69   :  { %122 = vsyncpa [#allocation57], 0 }
  0x6a   :  { %123 = vsyncpa [#allocation60], 0 }
  0x6b   :  { %124 = vsyncpa [#allocation4], 0  ;;  %s4089_s0 = smov [#allocation5]   ;;  %s3140_s10 = scalar_lea.hbm %s4147_s9, 320 }
  0x6c   :  { %s142_s7 = sshll.u32 %s4089_s0, 4  ;;  %p3141_p0 = scmp.ne.s32.totalorder %s4147_s9, %s3140_s10  ;;  %s143_s7 = int_to_ptr.vmem [resolvable:$true] %s142_s7 }
  0x6d   :  { %p3144_p1 = scmp.lt.u32.totalorder %s3140_s10, %s4147_s9 }
  0x6f   :  { %p3146_p2 = pnand %p3144_p1, %p3141_p0 }
  0x71   :  { %3149 = shalt.err (!%p3146_p2)
}
  0x72   :  { %s3150_s11 = scalar_lea.vmem %s143_s7, 320  ;;  %p3155_p4 = scmp.lt.s32.totalorder %s143_s7, %s143_s7 }
  0x73   :  { %p3151_p3 = scmp.ne.s32.totalorder %s143_s7, %s3150_s11  ;;  %p3156_p5 = scmp.lt.s32.totalorder %s3150_s11, %s3150_s11 }
  0x75   :  { %p3157_p6 = por %p3156_p5, %p3155_p4 }
  0x77   :  { %p3158_p7 = pnand %p3157_p6, %p3151_p3 }
  0x79   :  { %3161 = shalt.err (!%p3158_p7)
}
  0x7a   :  { %s4090_s15 = smov 64   ;;  %s4091_s16 = smov 4  }
  0x7b   :  { %148 = dma.hbm_to_vmem [thread:$0]  %s4147_s9, 320, %s143_s7, [#allocation6], %s4090_s15, %s4090_s15, %s4091_s16  }
  0x7c   :  { %s4092_s18 = smov [#allocation8]   ;;  %s4093_s23 = smov [#allocation11]  }
  0x7d   :  { %s165_s22 = sshll.u32 %s4092_s18, 4  ;;  %s189_s26 = sshll.u32 %s4093_s23, 4  ;;  %s166_s22 = int_to_ptr.vmem [resolvable:$true] %s165_s22  ;;  %s190_s26 = int_to_ptr.vmem [resolvable:$true] %s189_s26 }
  0x7e   :  { %s3162_s28 = scalar_lea.hbm %s4157_s17, 16 }
  0x7f   :  { %p3163_p8 = scmp.ne.s32.totalorder %s4157_s17, %s3162_s28  ;;  %p3166_p9 = scmp.lt.u32.totalorder %s3162_s28, %s4157_s17 }
  0x81   :  { %p3168_p10 = pnand %p3166_p9, %p3163_p8 }
  0x83   :  { %3171 = shalt.err (!%p3168_p10)
}
  0x84   :  { %s3172_s1 = scalar_lea.vmem %s166_s22, 16  ;;  %s3176_s2 = scalar_lea.vmem %s166_s22, 32 }
  0x85   :  { %p3173_p11 = scmp.ne.s32.totalorder %s166_s22, %s3172_s1  ;;  %p3177_p12 = scmp.lt.s32.totalorder %s166_s22, %s166_s22 }
  0x86   :  { %p3178_p13 = scmp.lt.s32.totalorder %s3176_s2, %s3172_s1 }
  0x88   :  { %p3179_p0 = por %p3178_p13, %p3177_p12 }
  0x8a   :  { %p3180_p1 = pnand %p3179_p0, %p3173_p11 }
  0x8c   :  { %3183 = shalt.err (!%p3180_p1)
}
  0x8d   :  { %168 = dma.hbm_to_vmem [thread:$0]  %s4157_s17, 16, %s166_s22, [#allocation9]  }
  0x8e   :  { %s3184_s9 = scalar_lea.hbm %s4172_s29, 16 }
  0x8f   :  { %p3185_p2 = scmp.ne.s32.totalorder %s4172_s29, %s3184_s9  ;;  %p3188_p3 = scmp.lt.u32.totalorder %s3184_s9, %s4172_s29 }
  0x91   :  { %p3190_p4 = pnand %p3188_p3, %p3185_p2 }
  0x93   :  { %3193 = shalt.err (!%p3190_p4)
}
  0x94   :  { %s3194_s0 = scalar_lea.vmem %s190_s26, 16  ;;  %s3198_s7 = scalar_lea.vmem %s190_s26, 32 }
  0x95   :  { %p3195_p5 = scmp.ne.s32.totalorder %s190_s26, %s3194_s0  ;;  %p3199_p6 = scmp.lt.s32.totalorder %s190_s26, %s190_s26 }
  0x96   :  { %p3200_p7 = scmp.lt.s32.totalorder %s3198_s7, %s3194_s0 }
  0x98   :  { %p3201_p8 = por %p3200_p7, %p3199_p6 }
  0x9a   :  { %p3202_p9 = pnand %p3201_p8, %p3195_p5 }
  0x9c   :  { %3205 = shalt.err (!%p3202_p9)
}
  0x9d   :  { %192 = dma.hbm_to_vmem [thread:$0]  %s4172_s29, 16, %s190_s26, [#allocation12]  }
  0x9e   :  { %s4094_s17 = smov [#allocation14]   ;;  %s4095_s11 = smov [#allocation17]  }
  0x9f   :  { %s208_s10 = sshll.u32 %s4094_s17, 4  ;;  %s233_s18 = sshll.u32 %s4095_s11, 4  ;;  %s209_s10 = int_to_ptr.vmem [resolvable:$true] %s208_s10  ;;  %s234_s18 = int_to_ptr.vmem [resolvable:$true] %s233_s18 }
  0xa0   :  { %s3206_s22 = scalar_lea.hbm %s4182_s8, 256 }
  0xa1   :  { %p3207_p10 = scmp.ne.s32.totalorder %s4182_s8, %s3206_s22  ;;  %p3210_p11 = scmp.lt.u32.totalorder %s3206_s22, %s4182_s8 }
  0xa3   :  { %p3212_p12 = pnand %p3210_p11, %p3207_p10 }
  0xa5   :  { %3215 = shalt.err (!%p3212_p12)
}
  0xa6   :  { %s3216_s23 = scalar_lea.vmem %s209_s10, 256  ;;  %p3221_p0 = scmp.lt.s32.totalorder %s209_s10, %s209_s10 }
  0xa7   :  { %p3217_p13 = scmp.ne.s32.totalorder %s209_s10, %s3216_s23  ;;  %p3222_p1 = scmp.lt.s32.totalorder %s3216_s23, %s3216_s23 }
  0xa9   :  { %p3223_p2 = por %p3222_p1, %p3221_p0 }
  0xab   :  { %p3224_p3 = pnand %p3223_p2, %p3217_p13 }
  0xad   :  { %3227 = shalt.err (!%p3224_p3)
}
  0xae   :  { %s4096_s28 = smov 128   ;;  %s4097_s29 = smov 8  }
  0xaf   :  { %214 = dma.hbm_to_vmem [thread:$0]  %s4182_s8, 256, %s209_s10, [#allocation15], %s4096_s28, %s4096_s28, %s4097_s29  }
  0xb0   :  { %s3228_s26 = scalar_lea.hbm %s4197_s24, 16 }
  0xb1   :  { %p3229_p4 = scmp.ne.s32.totalorder %s4197_s24, %s3228_s26  ;;  %p3232_p5 = scmp.lt.u32.totalorder %s3228_s26, %s4197_s24 }
  0xb3   :  { %p3234_p6 = pnand %p3232_p5, %p3229_p4 }
  0xb5   :  { %3237 = shalt.err (!%p3234_p6)
}
  0xb6   :  { %s3238_s1 = scalar_lea.vmem %s234_s18, 16  ;;  %s3242_s2 = scalar_lea.vmem %s234_s18, 32 }
  0xb7   :  { %p3239_p7 = scmp.ne.s32.totalorder %s234_s18, %s3238_s1  ;;  %p3243_p8 = scmp.lt.s32.totalorder %s234_s18, %s234_s18 }
  0xb8   :  { %p3244_p9 = scmp.lt.s32.totalorder %s3242_s2, %s3238_s1 }
  0xba   :  { %p3245_p10 = por %p3244_p9, %p3243_p8 }
  0xbc   :  { %p3246_p11 = pnand %p3245_p10, %p3239_p7 }
  0xbe   :  { %3249 = shalt.err (!%p3246_p11)
}
  0xbf   :  { %236 = dma.hbm_to_vmem [thread:$0]  %s4197_s24, 16, %s234_s18, [#allocation18]  }
  0xc0   :  { %s4098_s8 = smov [#allocation20]   ;;  %s4099_s0 = smov [#allocation23]  }
  0xc1   :  { %s257_s9 = sshll.u32 %s4098_s8, 4  ;;  %s276_s7 = sshll.u32 %s4099_s0, 4  ;;  %s258_s9 = int_to_ptr.vmem [resolvable:$true] %s257_s9  ;;  %s277_s7 = int_to_ptr.vmem [resolvable:$true] %s276_s7 }
  0xc2   :  { %s3250_s17 = scalar_lea.hbm %s4212_s12, 16 }
  0xc3   :  { %p3251_p12 = scmp.ne.s32.totalorder %s4212_s12, %s3250_s17  ;;  %p3254_p13 = scmp.lt.u32.totalorder %s3250_s17, %s4212_s12 }
  0xc5   :  { %p3256_p0 = pnand %p3254_p13, %p3251_p12 }
  0xc7   :  { %3259 = shalt.err (!%p3256_p0)
}
  0xc8   :  { %s3260_s10 = scalar_lea.vmem %s258_s9, 16  ;;  %s3264_s11 = scalar_lea.vmem %s258_s9, 32 }
  0xc9   :  { %p3261_p1 = scmp.ne.s32.totalorder %s258_s9, %s3260_s10  ;;  %p3265_p2 = scmp.lt.s32.totalorder %s258_s9, %s258_s9 }
  0xca   :  { %p3266_p3 = scmp.lt.s32.totalorder %s3264_s11, %s3260_s10 }
  0xcc   :  { %p3267_p4 = por %p3266_p3, %p3265_p2 }
  0xce   :  { %p3268_p5 = pnand %p3267_p4, %p3261_p1 }
  0xd0   :  { %3271 = shalt.err (!%p3268_p5)
}
  0xd1   :  { %260 = dma.hbm_to_vmem [thread:$0]  %s4212_s12, 16, %s258_s9, [#allocation21]  }
  0xd2   :  { %s3272_s24 = scalar_lea.hbm %s4222_s27, 256 }
  0xd3   :  { %p3273_p6 = scmp.ne.s32.totalorder %s4222_s27, %s3272_s24  ;;  %p3276_p7 = scmp.lt.u32.totalorder %s3272_s24, %s4222_s27 }
  0xd5   :  { %p3278_p8 = pnand %p3276_p7, %p3273_p6 }
  0xd7   :  { %3281 = shalt.err (!%p3278_p8)
}
  0xd8   :  { %s3282_s18 = scalar_lea.vmem %s277_s7, 256  ;;  %p3287_p10 = scmp.lt.s32.totalorder %s277_s7, %s277_s7 }
  0xd9   :  { %p3283_p9 = scmp.ne.s32.totalorder %s277_s7, %s3282_s18  ;;  %p3288_p11 = scmp.lt.s32.totalorder %s3282_s18, %s3282_s18 }
  0xdb   :  { %p3289_p12 = por %p3288_p11, %p3287_p10 }
  0xdd   :  { %p3290_p13 = pnand %p3289_p12, %p3283_p9 }
  0xdf   :  { %3293 = shalt.err (!%p3290_p13)
}
  0xe0   :  { %282 = dma.hbm_to_vmem [thread:$0]  %s4222_s27, 256, %s277_s7, [#allocation24], %s4096_s28, %s4096_s28, %s4097_s29  }
  0xe1   :  { %s4100_s12 = smov [#allocation26]   ;;  %s4101_s23 = smov [#allocation29]  }
  0xe2   :  { %s301_s22 = sshll.u32 %s4100_s12, 4  ;;  %s320_s26 = sshll.u32 %s4101_s23, 4  ;;  %s302_s22 = int_to_ptr.vmem [resolvable:$true] %s301_s22  ;;  %s321_s26 = int_to_ptr.vmem [resolvable:$true] %s320_s26 }
  0xe3   :  { %s3294_s1 = scalar_lea.hbm %s4232_s6, 16 }
  0xe4   :  { %p3295_p0 = scmp.ne.s32.totalorder %s4232_s6, %s3294_s1  ;;  %p3298_p1 = scmp.lt.u32.totalorder %s3294_s1, %s4232_s6 }
  0xe6   :  { %p3300_p2 = pnand %p3298_p1, %p3295_p0 }
  0xe8   :  { %3303 = shalt.err (!%p3300_p2)
}
  0xe9   :  { %s3304_s2 = scalar_lea.vmem %s302_s22, 16  ;;  %s3308_s8 = scalar_lea.vmem %s302_s22, 32 }
  0xea   :  { %p3305_p3 = scmp.ne.s32.totalorder %s302_s22, %s3304_s2  ;;  %p3309_p4 = scmp.lt.s32.totalorder %s302_s22, %s302_s22 }
  0xeb   :  { %p3310_p5 = scmp.lt.s32.totalorder %s3308_s8, %s3304_s2 }
  0xed   :  { %p3311_p6 = por %p3310_p5, %p3309_p4 }
  0xef   :  { %p3312_p7 = pnand %p3311_p6, %p3305_p3 }
  0xf1   :  { %3315 = shalt.err (!%p3312_p7)
}
  0xf2   :  { %304 = dma.hbm_to_vmem [thread:$0]  %s4232_s6, 16, %s302_s22, [#allocation27]  }
  0xf3   :  { %s3316_s27 = scalar_lea.hbm %s4242_s25, 256 }
  0xf4   :  { %p3317_p8 = scmp.ne.s32.totalorder %s4242_s25, %s3316_s27  ;;  %p3320_p9 = scmp.lt.u32.totalorder %s3316_s27, %s4242_s25 }
  0xf6   :  { %p3322_p10 = pnand %p3320_p9, %p3317_p8 }
  0xf8   :  { %3325 = shalt.err (!%p3322_p10)
}
  0xf9   :  { %s3326_s9 = scalar_lea.vmem %s321_s26, 256  ;;  %p3331_p12 = scmp.lt.s32.totalorder %s321_s26, %s321_s26 }
  0xfa   :  { %p3327_p11 = scmp.ne.s32.totalorder %s321_s26, %s3326_s9  ;;  %p3332_p13 = scmp.lt.s32.totalorder %s3326_s9, %s3326_s9 }
  0xfc   :  { %p3333_p0 = por %p3332_p13, %p3331_p12 }
  0xfe   :  { %p3334_p1 = pnand %p3333_p0, %p3327_p11 }
 0x100   :  { %3337 = shalt.err (!%p3334_p1)
}
 0x101   :  { %326 = dma.hbm_to_vmem [thread:$0]  %s4242_s25, 256, %s321_s26, [#allocation30], %s4096_s28, %s4096_s28, %s4097_s29  }
 0x102   :  { %s4102_s6 = smov [#allocation32]   ;;  %s4103_s7 = smov [#allocation35]  }
 0x103   :  { %s345_s0 = sshll.u32 %s4102_s6, 4  ;;  %s364_s17 = sshll.u32 %s4103_s7, 4  ;;  %s346_s0 = int_to_ptr.vmem [resolvable:$true] %s345_s0  ;;  %s365_s17 = int_to_ptr.vmem [resolvable:$true] %s364_s17 }
 0x104   :  { %s3338_s10 = scalar_lea.hbm %s4252_s20, 16 }
 0x105   :  { %p3339_p2 = scmp.ne.s32.totalorder %s4252_s20, %s3338_s10  ;;  %p3342_p3 = scmp.lt.u32.totalorder %s3338_s10, %s4252_s20 }
 0x107   :  { %p3344_p4 = pnand %p3342_p3, %p3339_p2 }
 0x109   :  { %3347 = shalt.err (!%p3344_p4)
}
 0x10a   :  { %s3348_s11 = scalar_lea.vmem %s346_s0, 16  ;;  %s3352_s24 = scalar_lea.vmem %s346_s0, 32 }
 0x10b   :  { %p3349_p5 = scmp.ne.s32.totalorder %s346_s0, %s3348_s11  ;;  %p3353_p6 = scmp.lt.s32.totalorder %s346_s0, %s346_s0 }
 0x10c   :  { %p3354_p7 = scmp.lt.s32.totalorder %s3352_s24, %s3348_s11 }
 0x10e   :  { %p3355_p8 = por %p3354_p7, %p3353_p6 }
 0x110   :  { %p3356_p9 = pnand %p3355_p8, %p3349_p5 }
 0x112   :  { %3359 = shalt.err (!%p3356_p9)
}
 0x113   :  { %348 = dma.hbm_to_vmem [thread:$0]  %s4252_s20, 16, %s346_s0, [#allocation33]  }
 0x114   :  { %s3360_s25 = scalar_lea.hbm %s4262_s30, 256 }
 0x115   :  { %p3361_p10 = scmp.ne.s32.totalorder %s4262_s30, %s3360_s25  ;;  %p3364_p11 = scmp.lt.u32.totalorder %s3360_s25, %s4262_s30 }
 0x117   :  { %p3366_p12 = pnand %p3364_p11, %p3361_p10 }
 0x119   :  { %3369 = shalt.err (!%p3366_p12)
}
 0x11a   :  { %s3370_s18 = scalar_lea.vmem %s365_s17, 256  ;;  %p3375_p0 = scmp.lt.s32.totalorder %s365_s17, %s365_s17 }
 0x11b   :  { %p3371_p13 = scmp.ne.s32.totalorder %s365_s17, %s3370_s18  ;;  %p3376_p1 = scmp.lt.s32.totalorder %s3370_s18, %s3370_s18 }
 0x11d   :  { %p3377_p2 = por %p3376_p1, %p3375_p0 }
 0x11f   :  { %p3378_p3 = pnand %p3377_p2, %p3371_p13 }
 0x121   :  { %3381 = shalt.err (!%p3378_p3)
}
 0x122   :  { %370 = dma.hbm_to_vmem [thread:$0]  %s4262_s30, 256, %s365_s17, [#allocation36], %s4096_s28, %s4096_s28, %s4097_s29  }
 0x123   :  { %s4104_s20 = smov [#allocation38]   ;;  %s4105_s22 = smov [#allocation41]  }
 0x124   :  { %s389_s12 = sshll.u32 %s4104_s20, 4  ;;  %s408_s23 = sshll.u32 %s4105_s22, 4  ;;  %s390_s12 = int_to_ptr.vmem [resolvable:$true] %s389_s12  ;;  %s409_s23 = int_to_ptr.vmem [resolvable:$true] %s408_s23 }
 0x125   :  { %s3382_s26 = scalar_lea.hbm %s4272_s19, 16 }
 0x126   :  { %p3383_p4 = scmp.ne.s32.totalorder %s4272_s19, %s3382_s26  ;;  %p3386_p5 = scmp.lt.u32.totalorder %s3382_s26, %s4272_s19 }
 0x128   :  { %p3388_p6 = pnand %p3386_p5, %p3383_p4 }
 0x12a   :  { %3391 = shalt.err (!%p3388_p6)
}
 0x12b   :  { %s3392_s1 = scalar_lea.vmem %s390_s12, 16  ;;  %s3396_s2 = scalar_lea.vmem %s390_s12, 32 }
 0x12c   :  { %p3393_p7 = scmp.ne.s32.totalorder %s390_s12, %s3392_s1  ;;  %p3397_p8 = scmp.lt.s32.totalorder %s390_s12, %s390_s12 }
 0x12d   :  { %p3398_p9 = scmp.lt.s32.totalorder %s3396_s2, %s3392_s1 }
 0x12f   :  { %p3399_p10 = por %p3398_p9, %p3397_p8 }
 0x131   :  { %p3400_p11 = pnand %p3399_p10, %p3393_p7 }
 0x133   :  { %3403 = shalt.err (!%p3400_p11)
}
 0x134   :  { %392 = dma.hbm_to_vmem [thread:$0]  %s4272_s19, 16, %s390_s12, [#allocation39]  }
 0x135   :  { %s3404_s30 = scalar_lea.hbm %s4282_s3, 256 }
 0x136   :  { %p3405_p12 = scmp.ne.s32.totalorder %s4282_s3, %s3404_s30  ;;  %p3408_p13 = scmp.lt.u32.totalorder %s3404_s30, %s4282_s3 }
 0x138   :  { %p3410_p0 = pnand %p3408_p13, %p3405_p12 }
 0x13a   :  { %3413 = shalt.err (!%p3410_p0)
}
 0x13b   :  { %s3414_s8 = scalar_lea.vmem %s409_s23, 256  ;;  %p3419_p2 = scmp.lt.s32.totalorder %s409_s23, %s409_s23 }
 0x13c   :  { %p3415_p1 = scmp.ne.s32.totalorder %s409_s23, %s3414_s8  ;;  %p3420_p3 = scmp.lt.s32.totalorder %s3414_s8, %s3414_s8 }
 0x13e   :  { %p3421_p4 = por %p3420_p3, %p3419_p2 }
 0x140   :  { %p3422_p5 = pnand %p3421_p4, %p3415_p1 }
 0x142   :  { %3425 = shalt.err (!%p3422_p5)
}
 0x143   :  { %414 = dma.hbm_to_vmem [thread:$0]  %s4282_s3, 256, %s409_s23, [#allocation42], %s4096_s28, %s4096_s28, %s4097_s29  }
 0x144   :  { %s4106_s19 = smov [#allocation44]   ;;  %s4107_s9 = smov [#allocation47]  }
 0x145   :  { %s433_s27 = sshll.u32 %s4106_s19, 4  ;;  %s452_s6 = sshll.u32 %s4107_s9, 4  ;;  %s434_s27 = int_to_ptr.vmem [resolvable:$true] %s433_s27  ;;  %s453_s6 = int_to_ptr.vmem [resolvable:$true] %s452_s6 }
 0x146   :  { %s3426_s0 = scalar_lea.hbm %s4292_s21, 16 }
 0x147   :  { %p3427_p6 = scmp.ne.s32.totalorder %s4292_s21, %s3426_s0  ;;  %p3430_p7 = scmp.lt.u32.totalorder %s3426_s0, %s4292_s21 }
 0x149   :  { %p3432_p8 = pnand %p3430_p7, %p3427_p6 }
 0x14b   :  { %3435 = shalt.err (!%p3432_p8)
}
 0x14c   :  { %s3436_s7 = scalar_lea.vmem %s434_s27, 16  ;;  %s3440_s17 = scalar_lea.vmem %s434_s27, 32 }
 0x14d   :  { %p3437_p9 = scmp.ne.s32.totalorder %s434_s27, %s3436_s7  ;;  %p3441_p10 = scmp.lt.s32.totalorder %s434_s27, %s434_s27 }
 0x14e   :  { %p3442_p11 = scmp.lt.s32.totalorder %s3440_s17, %s3436_s7 }
 0x150   :  { %p3443_p12 = por %p3442_p11, %p3441_p10 }
 0x152   :  { %p3444_p13 = pnand %p3443_p12, %p3437_p9 }
 0x154   :  { %3447 = shalt.err (!%p3444_p13)
}
 0x155   :  { %s4969_s3 = sld [smem:[#allocation101_spill]] }
 0x156   :  { %436 = dma.hbm_to_vmem [thread:$0]  %s4292_s21, 16, %s434_s27, [#allocation45]  }
 0x15b   :  { %s3448_s10 = scalar_lea.hbm %s4969_s3, 256 }
 0x15c   :  { %p3449_p0 = scmp.ne.s32.totalorder %s4969_s3, %s3448_s10  ;;  %p3452_p1 = scmp.lt.u32.totalorder %s3448_s10, %s4969_s3 }
 0x15e   :  { %p3454_p2 = pnand %p3452_p1, %p3449_p0 }
 0x160   :  { %3457 = shalt.err (!%p3454_p2)
}
 0x161   :  { %s3458_s11 = scalar_lea.vmem %s453_s6, 256  ;;  %p3463_p4 = scmp.lt.s32.totalorder %s453_s6, %s453_s6 }
 0x162   :  { %p3459_p3 = scmp.ne.s32.totalorder %s453_s6, %s3458_s11  ;;  %p3464_p5 = scmp.lt.s32.totalorder %s3458_s11, %s3458_s11 }
 0x164   :  { %p3465_p6 = por %p3464_p5, %p3463_p4 }
 0x166   :  { %p3466_p7 = pnand %p3465_p6, %p3459_p3 }
 0x168   :  { %3469 = shalt.err (!%p3466_p7)
}
 0x169   :  { %s4970_s24 = sld [smem:[#allocation107_spill]]  ;;  %s4108_s21 = smov [#allocation50]  }
 0x16a   :  { %458 = dma.hbm_to_vmem [thread:$0]  %s4969_s3, 256, %s453_s6, [#allocation48], %s4096_s28, %s4096_s28, %s4097_s29  }
 0x16b   :  { %s483_s25 = sshll.u32 %s4108_s21, 4  ;;  %s4109_s18 = smov [#allocation53]   ;;  %s484_s25 = int_to_ptr.vmem [resolvable:$true] %s483_s25 }
 0x16c   :  { %s507_s20 = sshll.u32 %s4109_s18, 4  ;;  %s508_s20 = int_to_ptr.vmem [resolvable:$true] %s507_s20 }
 0x16f   :  { %s3470_s12 = scalar_lea.hbm %s4970_s24, 16 }
 0x170   :  { %p3471_p8 = scmp.ne.s32.totalorder %s4970_s24, %s3470_s12  ;;  %p3474_p9 = scmp.lt.u32.totalorder %s3470_s12, %s4970_s24 }
 0x172   :  { %p3476_p10 = pnand %p3474_p9, %p3471_p8 }
 0x174   :  { %3479 = shalt.err (!%p3476_p10)
}
 0x175   :  { %s3480_s22 = scalar_lea.vmem %s484_s25, 16  ;;  %s3484_s23 = scalar_lea.vmem %s484_s25, 32 }
 0x176   :  { %p3481_p11 = scmp.ne.s32.totalorder %s484_s25, %s3480_s22  ;;  %p3485_p12 = scmp.lt.s32.totalorder %s484_s25, %s484_s25 }
 0x177   :  { %p3486_p13 = scmp.lt.s32.totalorder %s3484_s23, %s3480_s22 }
 0x179   :  { %p3487_p0 = por %p3486_p13, %p3485_p12 }
 0x17b   :  { %p3488_p1 = pnand %p3487_p0, %p3481_p11 }
 0x17d   :  { %3491 = shalt.err (!%p3488_p1)
}
 0x17e   :  { %s4971_s26 = sld [smem:[#allocation111_spill]] }
 0x17f   :  { %486 = dma.hbm_to_vmem [thread:$0]  %s4970_s24, 16, %s484_s25, [#allocation51]  }
 0x184   :  { %s3492_s1 = scalar_lea.hbm %s4971_s26, 16 }
 0x185   :  { %p3493_p2 = scmp.ne.s32.totalorder %s4971_s26, %s3492_s1  ;;  %p3496_p3 = scmp.lt.u32.totalorder %s3492_s1, %s4971_s26 }
 0x187   :  { %p3498_p4 = pnand %p3496_p3, %p3493_p2 }
 0x189   :  { %3501 = shalt.err (!%p3498_p4)
}
 0x18a   :  { %s3502_s2 = scalar_lea.vmem %s508_s20, 16  ;;  %s3506_s30 = scalar_lea.vmem %s508_s20, 32 }
 0x18b   :  { %p3503_p5 = scmp.ne.s32.totalorder %s508_s20, %s3502_s2  ;;  %p3507_p6 = scmp.lt.s32.totalorder %s508_s20, %s508_s20 }
 0x18c   :  { %p3508_p7 = scmp.lt.s32.totalorder %s3506_s30, %s3502_s2 }
 0x18e   :  { %p3509_p8 = por %p3508_p7, %p3507_p6 }
 0x190   :  { %p3510_p9 = pnand %p3509_p8, %p3503_p5 }
 0x192   :  { %3513 = shalt.err (!%p3510_p9)
}
 0x193   :  { %s4972_s8 = sld [smem:[#allocation114_spill]]  ;;  %s4110_s19 = smov [#allocation56]  }
 0x194   :  { %510 = dma.hbm_to_vmem [thread:$0]  %s4971_s26, 16, %s508_s20, [#allocation54]  }
 0x195   :  { %s528_s27 = sshll.u32 %s4110_s19, 4  ;;  %s4111_s9 = smov [#allocation2]   ;;  %s529_s27 = int_to_ptr.vmem [resolvable:$true] %s528_s27 }
 0x196   :  { %s130_s6 = sshll.u32 %s4111_s9, 4  ;;  %s131_s6 = int_to_ptr.vmem [resolvable:$true] %s130_s6 }
 0x199   :  { %s3514_s0 = scalar_lea.hbm %s4972_s8, 256 }
 0x19a   :  { %p3515_p10 = scmp.ne.s32.totalorder %s4972_s8, %s3514_s0  ;;  %p3518_p11 = scmp.lt.u32.totalorder %s3514_s0, %s4972_s8 }
 0x19c   :  { %p3520_p12 = pnand %p3518_p11, %p3515_p10 }
 0x19e   :  { %3523 = shalt.err (!%p3520_p12)
}
 0x19f   :  { %s3524_s7 = scalar_lea.vmem %s529_s27, 256  ;;  %p3529_p0 = scmp.lt.s32.totalorder %s529_s27, %s529_s27 }
 0x1a0   :  { %p3525_p13 = scmp.ne.s32.totalorder %s529_s27, %s3524_s7  ;;  %p3530_p1 = scmp.lt.s32.totalorder %s3524_s7, %s3524_s7 }
 0x1a2   :  { %p3531_p2 = por %p3530_p1, %p3529_p0 }
 0x1a4   :  { %p3532_p3 = pnand %p3531_p2, %p3525_p13 }
 0x1a6   :  { %3535 = shalt.err (!%p3532_p3)
}
 0x1a7   :  { %s4973_s17 = sld [smem:[#allocation83_spill]] }
 0x1a8   :  { %534 = dma.hbm_to_vmem [thread:$0]  %s4972_s8, 256, %s529_s27, [#allocation57], %s4090_s15, %s4090_s15, %s4091_s16  }
 0x1ad   :  { %s3536_s3 = scalar_lea.hbm %s4973_s17, 256 }
 0x1ae   :  { %p3537_p4 = scmp.ne.s32.totalorder %s4973_s17, %s3536_s3  ;;  %p3540_p5 = scmp.lt.u32.totalorder %s3536_s3, %s4973_s17 }
 0x1b0   :  { %p3542_p6 = pnand %p3540_p5, %p3537_p4 }
 0x1b2   :  { %3545 = shalt.err (!%p3542_p6)
}
 0x1b3   :  { %s3546_s10 = scalar_lea.vmem %s131_s6, 256  ;;  %p3551_p8 = scmp.lt.s32.totalorder %s131_s6, %s131_s6 }
 0x1b4   :  { %p3547_p7 = scmp.ne.s32.totalorder %s131_s6, %s3546_s10  ;;  %p3552_p9 = scmp.lt.s32.totalorder %s3546_s10, %s3546_s10 }
 0x1b6   :  { %p3553_p10 = por %p3552_p9, %p3551_p8 }
 0x1b8   :  { %p3554_p11 = pnand %p3553_p10, %p3547_p7 }
 0x1ba   :  { %3557 = shalt.err (!%p3554_p11)
}
 0x1bb   :  { %s4974_s11 = sld [smem:[#allocation84_spill]]  ;;  %s4112_s24 = smov [#allocation7]  }
 0x1bc   :  { %136 = dma.hbm_to_vmem [thread:$0]  %s4973_s17, 256, %s131_s6, [#allocation3], %s4096_s28, %s4096_s28, %s4097_s29  }
 0x1bd   :  { %s155_s21 = sshll.u32 %s4112_s24, 4  ;;  %s4113_s25 = smov [#allocation10]   ;;  %s156_s21 = int_to_ptr.vmem [resolvable:$true] %s155_s21 }
 0x1be   :  { %s174_s18 = sshll.u32 %s4113_s25, 4  ;;  %s175_s18 = int_to_ptr.vmem [resolvable:$true] %s174_s18 }
 0x1c1   :  { %s3558_s20 = scalar_lea.hbm %s4974_s11, 16 }
 0x1c2   :  { %p3559_p12 = scmp.ne.s32.totalorder %s4974_s11, %s3558_s20  ;;  %p3562_p13 = scmp.lt.u32.totalorder %s3558_s20, %s4974_s11 }
 0x1c4   :  { %p3564_p0 = pnand %p3562_p13, %p3559_p12 }
 0x1c6   :  { %3567 = shalt.err (!%p3564_p0)
}
 0x1c7   :  { %s3568_s12 = scalar_lea.vmem %s156_s21, 16  ;;  %s3572_s22 = scalar_lea.vmem %s156_s21, 32 }
 0x1c8   :  { %p3569_p1 = scmp.ne.s32.totalorder %s156_s21, %s3568_s12  ;;  %p3573_p2 = scmp.lt.s32.totalorder %s156_s21, %s156_s21 }
 0x1c9   :  { %p3574_p3 = scmp.lt.s32.totalorder %s3572_s22, %s3568_s12 }
 0x1cb   :  { %p3575_p4 = por %p3574_p3, %p3573_p2 }
 0x1cd   :  { %p3576_p5 = pnand %p3575_p4, %p3569_p1 }
 0x1cf   :  { %3579 = shalt.err (!%p3576_p5)
}
 0x1d0   :  { %s4975_s23 = sld [smem:[#allocation85_spill]] }
 0x1d1   :  { %158 = dma.hbm_to_vmem [thread:$0]  %s4974_s11, 16, %s156_s21, [#allocation6]  }
 0x1d6   :  { %s3580_s26 = scalar_lea.hbm %s4975_s23, 256 }
 0x1d7   :  { %p3581_p6 = scmp.ne.s32.totalorder %s4975_s23, %s3580_s26  ;;  %p3584_p7 = scmp.lt.u32.totalorder %s3580_s26, %s4975_s23 }
 0x1d9   :  { %p3586_p8 = pnand %p3584_p7, %p3581_p6 }
 0x1db   :  { %3589 = shalt.err (!%p3586_p8)
}
 0x1dc   :  { %s3590_s1 = scalar_lea.vmem %s175_s18, 256  ;;  %p3595_p10 = scmp.lt.s32.totalorder %s175_s18, %s175_s18 }
 0x1dd   :  { %p3591_p9 = scmp.ne.s32.totalorder %s175_s18, %s3590_s1  ;;  %p3596_p11 = scmp.lt.s32.totalorder %s3590_s1, %s3590_s1 }
 0x1df   :  { %p3597_p12 = por %p3596_p11, %p3595_p10 }
 0x1e1   :  { %p3598_p13 = pnand %p3597_p12, %p3591_p9 }
 0x1e3   :  { %3601 = shalt.err (!%p3598_p13)
}
 0x1e4   :  { %s4976_s2 = sld [smem:[#allocation87_spill]]  ;;  %s4114_s30 = smov [#allocation13]  }
 0x1e5   :  { %180 = dma.hbm_to_vmem [thread:$0]  %s4975_s23, 256, %s175_s18, [#allocation9], %s4096_s28, %s4096_s28, %s4097_s29  }
 0x1e6   :  { %s199_s8 = sshll.u32 %s4114_s30, 4  ;;  %s4115_s19 = smov [#allocation16]   ;;  %s200_s8 = int_to_ptr.vmem [resolvable:$true] %s199_s8 }
 0x1e7   :  { %s223_s27 = sshll.u32 %s4115_s19, 4  ;;  %s224_s27 = int_to_ptr.vmem [resolvable:$true] %s223_s27 }
 0x1ea   :  { %s3602_s9 = scalar_lea.hbm %s4976_s2, 16 }
 0x1eb   :  { %p3603_p0 = scmp.ne.s32.totalorder %s4976_s2, %s3602_s9  ;;  %p3606_p1 = scmp.lt.u32.totalorder %s3602_s9, %s4976_s2 }
 0x1ed   :  { %p3608_p2 = pnand %p3606_p1, %p3603_p0 }
 0x1ef   :  { %3611 = shalt.err (!%p3608_p2)
}
 0x1f0   :  { %s3612_s6 = scalar_lea.vmem %s200_s8, 16  ;;  %s3616_s0 = scalar_lea.vmem %s200_s8, 32 }
 0x1f1   :  { %p3613_p3 = scmp.ne.s32.totalorder %s200_s8, %s3612_s6  ;;  %p3617_p4 = scmp.lt.s32.totalorder %s200_s8, %s200_s8 }
 0x1f2   :  { %p3618_p5 = scmp.lt.s32.totalorder %s3616_s0, %s3612_s6 }
 0x1f4   :  { %p3619_p6 = por %p3618_p5, %p3617_p4 }
 0x1f6   :  { %p3620_p7 = pnand %p3619_p6, %p3613_p3 }
 0x1f8   :  { %3623 = shalt.err (!%p3620_p7)
}
 0x1f9   :  { %s4977_s7 = sld [smem:[#allocation89_spill]] }
 0x1fa   :  { %202 = dma.hbm_to_vmem [thread:$0]  %s4976_s2, 16, %s200_s8, [#allocation12]  }
 0x1ff   :  { %s3624_s17 = scalar_lea.hbm %s4977_s7, 16 }
 0x200   :  { %p3625_p8 = scmp.ne.s32.totalorder %s4977_s7, %s3624_s17  ;;  %p3628_p9 = scmp.lt.u32.totalorder %s3624_s17, %s4977_s7 }
 0x202   :  { %p3630_p10 = pnand %p3628_p9, %p3625_p8 }
 0x204   :  { %3633 = shalt.err (!%p3630_p10)
}
 0x205   :  { %s3634_s3 = scalar_lea.vmem %s224_s27, 16  ;;  %s3638_s10 = scalar_lea.vmem %s224_s27, 32 }
 0x206   :  { %p3635_p11 = scmp.ne.s32.totalorder %s224_s27, %s3634_s3  ;;  %p3639_p12 = scmp.lt.s32.totalorder %s224_s27, %s224_s27 }
 0x207   :  { %p3640_p13 = scmp.lt.s32.totalorder %s3638_s10, %s3634_s3 }
 0x209   :  { %p3641_p0 = por %p3640_p13, %p3639_p12 }
 0x20b   :  { %p3642_p1 = pnand %p3641_p0, %p3635_p11 }
 0x20d   :  { %3645 = shalt.err (!%p3642_p1)
}
 0x20e   :  { %s4978_s11 = sld [smem:[#allocation90_spill]]  ;;  %s4116_s24 = smov [#allocation19]  }
 0x20f   :  { %226 = dma.hbm_to_vmem [thread:$0]  %s4977_s7, 16, %s224_s27, [#allocation15]  }
 0x210   :  { %s242_s21 = sshll.u32 %s4116_s24, 4  ;;  %s4117_s25 = smov [#allocation22]   ;;  %s243_s21 = int_to_ptr.vmem [resolvable:$true] %s242_s21 }
 0x211   :  { %s267_s18 = sshll.u32 %s4117_s25, 4  ;;  %s268_s18 = int_to_ptr.vmem [resolvable:$true] %s267_s18 }
 0x214   :  { %s3646_s20 = scalar_lea.hbm %s4978_s11, 256 }
 0x215   :  { %p3647_p2 = scmp.ne.s32.totalorder %s4978_s11, %s3646_s20  ;;  %p3650_p3 = scmp.lt.u32.totalorder %s3646_s20, %s4978_s11 }
 0x217   :  { %p3652_p4 = pnand %p3650_p3, %p3647_p2 }
 0x219   :  { %3655 = shalt.err (!%p3652_p4)
}
 0x21a   :  { %s3656_s12 = scalar_lea.vmem %s243_s21, 256  ;;  %p3661_p6 = scmp.lt.s32.totalorder %s243_s21, %s243_s21 }
 0x21b   :  { %p3657_p5 = scmp.ne.s32.totalorder %s243_s21, %s3656_s12  ;;  %p3662_p7 = scmp.lt.s32.totalorder %s3656_s12, %s3656_s12 }
 0x21d   :  { %p3663_p8 = por %p3662_p7, %p3661_p6 }
 0x21f   :  { %p3664_p9 = pnand %p3663_p8, %p3657_p5 }
 0x221   :  { %3667 = shalt.err (!%p3664_p9)
}
 0x222   :  { %s4979_s22 = sld [smem:[#allocation92_spill]] }
 0x223   :  { %248 = dma.hbm_to_vmem [thread:$0]  %s4978_s11, 256, %s243_s21, [#allocation18], %s4096_s28, %s4096_s28, %s4097_s29  }
 0x228   :  { %s3668_s23 = scalar_lea.hbm %s4979_s22, 16 }
 0x229   :  { %p3669_p10 = scmp.ne.s32.totalorder %s4979_s22, %s3668_s23  ;;  %p3672_p11 = scmp.lt.u32.totalorder %s3668_s23, %s4979_s22 }
 0x22b   :  { %p3674_p12 = pnand %p3672_p11, %p3669_p10 }
 0x22d   :  { %3677 = shalt.err (!%p3674_p12)
}
 0x22e   :  { %s3678_s26 = scalar_lea.vmem %s268_s18, 16  ;;  %s3682_s1 = scalar_lea.vmem %s268_s18, 32 }
 0x22f   :  { %p3679_p13 = scmp.ne.s32.totalorder %s268_s18, %s3678_s26  ;;  %p3683_p0 = scmp.lt.s32.totalorder %s268_s18, %s268_s18 }
 0x230   :  { %p3684_p1 = scmp.lt.s32.totalorder %s3682_s1, %s3678_s26 }
 0x232   :  { %p3685_p2 = por %p3684_p1, %p3683_p0 }
 0x234   :  { %p3686_p3 = pnand %p3685_p2, %p3679_p13 }
 0x236   :  { %3689 = shalt.err (!%p3686_p3)
}
 0x237   :  { %s4980_s2 = sld [smem:[#allocation93_spill]]  ;;  %s4118_s30 = smov [#allocation25]  }
 0x238   :  { %270 = dma.hbm_to_vmem [thread:$0]  %s4979_s22, 16, %s268_s18, [#allocation21]  }
 0x239   :  { %s288_s8 = sshll.u32 %s4118_s30, 4  ;;  %s4119_s19 = smov [#allocation28]   ;;  %s289_s8 = int_to_ptr.vmem [resolvable:$true] %s288_s8 }
 0x23a   :  { %s311_s27 = sshll.u32 %s4119_s19, 4  ;;  %s312_s27 = int_to_ptr.vmem [resolvable:$true] %s311_s27 }
 0x23d   :  { %s3690_s9 = scalar_lea.hbm %s4980_s2, 1024 }
 0x23e   :  { %p3691_p4 = scmp.ne.s32.totalorder %s4980_s2, %s3690_s9  ;;  %p3694_p5 = scmp.lt.u32.totalorder %s3690_s9, %s4980_s2 }
 0x240   :  { %p3696_p6 = pnand %p3694_p5, %p3691_p4 }
 0x242   :  { %3699 = shalt.err (!%p3696_p6)
}
 0x243   :  { %s3700_s6 = scalar_lea.vmem %s289_s8, 1024  ;;  %p3705_p8 = scmp.lt.s32.totalorder %s289_s8, %s289_s8 }
 0x244   :  { %p3701_p7 = scmp.ne.s32.totalorder %s289_s8, %s3700_s6  ;;  %p3706_p9 = scmp.lt.s32.totalorder %s3700_s6, %s3700_s6 }
 0x246   :  { %p3707_p10 = por %p3706_p9, %p3705_p8 }
 0x248   :  { %p3708_p11 = pnand %p3707_p10, %p3701_p7 }
 0x24a   :  { %3711 = shalt.err (!%p3708_p11)
}
 0x24b   :  { %s4981_s0 = sld [smem:[#allocation94_spill]] }
 0x24c   :  { %294 = dma.hbm_to_vmem [thread:$0]  %s4980_s2, 1024, %s289_s8, [#allocation24], %s4090_s15, %s4090_s15, %s4091_s16  }
 0x251   :  { %s3712_s7 = scalar_lea.hbm %s4981_s0, 16 }
 0x252   :  { %p3713_p12 = scmp.ne.s32.totalorder %s4981_s0, %s3712_s7  ;;  %p3716_p13 = scmp.lt.u32.totalorder %s3712_s7, %s4981_s0 }
 0x254   :  { %p3718_p0 = pnand %p3716_p13, %p3713_p12 }
 0x256   :  { %3721 = shalt.err (!%p3718_p0)
}
 0x257   :  { %s3722_s17 = scalar_lea.vmem %s312_s27, 16  ;;  %s3726_s3 = scalar_lea.vmem %s312_s27, 32 }
 0x258   :  { %p3723_p1 = scmp.ne.s32.totalorder %s312_s27, %s3722_s17  ;;  %p3727_p2 = scmp.lt.s32.totalorder %s312_s27, %s312_s27 }
 0x259   :  { %p3728_p3 = scmp.lt.s32.totalorder %s3726_s3, %s3722_s17 }
 0x25b   :  { %p3729_p4 = por %p3728_p3, %p3727_p2 }
 0x25d   :  { %p3730_p5 = pnand %p3729_p4, %p3723_p1 }
 0x25f   :  { %3733 = shalt.err (!%p3730_p5)
}
 0x260   :  { %s4982_s10 = sld [smem:[#allocation95_spill]]  ;;  %s4120_s11 = smov [#allocation31]  }
 0x261   :  { %314 = dma.hbm_to_vmem [thread:$0]  %s4981_s0, 16, %s312_s27, [#allocation27]  }
 0x262   :  { %s332_s24 = sshll.u32 %s4120_s11, 4  ;;  %s4121_s21 = smov [#allocation34]   ;;  %s333_s24 = int_to_ptr.vmem [resolvable:$true] %s332_s24 }
 0x263   :  { %s355_s25 = sshll.u32 %s4121_s21, 4  ;;  %s356_s25 = int_to_ptr.vmem [resolvable:$true] %s355_s25 }
 0x266   :  { %s3734_s18 = scalar_lea.hbm %s4982_s10, 1024 }
 0x267   :  { %p3735_p6 = scmp.ne.s32.totalorder %s4982_s10, %s3734_s18  ;;  %p3738_p7 = scmp.lt.u32.totalorder %s3734_s18, %s4982_s10 }
 0x269   :  { %p3740_p8 = pnand %p3738_p7, %p3735_p6 }
 0x26b   :  { %3743 = shalt.err (!%p3740_p8)
}
 0x26c   :  { %s3744_s20 = scalar_lea.vmem %s333_s24, 1024  ;;  %p3749_p10 = scmp.lt.s32.totalorder %s333_s24, %s333_s24 }
 0x26d   :  { %p3745_p9 = scmp.ne.s32.totalorder %s333_s24, %s3744_s20  ;;  %p3750_p11 = scmp.lt.s32.totalorder %s3744_s20, %s3744_s20 }
 0x26f   :  { %p3751_p12 = por %p3750_p11, %p3749_p10 }
 0x271   :  { %p3752_p13 = pnand %p3751_p12, %p3745_p9 }
 0x273   :  { %3755 = shalt.err (!%p3752_p13)
}
 0x274   :  { %s4983_s12 = sld [smem:[#allocation96_spill]] }
 0x275   :  { %338 = dma.hbm_to_vmem [thread:$0]  %s4982_s10, 1024, %s333_s24, [#allocation30], %s4090_s15, %s4090_s15, %s4091_s16  }
 0x27a   :  { %s3756_s22 = scalar_lea.hbm %s4983_s12, 16 }
 0x27b   :  { %p3757_p0 = scmp.ne.s32.totalorder %s4983_s12, %s3756_s22  ;;  %p3760_p1 = scmp.lt.u32.totalorder %s3756_s22, %s4983_s12 }
 0x27d   :  { %p3762_p2 = pnand %p3760_p1, %p3757_p0 }
 0x27f   :  { %3765 = shalt.err (!%p3762_p2)
}
 0x280   :  { %s3766_s23 = scalar_lea.vmem %s356_s25, 16  ;;  %s3770_s26 = scalar_lea.vmem %s356_s25, 32 }
 0x281   :  { %p3767_p3 = scmp.ne.s32.totalorder %s356_s25, %s3766_s23  ;;  %p3771_p4 = scmp.lt.s32.totalorder %s356_s25, %s356_s25 }
 0x282   :  { %p3772_p5 = scmp.lt.s32.totalorder %s3770_s26, %s3766_s23 }
 0x284   :  { %p3773_p6 = por %p3772_p5, %p3771_p4 }
 0x286   :  { %p3774_p7 = pnand %p3773_p6, %p3767_p3 }
 0x288   :  { %3777 = shalt.err (!%p3774_p7)
}
 0x289   :  { %s4984_s1 = sld [smem:[#allocation97_spill]]  ;;  %s4122_s2 = smov [#allocation37]  }
 0x28a   :  { %358 = dma.hbm_to_vmem [thread:$0]  %s4983_s12, 16, %s356_s25, [#allocation33]  }
 0x28b   :  { %s376_s30 = sshll.u32 %s4122_s2, 4  ;;  %s4123_s8 = smov [#allocation40]   ;;  %s377_s30 = int_to_ptr.vmem [resolvable:$true] %s376_s30 }
 0x28c   :  { %s399_s19 = sshll.u32 %s4123_s8, 4  ;;  %s400_s19 = int_to_ptr.vmem [resolvable:$true] %s399_s19 }
 0x28f   :  { %s3778_s27 = scalar_lea.hbm %s4984_s1, 1024 }
 0x290   :  { %p3779_p8 = scmp.ne.s32.totalorder %s4984_s1, %s3778_s27  ;;  %p3782_p9 = scmp.lt.u32.totalorder %s3778_s27, %s4984_s1 }
 0x292   :  { %p3784_p10 = pnand %p3782_p9, %p3779_p8 }
 0x294   :  { %3787 = shalt.err (!%p3784_p10)
}
 0x295   :  { %s3788_s9 = scalar_lea.vmem %s377_s30, 1024  ;;  %p3793_p12 = scmp.lt.s32.totalorder %s377_s30, %s377_s30 }
 0x296   :  { %p3789_p11 = scmp.ne.s32.totalorder %s377_s30, %s3788_s9  ;;  %p3794_p13 = scmp.lt.s32.totalorder %s3788_s9, %s3788_s9 }
 0x298   :  { %p3795_p0 = por %p3794_p13, %p3793_p12 }
 0x29a   :  { %p3796_p1 = pnand %p3795_p0, %p3789_p11 }
 0x29c   :  { %3799 = shalt.err (!%p3796_p1)
}
 0x29d   :  { %s4985_s6 = sld [smem:[#allocation98_spill]] }
 0x29e   :  { %382 = dma.hbm_to_vmem [thread:$0]  %s4984_s1, 1024, %s377_s30, [#allocation36], %s4090_s15, %s4090_s15, %s4091_s16  }
 0x2a3   :  { %s3800_s0 = scalar_lea.hbm %s4985_s6, 16 }
 0x2a4   :  { %p3801_p2 = scmp.ne.s32.totalorder %s4985_s6, %s3800_s0  ;;  %p3804_p3 = scmp.lt.u32.totalorder %s3800_s0, %s4985_s6 }
 0x2a6   :  { %p3806_p4 = pnand %p3804_p3, %p3801_p2 }
 0x2a8   :  { %3809 = shalt.err (!%p3806_p4)
}
 0x2a9   :  { %s3810_s7 = scalar_lea.vmem %s400_s19, 16  ;;  %s3814_s17 = scalar_lea.vmem %s400_s19, 32 }
 0x2aa   :  { %p3811_p5 = scmp.ne.s32.totalorder %s400_s19, %s3810_s7  ;;  %p3815_p6 = scmp.lt.s32.totalorder %s400_s19, %s400_s19 }
 0x2ab   :  { %p3816_p7 = scmp.lt.s32.totalorder %s3814_s17, %s3810_s7 }
 0x2ad   :  { %p3817_p8 = por %p3816_p7, %p3815_p6 }
 0x2af   :  { %p3818_p9 = pnand %p3817_p8, %p3811_p5 }
 0x2b1   :  { %3821 = shalt.err (!%p3818_p9)
}
 0x2b2   :  { %s4986_s3 = sld [smem:[#allocation99_spill]]  ;;  %s4124_s10 = smov [#allocation43]  }
 0x2b3   :  { %402 = dma.hbm_to_vmem [thread:$0]  %s4985_s6, 16, %s400_s19, [#allocation39]  }
 0x2b4   :  { %s420_s11 = sshll.u32 %s4124_s10, 4  ;;  %s4125_s24 = smov [#allocation46]   ;;  %s421_s11 = int_to_ptr.vmem [resolvable:$true] %s420_s11 }
 0x2b5   :  { %s443_s21 = sshll.u32 %s4125_s24, 4  ;;  %s444_s21 = int_to_ptr.vmem [resolvable:$true] %s443_s21 }
 0x2b8   :  { %s3822_s25 = scalar_lea.hbm %s4986_s3, 1024 }
 0x2b9   :  { %p3823_p10 = scmp.ne.s32.totalorder %s4986_s3, %s3822_s25  ;;  %p3826_p11 = scmp.lt.u32.totalorder %s3822_s25, %s4986_s3 }
 0x2bb   :  { %p3828_p12 = pnand %p3826_p11, %p3823_p10 }
 0x2bd   :  { %3831 = shalt.err (!%p3828_p12)
}
 0x2be   :  { %s3832_s18 = scalar_lea.vmem %s421_s11, 1024  ;;  %p3837_p0 = scmp.lt.s32.totalorder %s421_s11, %s421_s11 }
 0x2bf   :  { %p3833_p13 = scmp.ne.s32.totalorder %s421_s11, %s3832_s18  ;;  %p3838_p1 = scmp.lt.s32.totalorder %s3832_s18, %s3832_s18 }
 0x2c1   :  { %p3839_p2 = por %p3838_p1, %p3837_p0 }
 0x2c3   :  { %p3840_p3 = pnand %p3839_p2, %p3833_p13 }
 0x2c5   :  { %3843 = shalt.err (!%p3840_p3)
}
 0x2c6   :  { %s4987_s20 = sld [smem:[#allocation100_spill]] }
 0x2c7   :  { %426 = dma.hbm_to_vmem [thread:$0]  %s4986_s3, 1024, %s421_s11, [#allocation42], %s4090_s15, %s4090_s15, %s4091_s16  }
 0x2cc   :  { %s3844_s12 = scalar_lea.hbm %s4987_s20, 16 }
 0x2cd   :  { %p3845_p4 = scmp.ne.s32.totalorder %s4987_s20, %s3844_s12  ;;  %p3848_p5 = scmp.lt.u32.totalorder %s3844_s12, %s4987_s20 }
 0x2cf   :  { %p3850_p6 = pnand %p3848_p5, %p3845_p4 }
 0x2d1   :  { %3853 = shalt.err (!%p3850_p6)
}
 0x2d2   :  { %s3854_s22 = scalar_lea.vmem %s444_s21, 16  ;;  %s3858_s23 = scalar_lea.vmem %s444_s21, 32 }
 0x2d3   :  { %p3855_p7 = scmp.ne.s32.totalorder %s444_s21, %s3854_s22  ;;  %p3859_p8 = scmp.lt.s32.totalorder %s444_s21, %s444_s21 }
 0x2d4   :  { %p3860_p9 = scmp.lt.s32.totalorder %s3858_s23, %s3854_s22 }
 0x2d6   :  { %p3861_p10 = por %p3860_p9, %p3859_p8 }
 0x2d8   :  { %p3862_p11 = pnand %p3861_p10, %p3855_p7 }
 0x2da   :  { %3865 = shalt.err (!%p3862_p11)
}
 0x2db   :  { %s4988_s26 = sld [smem:[#allocation103_spill]]  ;;  %s4126_s15 = smov [#allocation49]  }
 0x2dc   :  { %446 = dma.hbm_to_vmem [thread:$0]  %s4987_s20, 16, %s444_s21, [#allocation45]  }
 0x2dd   :  { %s467_s16 = sshll.u32 %s4126_s15, 4  ;;  %s4127_s1 = smov [#allocation52]   ;;  %s468_s16 = int_to_ptr.vmem [resolvable:$true] %s467_s16 }
 0x2de   :  { %s493_s2 = sshll.u32 %s4127_s1, 4  ;;  %s494_s2 = int_to_ptr.vmem [resolvable:$true] %s493_s2 }
 0x2e1   :  { %s3866_s30 = scalar_lea.hbm %s4988_s26, 16 }
 0x2e2   :  { %p3867_p12 = scmp.ne.s32.totalorder %s4988_s26, %s3866_s30  ;;  %p3870_p13 = scmp.lt.u32.totalorder %s3866_s30, %s4988_s26 }
 0x2e4   :  { %p3872_p0 = pnand %p3870_p13, %p3867_p12 }
 0x2e6   :  { %3875 = shalt.err (!%p3872_p0)
}
 0x2e7   :  { %s3876_s8 = scalar_lea.vmem %s468_s16, 16  ;;  %s3880_s19 = scalar_lea.vmem %s468_s16, 32 }
 0x2e8   :  { %p3877_p1 = scmp.ne.s32.totalorder %s468_s16, %s3876_s8  ;;  %p3881_p2 = scmp.lt.s32.totalorder %s468_s16, %s468_s16 }
 0x2e9   :  { %p3882_p3 = scmp.lt.s32.totalorder %s3880_s19, %s3876_s8 }
 0x2eb   :  { %p3883_p4 = por %p3882_p3, %p3881_p2 }
 0x2ed   :  { %p3884_p5 = pnand %p3883_p4, %p3877_p1 }
 0x2ef   :  { %3887 = shalt.err (!%p3884_p5)
}
 0x2f0   :  { %s4989_s27 = sld [smem:[#allocation108_spill]] }
 0x2f1   :  { %470 = dma.hbm_to_vmem [thread:$0]  %s4988_s26, 16, %s468_s16, [#allocation48]  }
 0x2f6   :  { %s3888_s9 = scalar_lea.hbm %s4989_s27, 16 }
 0x2f7   :  { %p3889_p6 = scmp.ne.s32.totalorder %s4989_s27, %s3888_s9  ;;  %p3892_p7 = scmp.lt.u32.totalorder %s3888_s9, %s4989_s27 }
 0x2f9   :  { %p3894_p8 = pnand %p3892_p7, %p3889_p6 }
 0x2fb   :  { %3897 = shalt.err (!%p3894_p8)
}
 0x2fc   :  { %s3898_s6 = scalar_lea.vmem %s494_s2, 16  ;;  %s3902_s0 = scalar_lea.vmem %s494_s2, 32 }
 0x2fd   :  { %p3899_p9 = scmp.ne.s32.totalorder %s494_s2, %s3898_s6  ;;  %p3903_p10 = scmp.lt.s32.totalorder %s494_s2, %s494_s2 }
 0x2fe   :  { %p3904_p11 = scmp.lt.s32.totalorder %s3902_s0, %s3898_s6 }
 0x300   :  { %p3905_p12 = por %p3904_p11, %p3903_p10 }
 0x302   :  { %p3906_p13 = pnand %p3905_p12, %p3899_p9 }
 0x304   :  { %3909 = shalt.err (!%p3906_p13)
}
 0x305   :  { %s4990_s7 = sld [smem:[#allocation112_spill]]  ;;  %s4128_s17 = smov [#allocation55]  }
 0x306   :  { %496 = dma.hbm_to_vmem [thread:$0]  %s4989_s27, 16, %s494_s2, [#allocation51]  }
 0x307   :  { %s517_s3 = sshll.u32 %s4128_s17, 4  ;;  %s4129_s10 = smov [#allocation58]   ;;  %s518_s3 = int_to_ptr.vmem [resolvable:$true] %s517_s3 }
 0x308   :  { %s541_s11 = sshll.u32 %s4129_s10, 4  ;;  %s542_s11 = int_to_ptr.vmem [resolvable:$true] %s541_s11 }
 0x30b   :  { %s3910_s24 = scalar_lea.hbm %s4990_s7, 16 }
 0x30c   :  { %p3911_p0 = scmp.ne.s32.totalorder %s4990_s7, %s3910_s24  ;;  %p3914_p1 = scmp.lt.u32.totalorder %s3910_s24, %s4990_s7 }
 0x30e   :  { %p3916_p2 = pnand %p3914_p1, %p3911_p0 }
 0x310   :  { %3919 = shalt.err (!%p3916_p2)
}
 0x311   :  { %s3920_s21 = scalar_lea.vmem %s518_s3, 16  ;;  %s3924_s25 = scalar_lea.vmem %s518_s3, 32 }
 0x312   :  { %p3921_p3 = scmp.ne.s32.totalorder %s518_s3, %s3920_s21  ;;  %p3925_p4 = scmp.lt.s32.totalorder %s518_s3, %s518_s3 }
 0x313   :  { %p3926_p5 = scmp.lt.s32.totalorder %s3924_s25, %s3920_s21 }
 0x315   :  { %p3927_p6 = por %p3926_p5, %p3925_p4 }
 0x317   :  { %p3928_p7 = pnand %p3927_p6, %p3921_p3 }
 0x319   :  { %3931 = shalt.err (!%p3928_p7)
}
 0x31a   :  { %520 = dma.hbm_to_vmem [thread:$0]  %s4990_s7, 16, %s518_s3, [#allocation54]  }
 0x31b   :  { %s3932_s18 = scalar_lea.hbm %s4372_s5, 16 }
 0x31c   :  { %p3933_p8 = scmp.ne.s32.totalorder %s4372_s5, %s3932_s18  ;;  %p3936_p9 = scmp.lt.u32.totalorder %s3932_s18, %s4372_s5 }
 0x31e   :  { %p3938_p10 = pnand %p3936_p9, %p3933_p8 }
 0x320   :  { %3941 = shalt.err (!%p3938_p10)
}
 0x321   :  { %s3942_s20 = scalar_lea.vmem %s542_s11, 16  ;;  %s3946_s12 = scalar_lea.vmem %s542_s11, 32 }
 0x322   :  { %p3943_p11 = scmp.ne.s32.totalorder %s542_s11, %s3942_s20  ;;  %p3947_p12 = scmp.lt.s32.totalorder %s542_s11, %s542_s11 }
 0x323   :  { %p3948_p13 = scmp.lt.s32.totalorder %s3946_s12, %s3942_s20 }
 0x325   :  { %p3949_p0 = por %p3948_p13, %p3947_p12 }
 0x327   :  { %p3950_p1 = pnand %p3949_p0, %p3943_p11 }
 0x329   :  { %3953 = shalt.err (!%p3950_p1)
}
 0x32a   :  { %544 = dma.hbm_to_vmem [thread:$0]  %s4372_s5, 16, %s542_s11, [#allocation57]  }
 0x32b   :  { %s4130_s22 = smov [#allocation59]   ;;  %s3954_s26 = scalar_lea.hbm %s4377_s14, 16 }
 0x32c   :  { %s551_s23 = sshll.u32 %s4130_s22, 4  ;;  %p3955_p2 = scmp.ne.s32.totalorder %s4377_s14, %s3954_s26  ;;  %s552_s23 = int_to_ptr.vmem [resolvable:$true] %s551_s23 }
 0x32d   :  { %p3958_p3 = scmp.lt.u32.totalorder %s3954_s26, %s4377_s14 }
 0x32f   :  { %p3960_p4 = pnand %p3958_p3, %p3955_p2 }
 0x331   :  { %3963 = shalt.err (!%p3960_p4)
}
 0x332   :  { %s3964_s15 = scalar_lea.vmem %s552_s23, 16  ;;  %s3968_s16 = scalar_lea.vmem %s552_s23, 32 }
 0x333   :  { %p3965_p5 = scmp.ne.s32.totalorder %s552_s23, %s3964_s15  ;;  %p3969_p6 = scmp.lt.s32.totalorder %s552_s23, %s552_s23 }
 0x334   :  { %p3970_p7 = scmp.lt.s32.totalorder %s3968_s16, %s3964_s15 }
 0x336   :  { %p3971_p8 = por %p3970_p7, %p3969_p6 }
 0x338   :  { %p3972_p9 = pnand %p3971_p8, %p3965_p5 }
 0x33a   :  { %3975 = shalt.err (!%p3972_p9)
}
 0x33b   :  { %554 = dma.hbm_to_vmem [thread:$0]  %s4377_s14, 16, %s552_s23, [#allocation60]  }
 0x33c   :  { %3998 = dma.done.wait [#allocation3], 256  }
 0x33d   :  { %3999 = vsyncadd [#allocation3], 4294967040 }
 0x33e   :  { %4000 = dma.done.wait [#allocation6], 336  }
 0x33f   :  { %4001 = vsyncadd [#allocation6], 4294966960 }
 0x340   :  { %4002 = dma.done.wait [#allocation9], 272  }
 0x341   :  { %4003 = vsyncadd [#allocation9], 4294967024 }
 0x342   :  { %4004 = dma.done.wait [#allocation12], 32  }
 0x343   :  { %4005 = vsyncadd [#allocation12], 4294967264 }
 0x344   :  { %4006 = dma.done.wait [#allocation15], 272  }
 0x345   :  { %4007 = vsyncadd [#allocation15], 4294967024 }
 0x346   :  { %4008 = dma.done.wait [#allocation18], 272  }
 0x347   :  { %4009 = vsyncadd [#allocation18], 4294967024 }
 0x348   :  { %4010 = dma.done.wait [#allocation21], 32  }
 0x349   :  { %4011 = vsyncadd [#allocation21], 4294967264 }
 0x34a   :  { %4012 = dma.done.wait [#allocation24], 1280  }
 0x34b   :  { %4013 = vsyncadd [#allocation24], 4294966016 }
 0x34c   :  { %4014 = dma.done.wait [#allocation27], 32  }
 0x34d   :  { %4015 = vsyncadd [#allocation27], 4294967264 }
 0x34e   :  { %4016 = dma.done.wait [#allocation30], 1280  }
 0x34f   :  { %4017 = vsyncadd [#allocation30], 4294966016 }
 0x350   :  { %4018 = dma.done.wait [#allocation33], 32  }
 0x351   :  { %4019 = vsyncadd [#allocation33], 4294967264 }
 0x352   :  { %4020 = dma.done.wait [#allocation36], 1280  }
 0x353   :  { %4021 = vsyncadd [#allocation36], 4294966016 }
 0x354   :  { %4022 = dma.done.wait [#allocation39], 32  }
 0x355   :  { %4023 = vsyncadd [#allocation39], 4294967264 }
 0x356   :  { %4024 = dma.done.wait [#allocation42], 1280  }
 0x357   :  { %4025 = vsyncadd [#allocation42], 4294966016 }
 0x358   :  { %4026 = dma.done.wait [#allocation45], 32  }
 0x359   :  { %4027 = vsyncadd [#allocation45], 4294967264 }
 0x35a   :  { %4028 = dma.done.wait [#allocation48], 272  }
 0x35b   :  { %4029 = vsyncadd [#allocation48], 4294967024 }
 0x35c   :  { %4030 = dma.done.wait [#allocation51], 32  }
 0x35d   :  { %4031 = vsyncadd [#allocation51], 4294967264 }
 0x35e   :  { %4032 = dma.done.wait [#allocation54], 32  }
 0x35f   :  { %4033 = vsyncadd [#allocation54], 4294967264 }
 0x360   :  { %4034 = dma.done.wait [#allocation57], 272  }
 0x361   :  { %4035 = vsyncadd [#allocation57], 4294967024 }
 0x362   :  { %4036 = dma.done.wait [#allocation60], 16  }
 0x363   :  { %4037 = vsyncadd [#allocation60], 4294967280  ;;  %v4131_v0 = vmov 0.0   ;;  %vm4132_vm0 = vmmov 0   ;;  %v3035_v1 = vld [vmem:[#allocation5] sm:$0xff]   ;;  %vm699_vm1 = vcmask 1043456   ;;  %v773_v42 = vlaneseq }
 0x364   :  { %2731 = vmatprep.subr.bf16.mxu0 %v4131_v0  ;;  %2737 = vmatprep.mubr.msk.bf16.mxu0 %vm4132_vm0, %v4131_v0  ;;  %s4991_s5 = sld [smem:[#allocation86_spill]]  ;;  %v3036_v2 = vld [vmem:[#allocation5 + $0x8] sm:$0xff]   ;;  %v3037_v3 = vld [vmem:[#allocation5 + $0x10] ss:$0 sps:$4 sm:$0xff]   ;;  %vm695_vm2 = vcmask 326656   ;;  %v673_v6 = vld [vmem:[#allocation2 + $0x8] sm:$0xff] }
 0x365   :  { %2741 = vmatprep.subr.bf16.mxu1 %v4131_v0  ;;  %2757 = vmatprep.mubr.msk.bf16.mxu1 %vm4132_vm0, %v4131_v0  ;;  %v701_v4 = vsel %vm699_vm1, %v3037_v3, 0  ;;  %v672_v5 = vld [vmem:[#allocation2] sm:$0xff]  ;;  %v774_v43 = vshrl.u32 %v773_v42, 7  ;;  %s4992_s14 = sld [smem:[#allocation88_spill]]  ;;  %v788_v55 = vld [vmem:[#allocation10] sm:$0xff]  ;;  %v789_v56 = vld [vmem:[#allocation10 + $0x8] sm:$0xff] }
 0x366   :  { %2732 = vmatpush3.bf16.msra.mxu0 %v3035_v1  ;;  %v674_v7 = vpack.c.bf16 %v673_v6, %v672_v5  ;;  %v765_v44 = vld [vmem:[#allocation7] sm:$0x1]  ;;  %v769_v48 = vld [vmem:[#allocation8] sm:$0x1]  ;;  %s4993_s1 = sld [smem:[#allocation91_spill]]  ;;  %s4994_s2 = sld [smem:[#allocation102_spill]] }
 0x367   :  { %2733 = vmatprep.subr.bf16.mxu0 %v4131_v0  ;;  %v4613_v45 = vsub.s32 0, %v774_v43  ;;  %s4995_s30 = sld [smem:[#allocation106_spill]]  ;;  %s4996_s8 = sld [smem:[#allocation104_spill]]  ;;  %vm2164_vm3 = vcmask 523264   ;;  %vm2296_vm4 = vcmask 261120   ;;  %vm2412_vm5 = vcmask 580608  }
 0x368   :  { %s4997_s19 = sld [smem:[#allocation105_spill]]  ;;  %s4998_s27 = sld [smem:[#allocation110_spill]] }
 0x369   :  { %s4999_s9 = sld [smem:[#allocation109_spill]]  ;;  %s5000_s6 = sld [smem:[#allocation113_spill]] }
 0x36a   :  { %2734 = vmatpush3.bf16.msra.mxu0 %v3036_v2  ;;  %v3038_v8 = vld [vmem:[%s4991_s5] sm:$0xff]   ;;  %v3039_v9 = vld [vmem:[%s4991_s5 + $0x8] sm:$0xff]   ;;  %v3040_v10 = vld [vmem:[%s4991_s5 + $0x10] sm:$0xff]   ;;  %s4133_s0 = smov [#allocation61]  }
 0x36b   :  { %2735 = vmatprep.subr.bf16.mxu0 %v4131_v0  ;;  %2742 = vmatpush3.bf16.msra.mxu1 %v3038_v8  ;;  %v3041_v11 = vld [vmem:[%s4991_s5 + $0x18] sm:$0xff]   ;;  %v3042_v12 = vld [vmem:[%s4991_s5 + $0x20] sm:$0xff]   ;;  %v3043_v13 = vld [vmem:[%s4991_s5 + $0x28] sm:$0xff]   ;;  %s2474_s7 = sshll.u32 %s4133_s0, 4  ;;  %s2475_s7 = int_to_ptr.vmem [resolvable:$true] %s2474_s7 }
 0x36c   :  { %2743 = vmatprep.subr.bf16.mxu1 %v4131_v0  ;;  %v3044_v14 = vld [vmem:[%s4991_s5 + $0x30] sm:$0xff]   ;;  %v3045_v15 = vld [vmem:[%s4991_s5 + $0x38] sm:$0xff]   ;;  %v3046_v1 = vld [vmem:[%s4992_s14] sm:$0xff]   ;;  %s3976_s17 = scalar_lea.vmem %s2475_s7, 256  ;;  %p3981_p11 = scmp.lt.s32.totalorder %s2475_s7, %s2475_s7 }
 0x36d   :  { %v3047_v2 = vld [vmem:[%s4992_s14 + $0x8] sm:$0xff]   ;;  %v3048_v3 = vld [vmem:[%s4992_s14 + $0x10] sm:$0xff]   ;;  %v3050_v5 = vld [vmem:[%s4992_s14 + $0x20] sm:$0xff]   ;;  %p3977_p10 = scmp.ne.s32.totalorder %s2475_s7, %s3976_s17  ;;  %p3982_p12 = scmp.lt.s32.totalorder %s3976_s17, %s3976_s17 }
 0x36e   :  { %2736 = vmatpush3.bf16.msra.mxu0 %v701_v4  ;;  %v3049_v4 = vld [vmem:[%s4992_s14 + $0x18] sm:$0xff]   ;;  %v3051_v6 = vld [vmem:[%s4992_s14 + $0x28] sm:$0xff]  }
 0x36f   :  { %2761 = vmatprep.subr.bf16.mxu0 %v4131_v0  ;;  %2744 = vmatpush3.bf16.msra.mxu1 %v3039_v9  ;;  %v3053_v8 = vld [vmem:[%s4992_s14 + $0x38] sm:$0xff]   ;;  %p3983_p13 = por %p3982_p12, %p3981_p11 }
 0x370   :  { %2745 = vmatprep.subr.bf16.mxu1 %v4131_v0 }
 0x371   :  { %2738 = vmatmul.mubr.msk.bf16.vlgmr.msra.gmra.mrb[0].mxu0 %vm695_vm2, %v674_v7  ;;  %v3052_v7 = vld [vmem:[%s4992_s14 + $0x30] sm:$0xff]   ;;  %p3984_p0 = pnand %p3983_p13, %p3977_p10 }
 0x372   :  { %2777 = vmatprep.mubr.msk.bf16.mxu0 %vm4132_vm0, %v4131_v0  ;;  %2762 = vmatpush3.bf16.msra.mxu0 %v3046_v1  ;;  %v3061_v1 = vld [vmem:[%s4993_s1 + $0x38] sm:$0xff]  }
 0x373   :  { %2746 = vmatpush3.bf16.msra.mxu1 %v3040_v10  ;;  %2763 = vmatprep.subr.bf16.mxu0 %v4131_v0 }
 0x374   :  { %2747 = vmatprep.subr.bf16.mxu1 %v4131_v0 }
 0x376   :  { %2764 = vmatpush3.bf16.msra.mxu0 %v3047_v2 }
 0x377   :  { %2748 = vmatpush3.bf16.msra.mxu1 %v3041_v11  ;;  %2765 = vmatprep.subr.bf16.mxu0 %v4131_v0 }
 0x378   :  { %2749 = vmatprep.subr.bf16.mxu1 %v4131_v0 }
 0x37a   :  { %2766 = vmatpush3.bf16.msra.mxu0 %v3048_v3 }
 0x37b   :  { %2750 = vmatpush3.bf16.msra.mxu1 %v3042_v12  ;;  %2767 = vmatprep.subr.bf16.mxu0 %v4131_v0 }
 0x37c   :  { %2751 = vmatprep.subr.bf16.mxu1 %v4131_v0 }
 0x37e   :  { %2768 = vmatpush3.bf16.msra.mxu0 %v3049_v4 }
 0x37f   :  { %2752 = vmatpush3.bf16.msra.mxu1 %v3043_v13  ;;  %2769 = vmatprep.subr.bf16.mxu0 %v4131_v0 }
 0x380   :  { %2753 = vmatprep.subr.bf16.mxu1 %v4131_v0 }
 0x382   :  { %2770 = vmatpush3.bf16.msra.mxu0 %v3050_v5 }
 0x383   :  { %2754 = vmatpush3.bf16.msra.mxu1 %v3044_v14  ;;  %2771 = vmatprep.subr.bf16.mxu0 %v4131_v0 }
 0x384   :  { %2755 = vmatprep.subr.bf16.mxu1 %v4131_v0 }
 0x386   :  { %2772 = vmatpush3.bf16.msra.mxu0 %v3051_v6 }
 0x387   :  { %2756 = vmatpush3.bf16.msra.mxu1 %v3045_v15  ;;  %2773 = vmatprep.subr.bf16.mxu0 %v4131_v0 }
 0x388   :  { %2781 = vmatprep.subr.bf16.mxu1 %v4131_v0 }
 0x38a   :  { %2774 = vmatpush3.bf16.msra.mxu0 %v3052_v7 }
 0x38b   :  { %2775 = vmatprep.subr.bf16.mxu0 %v4131_v0 }
 0x38e   :  { %2776 = vmatpush3.bf16.msra.mxu0 %v3053_v8 }
 0x38f   :  { %2801 = vmatprep.subr.bf16.mxu0 %v4131_v0 }
 0x444   :  { %v737_v16 = vpop.f32.mrb[0].mxu0 }
 0x445   :  { %v2739_v17 = vpop.f32.mrb[1].mxu0  ;;  %v752_v19 = vmul.f32 %v737_v16, %v737_v16 }
 0x446   :  { %v740_v18 = vpop.f32.mrb[2].mxu0 }
 0x447   :  { %v744_v20 = vadd.f32 %v740_v18, %v737_v16  ;;  %v753_v21 = vmul.f32 %v740_v18, %v740_v18  ;;  %v2740_v22 = vpop.f32.mrb[3].mxu0 }
 0x449   :  { %v745_v23 = vrot.slane %v744_v20, 4  ;;  %v754_v24 = vadd.f32 %v753_v21, %v752_v19 }
 0x44b   :  { %v746_v25 = vadd.f32 %v745_v23, %v744_v20  ;;  %v755_v26 = vrot.slane %v754_v24, 4 }
 0x44d   :  { %v747_v27 = vrot.slane %v746_v25, 2  ;;  %v756_v28 = vadd.f32 %v755_v26, %v754_v24 }
 0x44f   :  { %v748_v29 = vadd.f32 %v747_v27, %v746_v25  ;;  %v757_v30 = vrot.slane %v756_v28, 2 }
 0x451   :  { %v749_v31 = vrot.slane %v748_v29, 1  ;;  %v758_v32 = vadd.f32 %v757_v30, %v756_v28 }
 0x453   :  { %v750_v33 = vadd.f32 %v749_v31, %v748_v29  ;;  %v759_v34 = vrot.slane %v758_v32, 1 }
 0x455   :  { %v751_v35 = vmul.f32 0.0625, %v750_v33  ;;  %v760_v36 = vadd.f32 %v759_v34, %v758_v32 }
 0x457   :  { %v761_v37 = vmul.f32 0.0625, %v760_v36  ;;  %v762_v38 = vmul.f32 %v751_v35, %v751_v35 }
 0x459   :  { %v763_v39 = vsub.f32 %v761_v37, %v762_v38  ;;  %v925_v38 = vld [vmem:[#allocation13] sm:$0x1] }
 0x45b   :  { %v764_v40 = vmax.f32 %v763_v39, 0.0 }
 0x45d   :  { %v766_v41 = vadd.f32 1e-05, %v764_v40 }
 0x45f   :  { %3116 = vrsqrt.f32 %v766_v41 }
 0x469   :  { %v3117_v46 = vpop.eup %3116 }
 0x46a   :  { %v768_v47 = vmul.f32 %v3117_v46, %v765_v44  ;;  %v944_v46 = vld [vmem:[#allocation14] sm:$0xff] }
 0x46c   :  { %v770_v49 = vmul.f32 %v768_v47, %v751_v35  ;;  %v776_v50 = vrot.slane %v768_v47, %v4613_v45  ;;  %v921_v35 = vld [vmem:[#allocation11] sm:$0x1]  ;;  %v945_v47 = vld [vmem:[#allocation14 + $0x8] sm:$0xff] }
 0x46e   :  { %v771_v51 = vsub.f32 %v769_v48, %v770_v49  ;;  %v778_v52 = vmul.f32 %v776_v50, %v737_v16  ;;  %v779_v53 = vmul.f32 %v776_v50, %v740_v18 }
 0x470   :  { %v784_v54 = vrot.slane %v771_v51, %v4613_v45 }
 0x472   :  { %v787_v57 = vadd.f32 %v784_v54, %v779_v53  ;;  %v786_v58 = vadd.f32 %v784_v54, %v778_v52 }
 0x474   :  { %v4617_v59 = vmul.f32 %v788_v55, %v786_v58  ;;  %v4619_v60 = vmul.f32 %v789_v56, %v787_v57  ;;  %v3054_v57 = vld [vmem:[%s4993_s1] sm:$0xff]   ;;  %v3055_v58 = vld [vmem:[%s4993_s1 + $0x8] sm:$0xff]  }
 0x476   :  { %v792_v61 = vmax.f32 %v4617_v59, 0.0  ;;  %v793_v62 = vmax.f32 %v4619_v60, 0.0  ;;  %v3056_v59 = vld [vmem:[%s4993_s1 + $0x10] sm:$0xff]   ;;  %v3057_v60 = vld [vmem:[%s4993_s1 + $0x18] sm:$0xff]  }
 0x478   :  { %v794_v63 = vpack.c.bf16 %v793_v62, %v792_v61 }
 0x47a   :  { %2758 = vmatmul.mubr.bf16.vlgmr.msra.gmra.mrb[0].mxu1 %v794_v63  ;;  %v3060_v63 = vld [vmem:[%s4993_s1 + $0x30] sm:$0xff]  }
 0x47b   :  { %2797 = vmatprep.mubr.msk.bf16.mxu1 %vm4132_vm0, %v4131_v0  ;;  %2782 = vmatpush3.bf16.msra.mxu1 %v3054_v57  ;;  %v3069_v57 = vld [vmem:[#allocation25 + $0x38] sm:$0xff]  }
 0x47c   :  { %2783 = vmatprep.subr.bf16.mxu1 %v4131_v0 }
 0x47f   :  { %2784 = vmatpush3.bf16.msra.mxu1 %v3055_v58 }
 0x480   :  { %2785 = vmatprep.subr.bf16.mxu1 %v4131_v0 }
 0x483   :  { %2786 = vmatpush3.bf16.msra.mxu1 %v3056_v59 }
 0x484   :  { %2787 = vmatprep.subr.bf16.mxu1 %v4131_v0 }
 0x487   :  { %2788 = vmatpush3.bf16.msra.mxu1 %v3057_v60 }
 0x488   :  { %2789 = vmatprep.subr.bf16.mxu1 %v4131_v0 }
 0x54d   :  { %v893_v9 = vpop.f32.mrb[0].mxu1 }
 0x54e   :  { %v2759_v10 = vpop.f32.mrb[1].mxu1  ;;  %v908_v12 = vmul.f32 %v893_v9, %v893_v9 }
 0x54f   :  { %v896_v11 = vpop.f32.mrb[2].mxu1 }
 0x550   :  { %v900_v13 = vadd.f32 %v896_v11, %v893_v9  ;;  %v909_v14 = vmul.f32 %v896_v11, %v896_v11  ;;  %v2760_v15 = vpop.f32.mrb[3].mxu1 }
 0x552   :  { %v901_v16 = vrot.slane %v900_v13, 4  ;;  %v910_v17 = vadd.f32 %v909_v14, %v908_v12 }
 0x554   :  { %v902_v18 = vadd.f32 %v901_v16, %v900_v13  ;;  %v911_v19 = vrot.slane %v910_v17, 4 }
 0x556   :  { %v903_v20 = vrot.slane %v902_v18, 2  ;;  %v912_v21 = vadd.f32 %v911_v19, %v910_v17 }
 0x558   :  { %v904_v22 = vadd.f32 %v903_v20, %v902_v18  ;;  %v913_v23 = vrot.slane %v912_v21, 2 }
 0x55a   :  { %v905_v24 = vrot.slane %v904_v22, 1  ;;  %v914_v25 = vadd.f32 %v913_v23, %v912_v21 }
 0x55c   :  { %v906_v26 = vadd.f32 %v905_v24, %v904_v22  ;;  %v915_v27 = vrot.slane %v914_v25, 1 }
 0x55e   :  { %v907_v28 = vmul.f32 0.0625, %v906_v26  ;;  %v916_v29 = vadd.f32 %v915_v27, %v914_v25 }
 0x560   :  { %v917_v30 = vmul.f32 0.0625, %v916_v29  ;;  %v918_v31 = vmul.f32 %v907_v28, %v907_v28 }
 0x562   :  { %v919_v32 = vsub.f32 %v917_v30, %v918_v31  ;;  %v1083_v31 = vld [vmem:[#allocation17] sm:$0x1] }
 0x564   :  { %v920_v33 = vmax.f32 %v919_v32, 0.0 }
 0x566   :  { %v922_v34 = vadd.f32 1e-05, %v920_v33 }
 0x568   :  { %3118 = vrsqrt.f32 %v922_v34 }
 0x572   :  { %v3119_v36 = vpop.eup %3118 }
 0x573   :  { %v924_v37 = vmul.f32 %v3119_v36, %v921_v35 }
 0x575   :  { %v926_v39 = vmul.f32 %v924_v37, %v907_v28  ;;  %v932_v40 = vrot.slane %v924_v37, %v4613_v45  ;;  %v1079_v28 = vld [vmem:[#allocation16] sm:$0x1] }
 0x577   :  { %v927_v41 = vsub.f32 %v925_v38, %v926_v39  ;;  %v934_v42 = vmul.f32 %v932_v40, %v893_v9  ;;  %v935_v43 = vmul.f32 %v932_v40, %v896_v11  ;;  %v1102_v38 = vld [vmem:[#allocation19] sm:$0xff]  ;;  %v1103_v39 = vld [vmem:[#allocation19 + $0x8] sm:$0xff] }
 0x579   :  { %v940_v44 = vrot.slane %v927_v41, %v4613_v45 }
 0x57b   :  { %v942_v48 = vadd.f32 %v940_v44, %v934_v42  ;;  %v943_v49 = vadd.f32 %v940_v44, %v935_v43 }
 0x57d   :  { %v4647_v50 = vmul.f32 %v944_v46, %v942_v48  ;;  %v4649_v51 = vmul.f32 %v945_v47, %v943_v49 }
 0x57f   :  { %v949_v52 = vmax.f32 %v4649_v51, 0.0  ;;  %v948_v53 = vmax.f32 %v4647_v50, 0.0  ;;  %v3064_v50 = vld [vmem:[#allocation25 + $0x10] sm:$0xff]   ;;  %v3065_v51 = vld [vmem:[#allocation25 + $0x18] sm:$0xff]  }
 0x581   :  { %v950_v54 = vadd.f32 %v948_v53, %v792_v61  ;;  %v951_v55 = vadd.f32 %v949_v52, %v793_v62  ;;  %v3058_v61 = vld [vmem:[%s4993_s1 + $0x20] sm:$0xff]   ;;  %v3059_v62 = vld [vmem:[%s4993_s1 + $0x28] sm:$0xff]  }
 0x582   :  { %2790 = vmatpush3.bf16.msra.mxu1 %v3058_v61 }
 0x583   :  { %v952_v56 = vpack.c.bf16 %v951_v55, %v950_v54  ;;  %2791 = vmatprep.subr.bf16.mxu1 %v4131_v0  ;;  %v3062_v54 = vld [vmem:[#allocation25] sm:$0xff]   ;;  %v3063_v55 = vld [vmem:[#allocation25 + $0x8] sm:$0xff]  }
 0x585   :  { %2778 = vmatmul.mubr.bf16.vlgmr.msra.gmra.mrb[4].mxu0 %v952_v56  ;;  %v3068_v56 = vld [vmem:[#allocation25 + $0x30] sm:$0xff]  }
 0x586   :  { %2817 = vmatprep.mubr.msk.bf16.mxu0 %vm4132_vm0, %v4131_v0  ;;  %2792 = vmatpush3.bf16.msra.mxu1 %v3059_v62 }
 0x587   :  { %2793 = vmatprep.subr.bf16.mxu1 %v4131_v0  ;;  %2802 = vmatpush3.bf16.msra.mxu0 %v3062_v54  ;;  %v3077_v54 = vld [vmem:[#allocation31 + $0x38] sm:$0xff]  }
 0x588   :  { %2803 = vmatprep.subr.bf16.mxu0 %v4131_v0 }
 0x58a   :  { %2794 = vmatpush3.bf16.msra.mxu1 %v3060_v63 }
 0x58b   :  { %2795 = vmatprep.subr.bf16.mxu1 %v4131_v0  ;;  %2804 = vmatpush3.bf16.msra.mxu0 %v3063_v55 }
 0x58c   :  { %2805 = vmatprep.subr.bf16.mxu0 %v4131_v0 }
 0x58e   :  { %2796 = vmatpush3.bf16.msra.mxu1 %v3061_v1 }
 0x58f   :  { %2821 = vmatprep.subr.bf16.mxu1 %v4131_v0  ;;  %2806 = vmatpush3.bf16.msra.mxu0 %v3064_v50 }
 0x590   :  { %2807 = vmatprep.subr.bf16.mxu0 %v4131_v0 }
 0x593   :  { %2808 = vmatpush3.bf16.msra.mxu0 %v3065_v51 }
 0x594   :  { %2809 = vmatprep.subr.bf16.mxu0 %v4131_v0 }
 0x658   :  { %v1051_v2 = vpop.f32.mrb[4].mxu0 }
 0x659   :  { %v2779_v3 = vpop.f32.mrb[5].mxu0  ;;  %v1066_v5 = vmul.f32 %v1051_v2, %v1051_v2 }
 0x65a   :  { %v1054_v4 = vpop.f32.mrb[6].mxu0 }
 0x65b   :  { %v1058_v6 = vadd.f32 %v1054_v4, %v1051_v2  ;;  %v1067_v7 = vmul.f32 %v1054_v4, %v1054_v4  ;;  %v2780_v8 = vpop.f32.mrb[7].mxu0 }
 0x65d   :  { %v1059_v9 = vrot.slane %v1058_v6, 4  ;;  %v1068_v10 = vadd.f32 %v1067_v7, %v1066_v5 }
 0x65f   :  { %v1060_v11 = vadd.f32 %v1059_v9, %v1058_v6  ;;  %v1069_v12 = vrot.slane %v1068_v10, 4 }
 0x661   :  { %v1061_v13 = vrot.slane %v1060_v11, 2  ;;  %v1070_v14 = vadd.f32 %v1069_v12, %v1068_v10 }
 0x663   :  { %v1062_v15 = vadd.f32 %v1061_v13, %v1060_v11  ;;  %v1071_v16 = vrot.slane %v1070_v14, 2 }
 0x665   :  { %v1063_v17 = vrot.slane %v1062_v15, 1  ;;  %v1072_v18 = vadd.f32 %v1071_v16, %v1070_v14 }
 0x667   :  { %v1064_v19 = vadd.f32 %v1063_v17, %v1062_v15  ;;  %v1073_v20 = vrot.slane %v1072_v18, 1 }
 0x669   :  { %v1065_v21 = vmul.f32 0.0625, %v1064_v19  ;;  %v1074_v22 = vadd.f32 %v1073_v20, %v1072_v18 }
 0x66b   :  { %v1075_v23 = vmul.f32 0.0625, %v1074_v22  ;;  %v1076_v24 = vmul.f32 %v1065_v21, %v1065_v21 }
 0x66d   :  { %v1077_v25 = vsub.f32 %v1075_v23, %v1076_v24  ;;  %v1241_v24 = vld [vmem:[#allocation22] sm:$0x1] }
 0x66f   :  { %v1078_v26 = vmax.f32 %v1077_v25, 0.0 }
 0x671   :  { %v1080_v27 = vadd.f32 1e-05, %v1078_v26 }
 0x673   :  { %3120 = vrsqrt.f32 %v1080_v27 }
 0x67d   :  { %v3121_v29 = vpop.eup %3120 }
 0x67e   :  { %v1082_v30 = vmul.f32 %v3121_v29, %v1079_v28 }
 0x680   :  { %v1084_v32 = vmul.f32 %v1082_v30, %v1065_v21  ;;  %v1090_v33 = vrot.slane %v1082_v30, %v4613_v45  ;;  %v1237_v21 = vld [vmem:[#allocation20] sm:$0x1] }
 0x682   :  { %v1085_v34 = vsub.f32 %v1083_v31, %v1084_v32  ;;  %v1092_v35 = vmul.f32 %v1090_v33, %v1051_v2  ;;  %v1093_v36 = vmul.f32 %v1090_v33, %v1054_v4  ;;  %v1260_v31 = vld [vmem:[#allocation23] sm:$0xff]  ;;  %v1261_v32 = vld [vmem:[#allocation23 + $0x8] sm:$0xff] }
 0x684   :  { %v1098_v37 = vrot.slane %v1085_v34, %v4613_v45 }
 0x686   :  { %v1100_v40 = vadd.f32 %v1098_v37, %v1092_v35  ;;  %v1101_v41 = vadd.f32 %v1098_v37, %v1093_v36 }
 0x688   :  { %v4681_v42 = vmul.f32 %v1102_v38, %v1100_v40  ;;  %v4683_v43 = vmul.f32 %v1103_v39, %v1101_v41 }
 0x68a   :  { %v1107_v44 = vmax.f32 %v4683_v43, 0.0  ;;  %v1106_v46 = vmax.f32 %v4681_v42, 0.0  ;;  %v3072_v42 = vld [vmem:[#allocation31 + $0x10] sm:$0xff]   ;;  %v3073_v43 = vld [vmem:[#allocation31 + $0x18] sm:$0xff]  }
 0x68c   :  { %v1108_v47 = vadd.f32 %v1106_v46, %v948_v53  ;;  %v1109_v48 = vadd.f32 %v1107_v44, %v949_v52  ;;  %v3066_v52 = vld [vmem:[#allocation25 + $0x20] sm:$0xff]   ;;  %v3067_v53 = vld [vmem:[#allocation25 + $0x28] sm:$0xff]  }
 0x68d   :  { %2810 = vmatpush3.bf16.msra.mxu0 %v3066_v52 }
 0x68e   :  { %v1110_v49 = vpack.c.bf16 %v1109_v48, %v1108_v47  ;;  %2811 = vmatprep.subr.bf16.mxu0 %v4131_v0  ;;  %v3070_v47 = vld [vmem:[#allocation31] sm:$0xff]   ;;  %v3071_v48 = vld [vmem:[#allocation31 + $0x8] sm:$0xff]  }
 0x690   :  { %2798 = vmatmul.mubr.bf16.vlgmr.msra.gmra.mrb[4].mxu1 %v1110_v49  ;;  %v3076_v49 = vld [vmem:[#allocation31 + $0x30] sm:$0xff]  }
 0x691   :  { %2837 = vmatprep.mubr.msk.bf16.mxu1 %vm4132_vm0, %v4131_v0  ;;  %2812 = vmatpush3.bf16.msra.mxu0 %v3067_v53 }
 0x692   :  { %2813 = vmatprep.subr.bf16.mxu0 %v4131_v0  ;;  %2822 = vmatpush3.bf16.msra.mxu1 %v3070_v47  ;;  %v3085_v47 = vld [vmem:[#allocation37 + $0x38] sm:$0xff]  }
 0x693   :  { %2823 = vmatprep.subr.bf16.mxu1 %v4131_v0 }
 0x695   :  { %2814 = vmatpush3.bf16.msra.mxu0 %v3068_v56 }
 0x696   :  { %2815 = vmatprep.subr.bf16.mxu0 %v4131_v0  ;;  %2824 = vmatpush3.bf16.msra.mxu1 %v3071_v48 }
 0x697   :  { %2825 = vmatprep.subr.bf16.mxu1 %v4131_v0 }
 0x699   :  { %2816 = vmatpush3.bf16.msra.mxu0 %v3069_v57 }
 0x69a   :  { %2841 = vmatprep.subr.bf16.mxu0 %v4131_v0  ;;  %2826 = vmatpush3.bf16.msra.mxu1 %v3072_v42 }
 0x69b   :  { %2827 = vmatprep.subr.bf16.mxu1 %v4131_v0 }
 0x69e   :  { %2828 = vmatpush3.bf16.msra.mxu1 %v3073_v43 }
 0x69f   :  { %2829 = vmatprep.subr.bf16.mxu1 %v4131_v0 }
 0x763   :  { %v1209_v58 = vpop.f32.mrb[4].mxu1 }
 0x764   :  { %v2799_v59 = vpop.f32.mrb[5].mxu1  ;;  %v1224_v61 = vmul.f32 %v1209_v58, %v1209_v58 }
 0x765   :  { %v1212_v60 = vpop.f32.mrb[6].mxu1 }
 0x766   :  { %v1216_v62 = vadd.f32 %v1212_v60, %v1209_v58  ;;  %v1225_v63 = vmul.f32 %v1212_v60, %v1212_v60  ;;  %v2800_v1 = vpop.f32.mrb[7].mxu1 }
 0x768   :  { %v1217_v2 = vrot.slane %v1216_v62, 4  ;;  %v1226_v3 = vadd.f32 %v1225_v63, %v1224_v61 }
 0x76a   :  { %v1218_v4 = vadd.f32 %v1217_v2, %v1216_v62  ;;  %v1227_v5 = vrot.slane %v1226_v3, 4 }
 0x76c   :  { %v1219_v6 = vrot.slane %v1218_v4, 2  ;;  %v1228_v7 = vadd.f32 %v1227_v5, %v1226_v3 }
 0x76e   :  { %v1220_v8 = vadd.f32 %v1219_v6, %v1218_v4  ;;  %v1229_v9 = vrot.slane %v1228_v7, 2 }
 0x770   :  { %v1221_v10 = vrot.slane %v1220_v8, 1  ;;  %v1230_v11 = vadd.f32 %v1229_v9, %v1228_v7 }
 0x772   :  { %v1222_v12 = vadd.f32 %v1221_v10, %v1220_v8  ;;  %v1231_v13 = vrot.slane %v1230_v11, 1 }
 0x774   :  { %v1223_v14 = vmul.f32 0.0625, %v1222_v12  ;;  %v1232_v15 = vadd.f32 %v1231_v13, %v1230_v11 }
 0x776   :  { %v1233_v16 = vmul.f32 0.0625, %v1232_v15  ;;  %v1234_v17 = vmul.f32 %v1223_v14, %v1223_v14 }
 0x778   :  { %v1235_v18 = vsub.f32 %v1233_v16, %v1234_v17  ;;  %v1399_v17 = vld [vmem:[#allocation28] sm:$0x1] }
 0x77a   :  { %v1236_v19 = vmax.f32 %v1235_v18, 0.0 }
 0x77c   :  { %v1238_v20 = vadd.f32 1e-05, %v1236_v19 }
 0x77e   :  { %3122 = vrsqrt.f32 %v1238_v20 }
 0x788   :  { %v3123_v22 = vpop.eup %3122 }
 0x789   :  { %v1240_v23 = vmul.f32 %v3123_v22, %v1237_v21 }
 0x78b   :  { %v1242_v25 = vmul.f32 %v1240_v23, %v1223_v14  ;;  %v1248_v26 = vrot.slane %v1240_v23, %v4613_v45  ;;  %v1395_v14 = vld [vmem:[#allocation26] sm:$0x1] }
 0x78d   :  { %v1243_v27 = vsub.f32 %v1241_v24, %v1242_v25  ;;  %v1250_v28 = vmul.f32 %v1248_v26, %v1209_v58  ;;  %v1251_v29 = vmul.f32 %v1248_v26, %v1212_v60  ;;  %v1418_v24 = vld [vmem:[#allocation29] sm:$0xff]  ;;  %v1419_v25 = vld [vmem:[#allocation29 + $0x8] sm:$0xff] }
 0x78f   :  { %v1256_v30 = vrot.slane %v1243_v27, %v4613_v45 }
 0x791   :  { %v1258_v33 = vadd.f32 %v1256_v30, %v1250_v28  ;;  %v1259_v34 = vadd.f32 %v1256_v30, %v1251_v29 }
 0x793   :  { %v4707_v35 = vmul.f32 %v1260_v31, %v1258_v33  ;;  %v4709_v36 = vmul.f32 %v1261_v32, %v1259_v34 }
 0x795   :  { %v1265_v37 = vmax.f32 %v4709_v36, 0.0  ;;  %v1264_v38 = vmax.f32 %v4707_v35, 0.0  ;;  %v3080_v35 = vld [vmem:[#allocation37 + $0x10] sm:$0xff]   ;;  %v3081_v36 = vld [vmem:[#allocation37 + $0x18] sm:$0xff]  }
 0x797   :  { %v1266_v39 = vadd.f32 %v1264_v38, %v1106_v46  ;;  %v1267_v40 = vadd.f32 %v1265_v37, %v1107_v44  ;;  %v3074_v44 = vld [vmem:[#allocation31 + $0x20] sm:$0xff]   ;;  %v3075_v46 = vld [vmem:[#allocation31 + $0x28] sm:$0xff]  }
 0x798   :  { %2830 = vmatpush3.bf16.msra.mxu1 %v3074_v44 }
 0x799   :  { %v1268_v41 = vpack.c.bf16 %v1267_v40, %v1266_v39  ;;  %2831 = vmatprep.subr.bf16.mxu1 %v4131_v0  ;;  %v3078_v39 = vld [vmem:[#allocation37] sm:$0xff]   ;;  %v3079_v40 = vld [vmem:[#allocation37 + $0x8] sm:$0xff]  }
 0x79b   :  { %2818 = vmatmul.mubr.bf16.vlgmr.msra.gmra.mrb[8].mxu0 %v1268_v41  ;;  %v3084_v41 = vld [vmem:[#allocation37 + $0x30] sm:$0xff]  }
 0x79c   :  { %2857 = vmatprep.mubr.msk.bf16.mxu0 %vm4132_vm0, %v4131_v0  ;;  %2832 = vmatpush3.bf16.msra.mxu1 %v3075_v46 }
 0x79d   :  { %2833 = vmatprep.subr.bf16.mxu1 %v4131_v0  ;;  %2842 = vmatpush3.bf16.msra.mxu0 %v3078_v39  ;;  %v3093_v39 = vld [vmem:[#allocation43 + $0x38] sm:$0xff]  }
 0x79e   :  { %2843 = vmatprep.subr.bf16.mxu0 %v4131_v0 }
 0x7a0   :  { %2834 = vmatpush3.bf16.msra.mxu1 %v3076_v49 }
 0x7a1   :  { %2835 = vmatprep.subr.bf16.mxu1 %v4131_v0  ;;  %2844 = vmatpush3.bf16.msra.mxu0 %v3079_v40 }
 0x7a2   :  { %2845 = vmatprep.subr.bf16.mxu0 %v4131_v0 }
 0x7a4   :  { %2836 = vmatpush3.bf16.msra.mxu1 %v3077_v54 }
 0x7a5   :  { %2861 = vmatprep.subr.bf16.mxu1 %v4131_v0  ;;  %2846 = vmatpush3.bf16.msra.mxu0 %v3080_v35 }
 0x7a6   :  { %2847 = vmatprep.subr.bf16.mxu0 %v4131_v0 }
 0x7a9   :  { %2848 = vmatpush3.bf16.msra.mxu0 %v3081_v36 }
 0x7aa   :  { %2849 = vmatprep.subr.bf16.mxu0 %v4131_v0 }
 0x86e   :  { %v1367_v55 = vpop.f32.mrb[8].mxu0 }
 0x86f   :  { %v2819_v50 = vpop.f32.mrb[9].mxu0  ;;  %v1382_v52 = vmul.f32 %v1367_v55, %v1367_v55 }
 0x870   :  { %v1370_v51 = vpop.f32.mrb[10].mxu0 }
 0x871   :  { %v1374_v53 = vadd.f32 %v1370_v51, %v1367_v55  ;;  %v1383_v56 = vmul.f32 %v1370_v51, %v1370_v51  ;;  %v2820_v57 = vpop.f32.mrb[11].mxu0 }
 0x873   :  { %v1375_v58 = vrot.slane %v1374_v53, 4  ;;  %v1384_v59 = vadd.f32 %v1383_v56, %v1382_v52 }
 0x875   :  { %v1376_v60 = vadd.f32 %v1375_v58, %v1374_v53  ;;  %v1385_v61 = vrot.slane %v1384_v59, 4 }
 0x877   :  { %v1377_v62 = vrot.slane %v1376_v60, 2  ;;  %v1386_v63 = vadd.f32 %v1385_v61, %v1384_v59 }
 0x879   :  { %v1378_v1 = vadd.f32 %v1377_v62, %v1376_v60  ;;  %v1387_v2 = vrot.slane %v1386_v63, 2 }
 0x87b   :  { %v1379_v3 = vrot.slane %v1378_v1, 1  ;;  %v1388_v4 = vadd.f32 %v1387_v2, %v1386_v63 }
 0x87d   :  { %v1380_v5 = vadd.f32 %v1379_v3, %v1378_v1  ;;  %v1389_v6 = vrot.slane %v1388_v4, 1 }
 0x87f   :  { %v1381_v7 = vmul.f32 0.0625, %v1380_v5  ;;  %v1390_v8 = vadd.f32 %v1389_v6, %v1388_v4 }
 0x881   :  { %v1391_v9 = vmul.f32 0.0625, %v1390_v8  ;;  %v1392_v10 = vmul.f32 %v1381_v7, %v1381_v7 }
 0x883   :  { %v1393_v11 = vsub.f32 %v1391_v9, %v1392_v10  ;;  %v1557_v10 = vld [vmem:[#allocation34] sm:$0x1] }
 0x885   :  { %v1394_v12 = vmax.f32 %v1393_v11, 0.0 }
 0x887   :  { %v1396_v13 = vadd.f32 1e-05, %v1394_v12 }
 0x889   :  { %3124 = vrsqrt.f32 %v1396_v13 }
 0x893   :  { %v3125_v15 = vpop.eup %3124 }
 0x894   :  { %v1398_v16 = vmul.f32 %v3125_v15, %v1395_v14 }
 0x896   :  { %v1400_v18 = vmul.f32 %v1398_v16, %v1381_v7  ;;  %v1406_v19 = vrot.slane %v1398_v16, %v4613_v45  ;;  %v1553_v7 = vld [vmem:[#allocation32] sm:$0x1] }
 0x898   :  { %v1401_v20 = vsub.f32 %v1399_v17, %v1400_v18  ;;  %v1408_v21 = vmul.f32 %v1406_v19, %v1367_v55  ;;  %v1409_v22 = vmul.f32 %v1406_v19, %v1370_v51  ;;  %v1576_v17 = vld [vmem:[#allocation35] sm:$0xff]  ;;  %v1577_v18 = vld [vmem:[#allocation35 + $0x8] sm:$0xff] }
 0x89a   :  { %v1414_v23 = vrot.slane %v1401_v20, %v4613_v45 }
 0x89c   :  { %v1416_v26 = vadd.f32 %v1414_v23, %v1408_v21  ;;  %v1417_v27 = vadd.f32 %v1414_v23, %v1409_v22 }
 0x89e   :  { %v4733_v28 = vmul.f32 %v1418_v24, %v1416_v26  ;;  %v4735_v29 = vmul.f32 %v1419_v25, %v1417_v27 }
 0x8a0   :  { %v1423_v30 = vmax.f32 %v4735_v29, 0.0  ;;  %v1422_v31 = vmax.f32 %v4733_v28, 0.0  ;;  %v3088_v28 = vld [vmem:[#allocation43 + $0x10] sm:$0xff]   ;;  %v3089_v29 = vld [vmem:[#allocation43 + $0x18] sm:$0xff]  }
 0x8a2   :  { %v1424_v32 = vadd.f32 %v1422_v31, %v1264_v38  ;;  %v1425_v33 = vadd.f32 %v1423_v30, %v1265_v37  ;;  %v3082_v37 = vld [vmem:[#allocation37 + $0x20] sm:$0xff]   ;;  %v3083_v38 = vld [vmem:[#allocation37 + $0x28] sm:$0xff]  }
 0x8a3   :  { %2850 = vmatpush3.bf16.msra.mxu0 %v3082_v37 }
 0x8a4   :  { %v1426_v34 = vpack.c.bf16 %v1425_v33, %v1424_v32  ;;  %2851 = vmatprep.subr.bf16.mxu0 %v4131_v0  ;;  %v3086_v32 = vld [vmem:[#allocation43] sm:$0xff]   ;;  %v3087_v33 = vld [vmem:[#allocation43 + $0x8] sm:$0xff]  }
 0x8a6   :  { %2838 = vmatmul.mubr.bf16.vlgmr.msra.gmra.mrb[8].mxu1 %v1426_v34  ;;  %v3092_v34 = vld [vmem:[#allocation43 + $0x30] sm:$0xff]  }
 0x8a7   :  { %2877 = vmatprep.mubr.msk.bf16.mxu1 %vm4132_vm0, %v4131_v0  ;;  %2852 = vmatpush3.bf16.msra.mxu0 %v3083_v38 }
 0x8a8   :  { %2853 = vmatprep.subr.bf16.mxu0 %v4131_v0  ;;  %2862 = vmatpush3.bf16.msra.mxu1 %v3086_v32  ;;  %v3101_v32 = vld [vmem:[%s4994_s2 + $0x38] sm:$0xff]  }
 0x8a9   :  { %2863 = vmatprep.subr.bf16.mxu1 %v4131_v0 }
 0x8ab   :  { %2854 = vmatpush3.bf16.msra.mxu0 %v3084_v41 }
 0x8ac   :  { %2855 = vmatprep.subr.bf16.mxu0 %v4131_v0  ;;  %2864 = vmatpush3.bf16.msra.mxu1 %v3087_v33 }
 0x8ad   :  { %2865 = vmatprep.subr.bf16.mxu1 %v4131_v0 }
 0x8af   :  { %2856 = vmatpush3.bf16.msra.mxu0 %v3085_v47 }
 0x8b0   :  { %2881 = vmatprep.subr.bf16.mxu0 %v4131_v0  ;;  %2866 = vmatpush3.bf16.msra.mxu1 %v3088_v28 }
 0x8b1   :  { %2867 = vmatprep.subr.bf16.mxu1 %v4131_v0 }
 0x8b4   :  { %2868 = vmatpush3.bf16.msra.mxu1 %v3089_v29 }
 0x8b5   :  { %2869 = vmatprep.subr.bf16.mxu1 %v4131_v0 }
 0x979   :  { %v1525_v48 = vpop.f32.mrb[8].mxu1 }
 0x97a   :  { %v2839_v42 = vpop.f32.mrb[9].mxu1  ;;  %v1540_v44 = vmul.f32 %v1525_v48, %v1525_v48 }
 0x97b   :  { %v1528_v43 = vpop.f32.mrb[10].mxu1 }
 0x97c   :  { %v1532_v46 = vadd.f32 %v1528_v43, %v1525_v48  ;;  %v1541_v49 = vmul.f32 %v1528_v43, %v1528_v43  ;;  %v2840_v54 = vpop.f32.mrb[11].mxu1 }
 0x97e   :  { %v1533_v55 = vrot.slane %v1532_v46, 4  ;;  %v1542_v50 = vadd.f32 %v1541_v49, %v1540_v44 }
 0x980   :  { %v1534_v51 = vadd.f32 %v1533_v55, %v1532_v46  ;;  %v1543_v52 = vrot.slane %v1542_v50, 4 }
 0x982   :  { %v1535_v53 = vrot.slane %v1534_v51, 2  ;;  %v1544_v56 = vadd.f32 %v1543_v52, %v1542_v50 }
 0x984   :  { %v1536_v57 = vadd.f32 %v1535_v53, %v1534_v51  ;;  %v1545_v58 = vrot.slane %v1544_v56, 2 }
 0x986   :  { %v1537_v59 = vrot.slane %v1536_v57, 1  ;;  %v1546_v60 = vadd.f32 %v1545_v58, %v1544_v56 }
 0x988   :  { %v1538_v61 = vadd.f32 %v1537_v59, %v1536_v57  ;;  %v1547_v62 = vrot.slane %v1546_v60, 1 }
 0x98a   :  { %v1539_v63 = vmul.f32 0.0625, %v1538_v61  ;;  %v1548_v1 = vadd.f32 %v1547_v62, %v1546_v60 }
 0x98c   :  { %v1549_v2 = vmul.f32 0.0625, %v1548_v1  ;;  %v1550_v3 = vmul.f32 %v1539_v63, %v1539_v63 }
 0x98e   :  { %v1551_v4 = vsub.f32 %v1549_v2, %v1550_v3  ;;  %v1715_v3 = vld [vmem:[#allocation40] sm:$0x1] }
 0x990   :  { %v1552_v5 = vmax.f32 %v1551_v4, 0.0 }
 0x992   :  { %v1554_v6 = vadd.f32 1e-05, %v1552_v5 }
 0x994   :  { %3126 = vrsqrt.f32 %v1554_v6 }
 0x99e   :  { %v3127_v8 = vpop.eup %3126 }
 0x99f   :  { %v1556_v9 = vmul.f32 %v3127_v8, %v1553_v7 }
 0x9a1   :  { %v1558_v11 = vmul.f32 %v1556_v9, %v1539_v63  ;;  %v1564_v12 = vrot.slane %v1556_v9, %v4613_v45  ;;  %v1711_v63 = vld [vmem:[#allocation38] sm:$0x1] }
 0x9a3   :  { %v1559_v13 = vsub.f32 %v1557_v10, %v1558_v11  ;;  %v1566_v14 = vmul.f32 %v1564_v12, %v1525_v48  ;;  %v1567_v15 = vmul.f32 %v1564_v12, %v1528_v43  ;;  %v1734_v10 = vld [vmem:[#allocation41] sm:$0xff]  ;;  %v1735_v11 = vld [vmem:[#allocation41 + $0x8] sm:$0xff] }
 0x9a5   :  { %v1572_v16 = vrot.slane %v1559_v13, %v4613_v45 }
 0x9a7   :  { %v1574_v19 = vadd.f32 %v1572_v16, %v1566_v14  ;;  %v1575_v20 = vadd.f32 %v1572_v16, %v1567_v15 }
 0x9a9   :  { %v4759_v21 = vmul.f32 %v1576_v17, %v1574_v19  ;;  %v4761_v22 = vmul.f32 %v1577_v18, %v1575_v20 }
 0x9ab   :  { %v1581_v23 = vmax.f32 %v4761_v22, 0.0  ;;  %v1580_v24 = vmax.f32 %v4759_v21, 0.0  ;;  %v3095_v21 = vld [vmem:[%s4994_s2 + $0x8] sm:$0xff]   ;;  %v3096_v22 = vld [vmem:[%s4994_s2 + $0x10] sm:$0xff]  }
 0x9ad   :  { %v1582_v25 = vadd.f32 %v1580_v24, %v1422_v31  ;;  %v1583_v26 = vadd.f32 %v1581_v23, %v1423_v30  ;;  %v3090_v30 = vld [vmem:[#allocation43 + $0x20] sm:$0xff]   ;;  %v3091_v31 = vld [vmem:[#allocation43 + $0x28] sm:$0xff]  }
 0x9ae   :  { %2870 = vmatpush3.bf16.msra.mxu1 %v3090_v30 }
 0x9af   :  { %v1584_v27 = vpack.c.bf16 %v1583_v26, %v1582_v25  ;;  %2871 = vmatprep.subr.bf16.mxu1 %v4131_v0  ;;  %v3094_v25 = vld [vmem:[%s4994_s2] sm:$0xff]   ;;  %v3099_v26 = vld [vmem:[%s4994_s2 + $0x28] sm:$0xff]  }
 0x9b1   :  { %2858 = vmatmul.mubr.bf16.vlgmr.msra.gmra.mrb[12].mxu0 %v1584_v27  ;;  %v3100_v27 = vld [vmem:[%s4994_s2 + $0x30] sm:$0xff]  }
 0x9b2   :  { %2897 = vmatprep.mubr.msk.bf16.mxu0 %vm4132_vm0, %v4131_v0  ;;  %2872 = vmatpush3.bf16.msra.mxu1 %v3091_v31 }
 0x9b3   :  { %2873 = vmatprep.subr.bf16.mxu1 %v4131_v0  ;;  %2882 = vmatpush3.bf16.msra.mxu0 %v3094_v25  ;;  %v3109_v25 = vld [vmem:[%s4995_s30 + $0x38] sm:$0xff]  }
 0x9b4   :  { %2883 = vmatprep.subr.bf16.mxu0 %v4131_v0 }
 0x9b6   :  { %2874 = vmatpush3.bf16.msra.mxu1 %v3092_v34 }
 0x9b7   :  { %2875 = vmatprep.subr.bf16.mxu1 %v4131_v0  ;;  %2884 = vmatpush3.bf16.msra.mxu0 %v3095_v21 }
 0x9b8   :  { %2885 = vmatprep.subr.bf16.mxu0 %v4131_v0 }
 0x9ba   :  { %2876 = vmatpush3.bf16.msra.mxu1 %v3093_v39 }
 0x9bb   :  { %2901 = vmatprep.subr.bf16.mxu1 %v4131_v0  ;;  %2886 = vmatpush3.bf16.msra.mxu0 %v3096_v22 }
 0x9bc   :  { %2887 = vmatprep.subr.bf16.mxu0 %v4131_v0 }
 0xa84   :  { %v1683_v40 = vpop.f32.mrb[12].mxu0 }
 0xa85   :  { %v2859_v35 = vpop.f32.mrb[13].mxu0  ;;  %v1698_v37 = vmul.f32 %v1683_v40, %v1683_v40 }
 0xa86   :  { %v1686_v36 = vpop.f32.mrb[14].mxu0 }
 0xa87   :  { %v1690_v38 = vadd.f32 %v1686_v36, %v1683_v40  ;;  %v1699_v41 = vmul.f32 %v1686_v36, %v1686_v36  ;;  %v2860_v47 = vpop.f32.mrb[15].mxu0 }
 0xa89   :  { %v1691_v48 = vrot.slane %v1690_v38, 4  ;;  %v1700_v42 = vadd.f32 %v1699_v41, %v1698_v37 }
 0xa8b   :  { %v1692_v43 = vadd.f32 %v1691_v48, %v1690_v38  ;;  %v1701_v44 = vrot.slane %v1700_v42, 4 }
 0xa8d   :  { %v1693_v46 = vrot.slane %v1692_v43, 2  ;;  %v1702_v49 = vadd.f32 %v1701_v44, %v1700_v42 }
 0xa8f   :  { %v1694_v54 = vadd.f32 %v1693_v46, %v1692_v43  ;;  %v1703_v55 = vrot.slane %v1702_v49, 2 }
 0xa91   :  { %v1695_v50 = vrot.slane %v1694_v54, 1  ;;  %v1704_v51 = vadd.f32 %v1703_v55, %v1702_v49 }
 0xa93   :  { %v1696_v52 = vadd.f32 %v1695_v50, %v1694_v54  ;;  %v1705_v53 = vrot.slane %v1704_v51, 1 }
 0xa95   :  { %v1697_v56 = vmul.f32 0.0625, %v1696_v52  ;;  %v1706_v57 = vadd.f32 %v1705_v53, %v1704_v51 }
 0xa97   :  { %v1707_v58 = vmul.f32 0.0625, %v1706_v57  ;;  %v1708_v59 = vmul.f32 %v1697_v56, %v1697_v56 }
 0xa99   :  { %v1709_v60 = vsub.f32 %v1707_v58, %v1708_v59  ;;  %v1873_v59 = vld [vmem:[#allocation46] sm:$0x1] }
 0xa9b   :  { %v1710_v61 = vmax.f32 %v1709_v60, 0.0 }
 0xa9d   :  { %v1712_v62 = vadd.f32 1e-05, %v1710_v61 }
 0xa9f   :  { %3128 = vrsqrt.f32 %v1712_v62 }
 0xaa9   :  { %v3129_v1 = vpop.eup %3128 }
 0xaaa   :  { %v1714_v2 = vmul.f32 %v3129_v1, %v1711_v63 }
 0xaac   :  { %v1716_v4 = vmul.f32 %v1714_v2, %v1697_v56  ;;  %v1722_v5 = vrot.slane %v1714_v2, %v4613_v45  ;;  %v1869_v56 = vld [vmem:[#allocation44] sm:$0x1] }
 0xaae   :  { %v1717_v6 = vsub.f32 %v1715_v3, %v1716_v4  ;;  %v1724_v7 = vmul.f32 %v1722_v5, %v1683_v40  ;;  %v1725_v8 = vmul.f32 %v1722_v5, %v1686_v36  ;;  %v1892_v3 = vld [vmem:[#allocation47] sm:$0xff]  ;;  %v1893_v4 = vld [vmem:[#allocation47 + $0x8] sm:$0xff] }
 0xab0   :  { %v1730_v9 = vrot.slane %v1717_v6, %v4613_v45 }
 0xab2   :  { %v1732_v12 = vadd.f32 %v1730_v9, %v1724_v7  ;;  %v1733_v13 = vadd.f32 %v1730_v9, %v1725_v8 }
 0xab4   :  { %v4785_v14 = vmul.f32 %v1734_v10, %v1732_v12  ;;  %v4787_v15 = vmul.f32 %v1735_v11, %v1733_v13 }
 0xab6   :  { %v1739_v16 = vmax.f32 %v4787_v15, 0.0  ;;  %v1738_v17 = vmax.f32 %v4785_v14, 0.0  ;;  %v3103_v14 = vld [vmem:[%s4995_s30 + $0x8] sm:$0xff]   ;;  %v3104_v15 = vld [vmem:[%s4995_s30 + $0x10] sm:$0xff]  }
 0xab8   :  { %v1740_v18 = vadd.f32 %v1738_v17, %v1580_v24  ;;  %v1741_v19 = vadd.f32 %v1739_v16, %v1581_v23  ;;  %v3097_v23 = vld [vmem:[%s4994_s2 + $0x18] sm:$0xff]   ;;  %v3098_v24 = vld [vmem:[%s4994_s2 + $0x20] sm:$0xff]  }
 0xab9   :  { %2888 = vmatpush3.bf16.msra.mxu0 %v3097_v23 }
 0xaba   :  { %v1742_v20 = vpack.c.bf16 %v1741_v19, %v1740_v18  ;;  %2889 = vmatprep.subr.bf16.mxu0 %v4131_v0  ;;  %v3102_v18 = vld [vmem:[%s4995_s30] sm:$0xff]   ;;  %v3107_v19 = vld [vmem:[%s4995_s30 + $0x28] sm:$0xff]  }
 0xabc   :  { %2878 = vmatmul.mubr.bf16.vlgmr.msra.gmra.mrb[12].mxu1 %v1742_v20  ;;  %v3108_v20 = vld [vmem:[%s4995_s30 + $0x30] sm:$0xff]  }
 0xabd   :  { %2917 = vmatprep.mubr.msk.bf16.mxu1 %vm4132_vm0, %v4131_v0  ;;  %2890 = vmatpush3.bf16.msra.mxu0 %v3098_v24 }
 0xabe   :  { %2891 = vmatprep.subr.bf16.mxu0 %v4131_v0  ;;  %2902 = vmatpush3.bf16.msra.mxu1 %v3102_v18  ;;  %v3113_v18 = vld [vmem:[%s4998_s27 + $0x18] sm:$0xff]  }
 0xabf   :  { %2903 = vmatprep.subr.bf16.mxu1 %v4131_v0 }
 0xac1   :  { %2892 = vmatpush3.bf16.msra.mxu0 %v3099_v26 }
 0xac2   :  { %2893 = vmatprep.subr.bf16.mxu0 %v4131_v0  ;;  %2904 = vmatpush3.bf16.msra.mxu1 %v3103_v14 }
 0xac3   :  { %2905 = vmatprep.subr.bf16.mxu1 %v4131_v0 }
 0xac5   :  { %2894 = vmatpush3.bf16.msra.mxu0 %v3100_v27 }
 0xac6   :  { %2895 = vmatprep.subr.bf16.mxu0 %v4131_v0  ;;  %2906 = vmatpush3.bf16.msra.mxu1 %v3104_v15 }
 0xac7   :  { %2907 = vmatprep.subr.bf16.mxu1 %v4131_v0 }
 0xac9   :  { %2896 = vmatpush3.bf16.msra.mxu0 %v3101_v32 }
 0xaca   :  { %2921 = vmatprep.subr.bf16.mxu0 %v4131_v0 }
 0xb8f   :  { %v1841_v33 = vpop.f32.mrb[12].mxu1 }
 0xb90   :  { %v2879_v28 = vpop.f32.mrb[13].mxu1  ;;  %v1856_v30 = vmul.f32 %v1841_v33, %v1841_v33 }
 0xb91   :  { %v1844_v29 = vpop.f32.mrb[14].mxu1 }
 0xb92   :  { %v1848_v31 = vadd.f32 %v1844_v29, %v1841_v33  ;;  %v1857_v34 = vmul.f32 %v1844_v29, %v1844_v29  ;;  %v2880_v39 = vpop.f32.mrb[15].mxu1 }
 0xb94   :  { %v1849_v40 = vrot.slane %v1848_v31, 4  ;;  %v1858_v35 = vadd.f32 %v1857_v34, %v1856_v30 }
 0xb96   :  { %v1850_v36 = vadd.f32 %v1849_v40, %v1848_v31  ;;  %v1859_v37 = vrot.slane %v1858_v35, 4 }
 0xb98   :  { %v1851_v38 = vrot.slane %v1850_v36, 2  ;;  %v1860_v41 = vadd.f32 %v1859_v37, %v1858_v35 }
 0xb9a   :  { %v1852_v47 = vadd.f32 %v1851_v38, %v1850_v36  ;;  %v1861_v48 = vrot.slane %v1860_v41, 2 }
 0xb9c   :  { %v1853_v42 = vrot.slane %v1852_v47, 1  ;;  %v1862_v43 = vadd.f32 %v1861_v48, %v1860_v41 }
 0xb9e   :  { %v1854_v44 = vadd.f32 %v1853_v42, %v1852_v47  ;;  %v1863_v46 = vrot.slane %v1862_v43, 1 }
 0xba0   :  { %v1855_v49 = vmul.f32 0.0625, %v1854_v44  ;;  %v1864_v54 = vadd.f32 %v1863_v46, %v1862_v43 }
 0xba2   :  { %v1865_v55 = vmul.f32 0.0625, %v1864_v54  ;;  %v1866_v50 = vmul.f32 %v1855_v49, %v1855_v49 }
 0xba4   :  { %v1867_v51 = vsub.f32 %v1865_v55, %v1866_v50  ;;  %v2031_v50 = vld [vmem:[%s4996_s8] sm:$0x1] }
 0xba6   :  { %v1868_v52 = vmax.f32 %v1867_v51, 0.0 }
 0xba8   :  { %v1870_v53 = vadd.f32 1e-05, %v1868_v52 }
 0xbaa   :  { %3130 = vrsqrt.f32 %v1870_v53 }
 0xbb4   :  { %v3131_v57 = vpop.eup %3130 }
 0xbb5   :  { %v1872_v58 = vmul.f32 %v3131_v57, %v1869_v56 }
 0xbb7   :  { %v1874_v60 = vmul.f32 %v1872_v58, %v1855_v49  ;;  %v1880_v61 = vrot.slane %v1872_v58, %v4613_v45  ;;  %v2027_v49 = vld [vmem:[#allocation49] sm:$0x1] }
 0xbb9   :  { %v1875_v62 = vsub.f32 %v1873_v59, %v1874_v60  ;;  %v1882_v63 = vmul.f32 %v1880_v61, %v1841_v33  ;;  %v1883_v1 = vmul.f32 %v1880_v61, %v1844_v29  ;;  %v2050_v59 = vld [vmem:[%s4997_s19] sm:$0xff]  ;;  %v2051_v60 = vld [vmem:[%s4997_s19 + $0x8] sm:$0xff] }
 0xbbb   :  { %v1888_v2 = vrot.slane %v1875_v62, %v4613_v45 }
 0xbbd   :  { %v1890_v5 = vadd.f32 %v1888_v2, %v1882_v63  ;;  %v1891_v6 = vadd.f32 %v1888_v2, %v1883_v1 }
 0xbbf   :  { %v4819_v7 = vmul.f32 %v1892_v3, %v1890_v5  ;;  %v4821_v8 = vmul.f32 %v1893_v4, %v1891_v6 }
 0xbc1   :  { %v1897_v9 = vmax.f32 %v4821_v8, 0.0  ;;  %v1896_v10 = vmax.f32 %v4819_v7, 0.0 }
 0xbc3   :  { %v1898_v11 = vadd.f32 %v1896_v10, %v1738_v17  ;;  %v1899_v12 = vadd.f32 %v1897_v9, %v1739_v16  ;;  %v3105_v16 = vld [vmem:[%s4995_s30 + $0x18] sm:$0xff]   ;;  %v3106_v17 = vld [vmem:[%s4995_s30 + $0x20] sm:$0xff]  }
 0xbc4   :  { %2908 = vmatpush3.bf16.msra.mxu1 %v3105_v16 }
 0xbc5   :  { %v1900_v13 = vpack.c.bf16 %v1899_v12, %v1898_v11  ;;  %2909 = vmatprep.subr.bf16.mxu1 %v4131_v0  ;;  %v3110_v11 = vld [vmem:[%s4998_s27] sm:$0xff]   ;;  %v3111_v12 = vld [vmem:[%s4998_s27 + $0x8] sm:$0xff]  }
 0xbc7   :  { %2898 = vmatmul.mubr.bf16.vlgmr.msra.gmra.mrb[16].mxu0 %v1900_v13  ;;  %v3112_v13 = vld [vmem:[%s4998_s27 + $0x10] sm:$0xff]  }
 0xbc8   :  { %2929 = vmatprep.mubr.msk.bf16.mxu0 %vm4132_vm0, %v4131_v0  ;;  %2910 = vmatpush3.bf16.msra.mxu1 %v3106_v17 }
 0xbc9   :  { %2911 = vmatprep.subr.bf16.mxu1 %v4131_v0  ;;  %2922 = vmatpush3.bf16.msra.mxu0 %v3110_v11 }
 0xbca   :  { %2923 = vmatprep.subr.bf16.mxu0 %v4131_v0 }
 0xbcc   :  { %2912 = vmatpush3.bf16.msra.mxu1 %v3107_v19 }
 0xbcd   :  { %2913 = vmatprep.subr.bf16.mxu1 %v4131_v0  ;;  %2924 = vmatpush3.bf16.msra.mxu0 %v3111_v12 }
 0xbce   :  { %2925 = vmatprep.subr.bf16.mxu0 %v4131_v0 }
 0xbd0   :  { %2914 = vmatpush3.bf16.msra.mxu1 %v3108_v20 }
 0xbd1   :  { %2915 = vmatprep.subr.bf16.mxu1 %v4131_v0  ;;  %2926 = vmatpush3.bf16.msra.mxu0 %v3112_v13 }
 0xbd2   :  { %2927 = vmatprep.subr.bf16.mxu0 %v4131_v0 }
 0xbd4   :  { %2916 = vmatpush3.bf16.msra.mxu1 %v3109_v25 }
 0xbd5   :  { %2928 = vmatpush3.bf16.msra.mxu0 %v3113_v18 }
 0xbd6   :  { %2933 = vmatprep.subr.bf16.mxu0 %v4131_v0 }
 0xc9a   :  { %v1999_v21 = vpop.f32.mrb[16].mxu0 }
 0xc9b   :  { %v2899_v22 = vpop.f32.mrb[17].mxu0  ;;  %v2014_v24 = vmul.f32 %v1999_v21, %v1999_v21 }
 0xc9c   :  { %v2002_v23 = vpop.f32.mrb[18].mxu0 }
 0xc9d   :  { %v2006_v26 = vadd.f32 %v2002_v23, %v1999_v21  ;;  %v2015_v27 = vmul.f32 %v2002_v23, %v2002_v23  ;;  %v2900_v32 = vpop.f32.mrb[19].mxu0 }
 0xc9f   :  { %v2007_v33 = vrot.slane %v2006_v26, 4  ;;  %v2016_v28 = vadd.f32 %v2015_v27, %v2014_v24 }
 0xca1   :  { %v2008_v29 = vadd.f32 %v2007_v33, %v2006_v26  ;;  %v2017_v30 = vrot.slane %v2016_v28, 4 }
 0xca3   :  { %v2009_v31 = vrot.slane %v2008_v29, 2  ;;  %v2018_v34 = vadd.f32 %v2017_v30, %v2016_v28 }
 0xca5   :  { %v2010_v39 = vadd.f32 %v2009_v31, %v2008_v29  ;;  %v2019_v40 = vrot.slane %v2018_v34, 2 }
 0xca7   :  { %v2011_v35 = vrot.slane %v2010_v39, 1  ;;  %v2020_v36 = vadd.f32 %v2019_v40, %v2018_v34 }
 0xca9   :  { %v2012_v37 = vadd.f32 %v2011_v35, %v2010_v39  ;;  %v2021_v38 = vrot.slane %v2020_v36, 1 }
 0xcab   :  { %v2013_v41 = vmul.f32 0.0625, %v2012_v37  ;;  %v2022_v47 = vadd.f32 %v2021_v38, %v2020_v36 }
 0xcad   :  { %v2023_v48 = vmul.f32 0.0625, %v2022_v47  ;;  %v2024_v42 = vmul.f32 %v2013_v41, %v2013_v41 }
 0xcaf   :  { %v2025_v43 = vsub.f32 %v2023_v48, %v2024_v42  ;;  %v2194_v42 = vld [vmem:[#allocation52] sm:$0x1] }
 0xcb1   :  { %v2026_v44 = vmax.f32 %v2025_v43, 0.0 }
 0xcb3   :  { %v2028_v46 = vadd.f32 1e-05, %v2026_v44 }
 0xcb5   :  { %3132 = vrsqrt.f32 %v2028_v46 }
 0xcbf   :  { %v3133_v54 = vpop.eup %3132 }
 0xcc0   :  { %v2030_v55 = vmul.f32 %v3133_v54, %v2027_v49 }
 0xcc2   :  { %v2032_v51 = vmul.f32 %v2030_v55, %v2013_v41  ;;  %v2038_v52 = vrot.slane %v2030_v55, %v4613_v45  ;;  %v2190_v41 = vld [vmem:[#allocation50] sm:$0x1] }
 0xcc4   :  { %v2033_v53 = vsub.f32 %v2031_v50, %v2032_v51  ;;  %v2040_v56 = vmul.f32 %v2038_v52, %v1999_v21  ;;  %v2041_v57 = vmul.f32 %v2038_v52, %v2002_v23  ;;  %v2213_v50 = vld [vmem:[%s4999_s9] sm:$0xff]  ;;  %v2214_v51 = vld [vmem:[%s4999_s9 + $0x8] sm:$0xff] }
 0xcc6   :  { %v2046_v58 = vrot.slane %v2033_v53, %v4613_v45 }
 0xcc8   :  { %v2048_v61 = vadd.f32 %v2046_v58, %v2040_v56  ;;  %v2049_v62 = vadd.f32 %v2046_v58, %v2041_v57 }
 0xcca   :  { %v2052_v63 = vmul.f32 %v2050_v59, %v2048_v61  ;;  %v2053_v1 = vmul.f32 %v2051_v60, %v2049_v62  ;;  %v3114_v61 = vld [vmem:[#allocation56] sm:$0xff]   ;;  %v3115_v62 = vld [vmem:[#allocation56 + $0x8] sm:$0xff]  }
 0xccc   :  { %v2055_v2 = vmax.f32 %v2053_v1, 0.0  ;;  %v2054_v3 = vmax.f32 %v2052_v63, 0.0 }
 0xcce   :  { %v2056_v4 = vadd.f32 %v2054_v3, %v1896_v10  ;;  %v2057_v5 = vadd.f32 %v2055_v2, %v1897_v9 }
 0xcd0   :  { %v2058_v6 = vpack.c.bf16 %v2057_v5, %v2056_v4 }
 0xcd2   :  { %2918 = vmatmul.mubr.bf16.vlgmr.msra.gmra.mrb[16].mxu1 %v2058_v6 }
 0xda5   :  { %v2157_v7 = vpop.f32.mrb[16].mxu1 }
 0xda6   :  { %v2175_v8 = vmul.f32 %v2157_v7, %v2157_v7  ;;  %v2919_v9 = vpop.f32.mrb[17].mxu1  ;;  %v2165_v14 = vsel %vm2164_vm3, %v2157_v7, 0.0 }
 0xda7   :  { %v2160_v10 = vpop.f32.mrb[18].mxu1 }
 0xda8   :  { %v2166_v15 = vsel %vm2164_vm3, %v2160_v10, 0.0  ;;  %v2176_v16 = vmul.f32 %v2160_v10, %v2160_v10  ;;  %v2920_v17 = vpop.f32.mrb[19].mxu1  ;;  %v2177_v20 = vsel %vm2164_vm3, %v2175_v8, 0.0 }
 0xda9   :  { %v2167_v19 = vadd.f32 %v2166_v15, %v2165_v14 }
 0xdaa   :  { %v2178_v25 = vsel %vm2164_vm3, %v2176_v16, 0.0 }
 0xdab   :  { %v2168_v21 = vrot.slane %v2167_v19, 4  ;;  %v2179_v22 = vadd.f32 %v2178_v25, %v2177_v20 }
 0xdad   :  { %v2169_v23 = vadd.f32 %v2168_v21, %v2167_v19  ;;  %v2180_v24 = vrot.slane %v2179_v22, 4 }
 0xdaf   :  { %v2170_v26 = vrot.slane %v2169_v23, 2  ;;  %v2181_v27 = vadd.f32 %v2180_v24, %v2179_v22 }
 0xdb1   :  { %v2171_v32 = vadd.f32 %v2170_v26, %v2169_v23  ;;  %v2182_v33 = vrot.slane %v2181_v27, 2 }
 0xdb3   :  { %v2172_v28 = vrot.slane %v2171_v32, 1  ;;  %v2183_v29 = vadd.f32 %v2182_v33, %v2181_v27  ;;  %v2322_v33 = vld [vmem:[#allocation53] sm:$0x1] }
 0xdb5   :  { %v2173_v30 = vadd.f32 %v2172_v28, %v2171_v32  ;;  %v2184_v31 = vrot.slane %v2183_v29, 1 }
 0xdb7   :  { %v2174_v34 = vmul.f32 0.0625, %v2173_v30  ;;  %v2185_v39 = vadd.f32 %v2184_v31, %v2183_v29  ;;  %v2326_v30 = vld [vmem:[#allocation55] sm:$0x1] }
 0xdb9   :  { %v2186_v40 = vmul.f32 0.0625, %v2185_v39  ;;  %v2187_v35 = vmul.f32 %v2174_v34, %v2174_v34 }
 0xdbb   :  { %v2188_v36 = vsub.f32 %v2186_v40, %v2187_v35 }
 0xdbd   :  { %v2189_v37 = vmax.f32 %v2188_v36, 0.0 }
 0xdbf   :  { %v2191_v38 = vadd.f32 1e-05, %v2189_v37  ;;  %v2345_v37 = vld [vmem:[%s5000_s6] sm:$0xff] }
 0xdc1   :  { %3134 = vrsqrt.f32 %v2191_v38  ;;  %v2346_v38 = vld [vmem:[%s5000_s6 + $0x8] sm:$0xff] }
 0xdcb   :  { %v3135_v47 = vpop.eup %3134 }
 0xdcc   :  { %v2193_v48 = vmul.f32 %v3135_v47, %v2190_v41 }
 0xdce   :  { %v2195_v43 = vmul.f32 %v2193_v48, %v2174_v34  ;;  %v2201_v44 = vrot.slane %v2193_v48, %v4613_v45 }
 0xdd0   :  { %v2196_v46 = vsub.f32 %v2194_v42, %v2195_v43  ;;  %v2203_v49 = vmul.f32 %v2201_v44, %v2157_v7  ;;  %v2204_v54 = vmul.f32 %v2201_v44, %v2160_v10 }
 0xdd2   :  { %v2209_v55 = vrot.slane %v2196_v46, %v4613_v45 }
 0xdd4   :  { %v2211_v52 = vadd.f32 %v2209_v55, %v2203_v49  ;;  %v2212_v53 = vadd.f32 %v2209_v55, %v2204_v54 }
 0xdd6   :  { %v2215_v56 = vmul.f32 %v2213_v50, %v2211_v52  ;;  %v2216_v57 = vmul.f32 %v2214_v51, %v2212_v53 }
 0xdd8   :  { %v2217_v58 = vmax.f32 %v2215_v56, 0.0  ;;  %v2218_v59 = vmax.f32 %v2216_v57, 0.0 }
 0xdda   :  { %v2219_v60 = vpack.c.bf16 %v2218_v59, %v2217_v58 }
 0xddc   :  { %2930 = vmatmul.mubr.msk.bf16.vlgmr.msra.gmra.mrb[20].mxu0 %vm2164_vm3, %v2219_v60 }
 0xddd   :  { %2937 = vmatprep.mubr.msk.bf16.mxu0 %vm4132_vm0, %v4131_v0  ;;  %2934 = vmatpush3.bf16.msra.mxu0 %v3114_v61 }
 0xdde   :  { %2935 = vmatprep.subr.bf16.mxu0 %v4131_v0 }
 0xde1   :  { %2936 = vmatpush3.bf16.msra.mxu0 %v3115_v62 }
 0xeaf   :  { %v2289_v63 = vpop.f32.mrb[20].mxu0 }
 0xeb0   :  { %v2307_v1 = vmul.f32 %v2289_v63, %v2289_v63  ;;  %v2931_v2 = vpop.f32.mrb[21].mxu0  ;;  %v2297_v4 = vsel %vm2296_vm4, %v2289_v63, 0.0 }
 0xeb1   :  { %v2292_v3 = vpop.f32.mrb[22].mxu0 }
 0xeb2   :  { %v2298_v5 = vsel %vm2296_vm4, %v2292_v3, 0.0  ;;  %v2308_v6 = vmul.f32 %v2292_v3, %v2292_v3  ;;  %v2932_v11 = vpop.f32.mrb[23].mxu0  ;;  %v2309_v13 = vsel %vm2296_vm4, %v2307_v1, 0.0 }
 0xeb3   :  { %v2299_v12 = vadd.f32 %v2298_v5, %v2297_v4 }
 0xeb4   :  { %v2310_v18 = vsel %vm2296_vm4, %v2308_v6, 0.0 }
 0xeb5   :  { %v2300_v7 = vrot.slane %v2299_v12, 4  ;;  %v2311_v0 = vadd.f32 %v2310_v18, %v2309_v13 }
 0xeb7   :  { %v2301_v8 = vadd.f32 %v2300_v7, %v2299_v12  ;;  %v2312_v9 = vrot.slane %v2311_v0, 4 }
 0xeb9   :  { %v2302_v10 = vrot.slane %v2301_v8, 2  ;;  %v2313_v14 = vadd.f32 %v2312_v9, %v2311_v0 }
 0xebb   :  { %v2303_v15 = vadd.f32 %v2302_v10, %v2301_v8  ;;  %v2314_v16 = vrot.slane %v2313_v14, 2 }
 0xebd   :  { %v2304_v17 = vrot.slane %v2303_v15, 1  ;;  %v2315_v19 = vadd.f32 %v2314_v16, %v2313_v14  ;;  %v2438_v14 = vld [vmem:[#allocation58] sm:$0x1] }
 0xebf   :  { %v2305_v20 = vadd.f32 %v2304_v17, %v2303_v15  ;;  %v2316_v25 = vrot.slane %v2315_v19, 1  ;;  %v2442_v17 = vld [vmem:[#allocation59] sm:$0x1] }
 0xec1   :  { %v2306_v21 = vmul.f32 0.0625, %v2305_v20  ;;  %v2317_v22 = vadd.f32 %v2316_v25, %v2315_v19 }
 0xec3   :  { %v2318_v23 = vmul.f32 0.0625, %v2317_v22  ;;  %v2319_v24 = vmul.f32 %v2306_v21, %v2306_v21 }
 0xec5   :  { %v2320_v26 = vsub.f32 %v2318_v23, %v2319_v24  ;;  %v2462_v24 = vld [vmem:[%s4382_s13 + $0x8] sm:$0xff] }
 0xec7   :  { %v2321_v27 = vmax.f32 %v2320_v26, 0.0  ;;  %v2461_v26 = vld [vmem:[%s4382_s13] sm:$0xff] }
 0xec9   :  { %v2323_v32 = vadd.f32 1e-05, %v2321_v27 }
 0xecb   :  { %3136 = vrsqrt.f32 %v2323_v32 }
 0xed5   :  { %v3137_v28 = vpop.eup %3136 }
 0xed6   :  { %v2325_v29 = vmul.f32 %v3137_v28, %v2322_v33 }
 0xed8   :  { %v2327_v31 = vmul.f32 %v2325_v29, %v2306_v21  ;;  %v2333_v34 = vrot.slane %v2325_v29, %v4613_v45 }
 0xeda   :  { %v2328_v39 = vsub.f32 %v2326_v30, %v2327_v31  ;;  %v2335_v40 = vmul.f32 %v2333_v34, %v2289_v63  ;;  %v2336_v35 = vmul.f32 %v2333_v34, %v2292_v3 }
 0xedc   :  { %v2341_v36 = vrot.slane %v2328_v39, %v4613_v45 }
 0xede   :  { %v2343_v41 = vadd.f32 %v2341_v36, %v2335_v40  ;;  %v2344_v47 = vadd.f32 %v2341_v36, %v2336_v35 }
 0xee0   :  { %v2347_v48 = vmul.f32 %v2345_v37, %v2343_v41  ;;  %v2348_v42 = vmul.f32 %v2346_v38, %v2344_v47 }
 0xee2   :  { %v2349_v43 = vmax.f32 %v2347_v48, 0.0  ;;  %v2350_v44 = vmax.f32 %v2348_v42, 0.0 }
 0xee4   :  { %v2351_v46 = vpack.c.bf16 %v2350_v44, %v2349_v43 }
 0xee6   :  { %2938 = vmatmul.mubr.msk.bf16.vlgmr.msra.gmra.mrb[24].mxu0 %vm2296_vm4, %v2351_v46 }
 0xfb9   :  { %v2405_v49 = vpop.f32.mrb[24].mxu0 }
 0xfba   :  { %v2423_v54 = vmul.f32 %v2405_v49, %v2405_v49  ;;  %v2939_v55 = vpop.f32.mrb[25].mxu0  ;;  %v2413_v51 = vsel %vm2412_vm5, %v2405_v49, 0.0 }
 0xfbb   :  { %v2408_v50 = vpop.f32.mrb[26].mxu0 }
 0xfbc   :  { %v2414_v52 = vsel %vm2412_vm5, %v2408_v50, 0.0  ;;  %v2424_v53 = vmul.f32 %v2408_v50, %v2408_v50  ;;  %v2940_v56 = vpop.f32.mrb[27].mxu0  ;;  %v2425_v58 = vsel %vm2412_vm5, %v2423_v54, 0.0 }
 0xfbd   :  { %v2415_v57 = vadd.f32 %v2414_v52, %v2413_v51 }
 0xfbe   :  { %v2426_v59 = vsel %vm2412_vm5, %v2424_v53, 0.0 }
 0xfbf   :  { %v2416_v60 = vrot.slane %v2415_v57, 4  ;;  %v2427_v61 = vadd.f32 %v2426_v59, %v2425_v58 }
 0xfc1   :  { %v2417_v62 = vadd.f32 %v2416_v60, %v2415_v57  ;;  %v2428_v63 = vrot.slane %v2427_v61, 4 }
 0xfc3   :  { %v2418_v1 = vrot.slane %v2417_v62, 2  ;;  %v2429_v2 = vadd.f32 %v2428_v63, %v2427_v61 }
 0xfc5   :  { %v2419_v3 = vadd.f32 %v2418_v1, %v2417_v62  ;;  %v2430_v4 = vrot.slane %v2429_v2, 2 }
 0xfc7   :  { %v2420_v5 = vrot.slane %v2419_v3, 1  ;;  %v2431_v6 = vadd.f32 %v2430_v4, %v2429_v2 }
 0xfc9   :  { %v2421_v11 = vadd.f32 %v2420_v5, %v2419_v3  ;;  %v2432_v12 = vrot.slane %v2431_v6, 1 }
 0xfcb   :  { %v2422_v13 = vmul.f32 0.0625, %v2421_v11  ;;  %v2433_v18 = vadd.f32 %v2432_v12, %v2431_v6 }
 0xfcd   :  { %v2434_v7 = vmul.f32 0.0625, %v2433_v18  ;;  %v2435_v0 = vmul.f32 %v2422_v13, %v2422_v13 }
 0xfcf   :  { %v2436_v8 = vsub.f32 %v2434_v7, %v2435_v0 }
 0xfd1   :  { %v2437_v9 = vmax.f32 %v2436_v8, 0.0 }
 0xfd3   :  { %v2439_v10 = vadd.f32 1e-05, %v2437_v9 }
 0xfd5   :  { %3138 = vrsqrt.f32 %v2439_v10 }
 0xfdf   :  { %v3139_v15 = vpop.eup %3138 }
 0xfe0   :  { %v2441_v16 = vmul.f32 %v3139_v15, %v2438_v14 }
 0xfe2   :  { %v2443_v19 = vmul.f32 %v2441_v16, %v2422_v13  ;;  %v2449_v20 = vrot.slane %v2441_v16, %v4613_v45 }
 0xfe4   :  { %v2444_v25 = vsub.f32 %v2442_v17, %v2443_v19  ;;  %v2451_v21 = vmul.f32 %v2449_v20, %v2405_v49  ;;  %v2452_v22 = vmul.f32 %v2449_v20, %v2408_v50 }
 0xfe6   :  { %v2457_v23 = vrot.slane %v2444_v25, %v4613_v45 }
 0xfe8   :  { %v2459_v27 = vadd.f32 %v2457_v23, %v2451_v21  ;;  %v2460_v32 = vadd.f32 %v2457_v23, %v2452_v22 }
 0xfea   :  { %v2464_v33 = vmul.f32 %v2462_v24, %v2460_v32  ;;  %v2463_v28 = vmul.f32 %v2461_v26, %v2459_v27 }
 0xfec   :  { %v2465_v29 = vmax.f32 %v2463_v28, 0.0  ;;  %v2466_v30 = vmax.f32 %v2464_v33, 0.0 }
 0xfee   :  { %2467 = vst.msk [vmem:[#allocation61] sm:$0xff] %vm2412_vm5, %v2465_v29  ;;  %2468 = vst.msk [vmem:[#allocation61 + $0x8] sm:$0xff] %vm2412_vm5, %v2466_v30 }
 0xfef   :  { %3987 = shalt.err (!%p3984_p0)
}
 0xff0   :  { %s3988_s13 = scalar_lea.hbm %s4387_s4, 256 }
 0xff1   :  { %p3989_p1 = scmp.ne.s32.totalorder %s4387_s4, %s3988_s13  ;;  %p3992_p2 = scmp.lt.u32.totalorder %s3988_s13, %s4387_s4 }
 0xff3   :  { %p3994_p3 = pnand %p3992_p2, %p3989_p1 }
 0xff5   :  { %3997 = shalt.err (!%p3994_p3)
}
 0xff6   :  { %2480 = dma.vmem_to_hbm [thread:$0]  %s2475_s7, 256, %s4387_s4, [#allocation4], %s4096_s28, %s4096_s28, %s4097_s29  }
 0xff7   :  { %4038 = dma.done.wait [#allocation4], 256  }
 0xff8   :  { %4039 = vsyncadd [#allocation4], 4294967040 }
 0xff9   :  { %2484 = vsyncpa [#allocation3], 1 }
 0xffa   :  { %2485 = vsyncpa [#allocation6], 1 }
 0xffb   :  { %2486 = vsyncpa [#allocation9], 1 }
 0xffc   :  { %2487 = vsyncpa [#allocation12], 1 }
 0xffd   :  { %2488 = vsyncpa [#allocation15], 1 }
 0xffe   :  { %2489 = vsyncpa [#allocation18], 1 }
 0xfff   :  { %2490 = vsyncpa [#allocation21], 1 }
0x1000   :  { %2491 = vsyncpa [#allocation24], 1 }
0x1001   :  { %2492 = vsyncpa [#allocation27], 1 }
0x1002   :  { %2493 = vsyncpa [#allocation30], 1 }
0x1003   :  { %2494 = vsyncpa [#allocation33], 1 }
0x1004   :  { %2495 = vsyncpa [#allocation36], 1 }
0x1005   :  { %2496 = vsyncpa [#allocation39], 1 }
0x1006   :  { %2497 = vsyncpa [#allocation42], 1 }
0x1007   :  { %2498 = vsyncpa [#allocation45], 1 }
0x1008   :  { %2499 = vsyncpa [#allocation48], 1 }
0x1009   :  { %2500 = vsyncpa [#allocation51], 1 }
0x100a   :  { %2501 = vsyncpa [#allocation54], 1 }
0x100b   :  { %2502 = vsyncpa [#allocation57], 1 }
0x100c   :  { %2503 = vsyncpa [#allocation60], 1 }
0x100d   :  { %2504 = vsyncpa [#allocation4], 1 }

</bundles_post_ra>
